<compile_context>
chip_gen: v6e
topology: v6e:2x2x1
jax: 0.10.0
libtpu: 0.0.40
codegen_flags: <defaults>
</compile_context>

<pallas_src>
import functools

import jax
import jax.numpy as jnp
from jax.experimental import pallas as pl
from jax.experimental.pallas import tpu as pltpu


def _round_up(x, m):
    return (x + m - 1) // m * m


# --------------------------------------------------------------------------
# Pallas kernel 1: single-K-block matmul + bias (+ residual) + activation.
#   out = act(A @ B + bias [+ residual])
# --------------------------------------------------------------------------
def _matmul_fused_kernel(a_ref, b_ref, bias_ref, *rest, activation, has_residual):
    if has_residual:
        res_ref, o_ref = rest
    else:
        (o_ref,) = rest

    out = jnp.dot(a_ref[...], b_ref[...], preferred_element_type=jnp.float32)
    out = out + bias_ref[...]
    if has_residual:
        out = out + res_ref[...]
    if activation == "relu":
        out = jnp.maximum(out, 0.0)
    elif activation == "softplus":
        out = jnp.maximum(out, 0.0) + jnp.log1p(jnp.exp(-jnp.abs(out)))
    o_ref[...] = out.astype(o_ref.dtype)


def pallas_matmul_fused(a, b_padded, bias_padded, activation="none", residual=None):
    """a:(M,K) f32, b_padded:(Kp,Np), bias_padded:(1,Np) -> (Mp,Np) f32."""
    M, K = a.shape
    Kp, Np = b_padded.shape
    assert Np % 128 == 0 and Kp % 128 == 0

    Mp = _round_up(M, 128)
    tm = Mp if Mp <= 512 else 512
    Mp = _round_up(Mp, tm)
    tn = 128

    a = jnp.pad(a.astype(jnp.float32), ((0, Mp - M), (0, Kp - K)))

    in_specs = [
        pl.BlockSpec((tm, Kp), lambda i, j: (i, 0)),   # A: full K in one block
        pl.BlockSpec((Kp, tn), lambda i, j: (0, j)),   # B
        pl.BlockSpec((1, tn), lambda i, j: (0, j)),    # bias row
    ]
    args = [a, b_padded, bias_padded]

    has_residual = residual is not None
    if has_residual:
        rM, rN = residual.shape
        resp = jnp.pad(residual.astype(jnp.float32),
                       ((0, Mp - rM), (0, Np - rN)))
        in_specs.append(pl.BlockSpec((tm, tn), lambda i, j: (i, j)))
        args.append(resp)

    kernel = functools.partial(_matmul_fused_kernel,
                               activation=activation,
                               has_residual=has_residual)
    out = pl.pallas_call(
        kernel,
        out_shape=jax.ShapeDtypeStruct((Mp, Np), jnp.float32),
        grid_spec=pltpu.PrefetchScalarGridSpec(
            num_scalar_prefetch=0,
            grid=(Mp // tm, Np // tn),
            in_specs=in_specs,
            out_specs=pl.BlockSpec((tm, tn), lambda i, j: (i, j)),
        ),
        compiler_params=pltpu.CompilerParams(
            dimension_semantics=("parallel", "parallel")),
    )(*args)
    return out


# --------------------------------------------------------------------------
# Pallas kernel 2: guided fusion (lane-dense (rows,128) slab)
#   c = softplus(c_raw);  alpha = c_rgb * reciprocal(c_rgb + c_dep + 1e-6)
#   xout = (1 - alpha) * x_dep + alpha * x_rgb
# --------------------------------------------------------------------------
def _fusion_kernel(xd_ref, cd_ref, xr_ref, cr_ref, xout_ref, cdep_ref, alpha_ref):
    def softplus(v):
        return jnp.maximum(v, 0.0) + jnp.log1p(jnp.exp(-jnp.abs(v)))

    c_dep = softplus(cd_ref[...])
    c_rgb = softplus(cr_ref[...])
    alpha = c_rgb * pl.reciprocal(c_rgb + c_dep + 1e-6, approx=True)
    xout_ref[...] = (1.0 - alpha) * xd_ref[...] + alpha * xr_ref[...]
    cdep_ref[...] = c_dep
    alpha_ref[...] = alpha


def pallas_guided_fusion(x_dep, c_dep_raw, x_rgb, c_rgb_raw):
    shape = x_dep.shape  # (rows, 128) lane-dense
    vm = pl.BlockSpec(memory_space=pltpu.MemorySpace.VMEM)
    return pl.pallas_call(
        _fusion_kernel,
        out_shape=tuple(jax.ShapeDtypeStruct(shape, jnp.float32) for _ in range(3)),
        in_specs=[vm, vm, vm, vm],
        out_specs=(vm, vm, vm),
    )(x_dep, c_dep_raw, x_rgb, c_rgb_raw)


# --------------------------------------------------------------------------
# Conv2d = im2col (XLA glue) + Pallas fused matmul kernel.
# --------------------------------------------------------------------------
def _im2col(x, kh, kw, stride, pad):
    N, H, W, C = x.shape
    xp = jnp.pad(x, ((0, 0), (pad, pad), (pad, pad), (0, 0)))
    Ho = (H + 2 * pad - kh) // stride + 1
    Wo = (W + 2 * pad - kw) // stride + 1
    cols = []
    for i in range(kh):
        for j in range(kw):
            cols.append(xp[:, i:i + stride * Ho:stride, j:j + stride * Wo:stride, :])
    patches = jnp.stack(cols, axis=-1)                 # (N,Ho,Wo,C,kh*kw)
    patches = patches.reshape(N, Ho, Wo, C * kh * kw)  # K order = (c, ki, kj)
    return patches, Ho, Wo


def conv2d(x, layer, stride=1, pad=1, activation="none", residual=None):
    kh, kw, cout = layer["kh"], layer["kw"], layer["cout"]
    patches, Ho, Wo = _im2col(x, kh, kw, stride, pad)
    N = x.shape[0]
    M = N * Ho * Wo
    A = patches.reshape(M, -1)
    res2d = None
    if residual is not None:
        res2d = residual.reshape(M, -1)
    out = pallas_matmul_fused(A, layer["w"], layer["b"],
                              activation=activation, residual=res2d)
    out = out[:M, :cout]
    return out.reshape(N, Ho, Wo, cout)


# --------------------------------------------------------------------------
# Synthesized RESNET18_UNETModel (activation='softplus' on confidence).
# --------------------------------------------------------------------------
def resnet18_unet_forward(p, x_nhwc):
    f1 = conv2d(x_nhwc, p["conv1"], 1, 1, "relu")                   # (N,16,16,16)
    f2 = conv2d(f1, p["conv2"], 2, 1, "relu")                       # (N, 8, 8,32)
    r = conv2d(f2, p["conv3"], 1, 1, "relu")
    f3 = conv2d(r, p["conv4"], 1, 1, "relu", residual=f2)           # fused res+relu
    up = jnp.repeat(jnp.repeat(f3, 2, axis=1), 2, axis=2)           # nearest 2x
    cat = jnp.concatenate([up, f1], axis=-1)                        # (N,16,16,48)
    d1 = conv2d(cat, p["conv5"], 1, 1, "relu")                      # (N,16,16,16)
    head = conv2d(d1, p["head"], 1, 0, "none")                      # (N,16,16, 2)
    pred = head[..., 0:1]
    conf_raw = head[..., 1:2]                                       # softplus in fusion
    return pred, conf_raw


# --------------------------------------------------------------------------
# GUIDEDRESNET18Model forward.
# --------------------------------------------------------------------------
def guided_resnet18_forward(prepared, sample_nchw):
    x = jnp.transpose(sample_nchw, (0, 2, 3, 1)).astype(jnp.float32)  # NCHW -> NHWC

    # Faithful to the PyTorch forward: rgb_unet is applied to the same sample
    # for BOTH branches; outputs are identical, so compute once and reuse
    # (explicit dedupe instead of relying on XLA CSE across pallas_calls).
    pred, conf_raw = resnet18_unet_forward(prepared["rgb_unet"], x)
    x_dep, c_dep_raw = pred, conf_raw
    x_rgb, c_rgb_raw = pred, conf_raw

    N, H, W, _ = x_dep.shape
    total = N * H * W
    totp = _round_up(total, 128)

    def to2d(t):
        v = t.reshape(total)
        if totp != total:
            v = jnp.pad(v, (0, totp - total))
        return v.reshape(totp // 128, 128)

    xout2, cdep2, alpha2 = pallas_guided_fusion(
        to2d(x_dep), to2d(c_dep_raw), to2d(x_rgb), to2d(c_rgb_raw))

    def from2d(t):
        return t.reshape(totp)[:total].reshape(N, H, W, 1)

    nchw = lambda t: jnp.transpose(t, (0, 3, 1, 2))
    return {
        "pred": nchw(from2d(xout2)),
        "confidence": nchw(from2d(cdep2)),
        "confidence_rgb": nchw(from2d(alpha2)),
        "pred_rgb": nchw(x_rgb),
    }


# --------------------------------------------------------------------------
# Deterministic parameter init + one-time padding to MXU-friendly layout.
# --------------------------------------------------------------------------
def init_params(key):
    def conv_init(k, o, i, kh, kw):
        k1, k2 = jax.random.split(k)
        fan_in = i * kh * kw
        w = jax.random.normal(k1, (o, i, kh, kw), jnp.float32) / jnp.sqrt(float(fan_in))
        b = jax.random.normal(k2, (o,), jnp.float32) * 0.01
        return w, b

    keys = jax.random.split(key, 6)
    p = {}
    p["conv1"] = conv_init(keys[0], 16, 3, 3, 3)
    p["conv2"] = conv_init(keys[1], 32, 16, 3, 3)
    p["conv3"] = conv_init(keys[2], 32, 32, 3, 3)
    p["conv4"] = conv_init(keys[3], 32, 32, 3, 3)
    p["conv5"] = conv_init(keys[4], 16, 48, 3, 3)
    p["head"] = conv_init(keys[5], 2, 16, 1, 1)
    return {"rgb_unet": p}


def prepare_params(params):
    """Pre-pad OIHW weights to (Kp,128k) matmul matrices and biases to (1,128k)."""
    def prep(w_oihw, bias):
        O, I, kh, kw = w_oihw.shape
        K = I * kh * kw
        Kp = _round_up(K, 128)
        Np = _round_up(O, 128)
        B = w_oihw.reshape(O, K).T                     # (K, O), matches im2col K order
        Bp = jnp.pad(B.astype(jnp.float32), ((0, Kp - K), (0, Np - O)))
        bp = jnp.pad(bias.astype(jnp.float32).reshape(1, -1), ((0, 0), (0, Np - O)))
        return {"w": Bp, "b": bp, "kh": kh, "kw": kw, "cout": O}

    return {"rgb_unet": {name: prep(w, b)
                         for name, (w, b) in params["rgb_unet"].items()}}


if __name__ == "__main__":
    key = jax.random.PRNGKey(0)
    pkey, xkey = jax.random.split(key)
    params = init_params(pkey)
    prepared = prepare_params(params)
    sample = jax.random.normal(xkey, (2, 3, 16, 16), jnp.float32)  # NCHW RGB input

    fwd = jax.jit(lambda s: guided_resnet18_forward(prepared, s))
    out = fwd(sample)
    jax.block_until_ready(out)

    assert out["pred"].shape == (2, 1, 16, 16)
    assert out["confidence"].shape == (2, 1, 16, 16)
    assert out["confidence_rgb"].shape == (2, 1, 16, 16)
    assert out["pred_rgb"].shape == (2, 1, 16, 16)
    for v in out.values():
        assert bool(jnp.all(jnp.isfinite(v)))
    # Both branches use rgb_unet on the same sample -> alpha ~= 0.5, pred == pred_rgb
    assert bool(jnp.allclose(out["pred"], out["pred_rgb"], atol=1e-5))

    print("KERNEL_OK")
</pallas_src>

<mosaic_0001>
module attributes {stable_mosaic.version = 11 : i64} {
  func.func @_matmul_fused_kernel(%arg0: i32, %arg1: i32, %arg2: memref<512x128xf32, #tpu.memory_space<vmem>>, %arg3: memref<128x128xf32, #tpu.memory_space<vmem>>, %arg4: memref<1x128xf32, #tpu.memory_space<vmem>>, %arg5: memref<512x128xf32, #tpu.memory_space<vmem>>) attributes {dimension_semantics = [#tpu.dimension_semantics<parallel>, #tpu.dimension_semantics<parallel>], iteration_bounds = array<i64: 1, 1>, scalar_prefetch = 0 : i64, scratch_operands = 0 : i64, tpu.core_type = #tpu.core_type<tc>, window_params = [{transform_indices = @transform_0, window_bounds = array<i64: 512, 128>}, {transform_indices = @transform_1, window_bounds = array<i64: 128, 128>}, {transform_indices = @transform_2, window_bounds = array<i64: 1, 128>}, {transform_indices = @transform_3, window_bounds = array<i64: 512, 128>}]} {
    %c0 = arith.constant 0 : index
    %c0_0 = arith.constant 0 : index
    %0 = vector.load %arg2[%c0, %c0_0] : memref<512x128xf32, #tpu.memory_space<vmem>>, vector<512x128xf32>
    %c0_1 = arith.constant 0 : index
    %c0_2 = arith.constant 0 : index
    %1 = vector.load %arg3[%c0_1, %c0_2] : memref<128x128xf32, #tpu.memory_space<vmem>>, vector<128x128xf32>
    %cst = arith.constant dense<0.000000e+00> : vector<512x128xf32>
    %2 = tpu.matmul %0, %1, %cst {dimension_numbers = #tpu.dot_dimension_numbers<[1], [0], [0], [1], [0, 0, 1, 1], [], []>} : vector<512x128xf32>, vector<128x128xf32>, vector<512x128xf32> -> vector<512x128xf32>
    %c0_3 = arith.constant 0 : index
    %c0_4 = arith.constant 0 : index
    %3 = vector.load %arg4[%c0_3, %c0_4] : memref<1x128xf32, #tpu.memory_space<vmem>>, vector<1x128xf32>
    %4 = vector.broadcast %3 : vector<1x128xf32> to vector<512x128xf32>
    %5 = arith.addf %2, %4 : vector<512x128xf32>
    %cst_5 = arith.constant 0.000000e+00 : f32
    %6 = vector.broadcast %cst_5 : f32 to vector<512x128xf32>
    %7 = arith.maximumf %5, %6 : vector<512x128xf32>
    %c0_6 = arith.constant 0 : index
    %c0_7 = arith.constant 0 : index
    %8 = vector.load %arg5[%c0_6, %c0_7] : memref<512x128xf32, #tpu.memory_space<vmem>>, vector<512x128xf32>
    tpu.vector_store %arg5[%c0_6, %c0_7], %7 {strides = array<i32>} : memref<512x128xf32, #tpu.memory_space<vmem>>, vector<512x128xf32>,
    return
  }
  func.func @transform_0(%arg0: i32, %arg1: i32) -> (i32, i32) {
    %c0_i32 = arith.constant 0 : i32
    %c0_i32_0 = arith.constant 0 : i32
    return %arg0, %c0_i32 : i32, i32
  }
  func.func @transform_1(%arg0: i32, %arg1: i32) -> (i32, i32) {
    %c0_i32 = arith.constant 0 : i32
    %c0_i32_0 = arith.constant 0 : i32
    return %c0_i32, %arg1 : i32, i32
  }
  func.func @transform_2(%arg0: i32, %arg1: i32) -> (i32, i32) {
    %c0_i32 = arith.constant 0 : i32
    %c0_i32_0 = arith.constant 0 : i32
    return %c0_i32, %arg1 : i32, i32
  }
  func.func @transform_3(%arg0: i32, %arg1: i32) -> (i32, i32) {
    %c0_i32 = arith.constant 0 : i32
    return %arg0, %arg1 : i32, i32
  }
}

module attributes {stable_mosaic.version = 11 : i64} {
  func.func @_matmul_fused_kernel(%arg0: i32, %arg1: i32, %arg2: memref<128x256xf32, #tpu.memory_space<vmem>>, %arg3: memref<256x128xf32, #tpu.memory_space<vmem>>, %arg4: memref<1x128xf32, #tpu.memory_space<vmem>>, %arg5: memref<128x128xf32, #tpu.memory_space<vmem>>) attributes {dimension_semantics = [#tpu.dimension_semantics<parallel>, #tpu.dimension_semantics<parallel>], iteration_bounds = array<i64: 1, 1>, scalar_prefetch = 0 : i64, scratch_operands = 0 : i64, tpu.core_type = #tpu.core_type<tc>, window_params = [{transform_indices = @transform_0, window_bounds = array<i64: 128, 256>}, {transform_indices = @transform_1, window_bounds = array<i64: 256, 128>}, {transform_indices = @transform_2, window_bounds = array<i64: 1, 128>}, {transform_indices = @transform_3, window_bounds = array<i64: 128, 128>}]} {
    %c0 = arith.constant 0 : index
    %c0_0 = arith.constant 0 : index
    %0 = vector.load %arg2[%c0, %c0_0] : memref<128x256xf32, #tpu.memory_space<vmem>>, vector<128x256xf32>
    %c0_1 = arith.constant 0 : index
    %c0_2 = arith.constant 0 : index
    %1 = vector.load %arg3[%c0_1, %c0_2] : memref<256x128xf32, #tpu.memory_space<vmem>>, vector<256x128xf32>
    %cst = arith.constant dense<0.000000e+00> : vector<128x128xf32>
    %2 = tpu.matmul %0, %1, %cst {dimension_numbers = #tpu.dot_dimension_numbers<[1], [0], [0], [1], [0, 0, 1, 1], [], []>} : vector<128x256xf32>, vector<256x128xf32>, vector<128x128xf32> -> vector<128x128xf32>
    %c0_3 = arith.constant 0 : index
    %c0_4 = arith.constant 0 : index
    %3 = vector.load %arg4[%c0_3, %c0_4] : memref<1x128xf32, #tpu.memory_space<vmem>>, vector<1x128xf32>
    %4 = vector.broadcast %3 : vector<1x128xf32> to vector<128x128xf32>
    %5 = arith.addf %2, %4 : vector<128x128xf32>
    %cst_5 = arith.constant 0.000000e+00 : f32
    %6 = vector.broadcast %cst_5 : f32 to vector<128x128xf32>
    %7 = arith.maximumf %5, %6 : vector<128x128xf32>
    %c0_6 = arith.constant 0 : index
    %c0_7 = arith.constant 0 : index
    %8 = vector.load %arg5[%c0_6, %c0_7] : memref<128x128xf32, #tpu.memory_space<vmem>>, vector<128x128xf32>
    tpu.vector_store %arg5[%c0_6, %c0_7], %7 {strides = array<i32>} : memref<128x128xf32, #tpu.memory_space<vmem>>, vector<128x128xf32>,
    return
  }
  func.func @transform_0(%arg0: i32, %arg1: i32) -> (i32, i32) {
    %c0_i32 = arith.constant 0 : i32
    %c0_i32_0 = arith.constant 0 : i32
    return %arg0, %c0_i32 : i32, i32
  }
  func.func @transform_1(%arg0: i32, %arg1: i32) -> (i32, i32) {
    %c0_i32 = arith.constant 0 : i32
    %c0_i32_0 = arith.constant 0 : i32
    return %c0_i32, %arg1 : i32, i32
  }
  func.func @transform_2(%arg0: i32, %arg1: i32) -> (i32, i32) {
    %c0_i32 = arith.constant 0 : i32
    %c0_i32_0 = arith.constant 0 : i32
    return %c0_i32, %arg1 : i32, i32
  }
  func.func @transform_3(%arg0: i32, %arg1: i32) -> (i32, i32) {
    %c0_i32 = arith.constant 0 : i32
    return %arg0, %arg1 : i32, i32
  }
}

module attributes {stable_mosaic.version = 11 : i64} {
  func.func @_matmul_fused_kernel(%arg0: i32, %arg1: i32, %arg2: memref<128x384xf32, #tpu.memory_space<vmem>>, %arg3: memref<384x128xf32, #tpu.memory_space<vmem>>, %arg4: memref<1x128xf32, #tpu.memory_space<vmem>>, %arg5: memref<128x128xf32, #tpu.memory_space<vmem>>) attributes {dimension_semantics = [#tpu.dimension_semantics<parallel>, #tpu.dimension_semantics<parallel>], iteration_bounds = array<i64: 1, 1>, scalar_prefetch = 0 : i64, scratch_operands = 0 : i64, tpu.core_type = #tpu.core_type<tc>, window_params = [{transform_indices = @transform_0, window_bounds = array<i64: 128, 384>}, {transform_indices = @transform_1, window_bounds = array<i64: 384, 128>}, {transform_indices = @transform_2, window_bounds = array<i64: 1, 128>}, {transform_indices = @transform_3, window_bounds = array<i64: 128, 128>}]} {
    %c0 = arith.constant 0 : index
    %c0_0 = arith.constant 0 : index
    %0 = vector.load %arg2[%c0, %c0_0] : memref<128x384xf32, #tpu.memory_space<vmem>>, vector<128x384xf32>
    %c0_1 = arith.constant 0 : index
    %c0_2 = arith.constant 0 : index
    %1 = vector.load %arg3[%c0_1, %c0_2] : memref<384x128xf32, #tpu.memory_space<vmem>>, vector<384x128xf32>
    %cst = arith.constant dense<0.000000e+00> : vector<128x128xf32>
    %2 = tpu.matmul %0, %1, %cst {dimension_numbers = #tpu.dot_dimension_numbers<[1], [0], [0], [1], [0, 0, 1, 1], [], []>} : vector<128x384xf32>, vector<384x128xf32>, vector<128x128xf32> -> vector<128x128xf32>
    %c0_3 = arith.constant 0 : index
    %c0_4 = arith.constant 0 : index
    %3 = vector.load %arg4[%c0_3, %c0_4] : memref<1x128xf32, #tpu.memory_space<vmem>>, vector<1x128xf32>
    %4 = vector.broadcast %3 : vector<1x128xf32> to vector<128x128xf32>
    %5 = arith.addf %2, %4 : vector<128x128xf32>
    %cst_5 = arith.constant 0.000000e+00 : f32
    %6 = vector.broadcast %cst_5 : f32 to vector<128x128xf32>
    %7 = arith.maximumf %5, %6 : vector<128x128xf32>
    %c0_6 = arith.constant 0 : index
    %c0_7 = arith.constant 0 : index
    %8 = vector.load %arg5[%c0_6, %c0_7] : memref<128x128xf32, #tpu.memory_space<vmem>>, vector<128x128xf32>
    tpu.vector_store %arg5[%c0_6, %c0_7], %7 {strides = array<i32>} : memref<128x128xf32, #tpu.memory_space<vmem>>, vector<128x128xf32>,
    return
  }
  func.func @transform_0(%arg0: i32, %arg1: i32) -> (i32, i32) {
    %c0_i32 = arith.constant 0 : i32
    %c0_i32_0 = arith.constant 0 : i32
    return %arg0, %c0_i32 : i32, i32
  }
  func.func @transform_1(%arg0: i32, %arg1: i32) -> (i32, i32) {
    %c0_i32 = arith.constant 0 : i32
    %c0_i32_0 = arith.constant 0 : i32
    return %c0_i32, %arg1 : i32, i32
  }
  func.func @transform_2(%arg0: i32, %arg1: i32) -> (i32, i32) {
    %c0_i32 = arith.constant 0 : i32
    %c0_i32_0 = arith.constant 0 : i32
    return %c0_i32, %arg1 : i32, i32
  }
  func.func @transform_3(%arg0: i32, %arg1: i32) -> (i32, i32) {
    %c0_i32 = arith.constant 0 : i32
    return %arg0, %arg1 : i32, i32
  }
}

module attributes {stable_mosaic.version = 11 : i64} {
  func.func @_matmul_fused_kernel(%arg0: i32, %arg1: i32, %arg2: memref<128x384xf32, #tpu.memory_space<vmem>>, %arg3: memref<384x128xf32, #tpu.memory_space<vmem>>, %arg4: memref<1x128xf32, #tpu.memory_space<vmem>>, %arg5: memref<128x128xf32, #tpu.memory_space<vmem>>, %arg6: memref<128x128xf32, #tpu.memory_space<vmem>>) attributes {dimension_semantics = [#tpu.dimension_semantics<parallel>, #tpu.dimension_semantics<parallel>], iteration_bounds = array<i64: 1, 1>, scalar_prefetch = 0 : i64, scratch_operands = 0 : i64, tpu.core_type = #tpu.core_type<tc>, window_params = [{transform_indices = @transform_0, window_bounds = array<i64: 128, 384>}, {transform_indices = @transform_1, window_bounds = array<i64: 384, 128>}, {transform_indices = @transform_2, window_bounds = array<i64: 1, 128>}, {transform_indices = @transform_3, window_bounds = array<i64: 128, 128>}, {transform_indices = @transform_4, window_bounds = array<i64: 128, 128>}]} {
    %c0 = arith.constant 0 : index
    %c0_0 = arith.constant 0 : index
    %0 = vector.load %arg2[%c0, %c0_0] : memref<128x384xf32, #tpu.memory_space<vmem>>, vector<128x384xf32>
    %c0_1 = arith.constant 0 : index
    %c0_2 = arith.constant 0 : index
    %1 = vector.load %arg3[%c0_1, %c0_2] : memref<384x128xf32, #tpu.memory_space<vmem>>, vector<384x128xf32>
    %cst = arith.constant dense<0.000000e+00> : vector<128x128xf32>
    %2 = tpu.matmul %0, %1, %cst {dimension_numbers = #tpu.dot_dimension_numbers<[1], [0], [0], [1], [0, 0, 1, 1], [], []>} : vector<128x384xf32>, vector<384x128xf32>, vector<128x128xf32> -> vector<128x128xf32>
    %c0_3 = arith.constant 0 : index
    %c0_4 = arith.constant 0 : index
    %3 = vector.load %arg4[%c0_3, %c0_4] : memref<1x128xf32, #tpu.memory_space<vmem>>, vector<1x128xf32>
    %4 = vector.broadcast %3 : vector<1x128xf32> to vector<128x128xf32>
    %5 = arith.addf %2, %4 : vector<128x128xf32>
    %c0_5 = arith.constant 0 : index
    %c0_6 = arith.constant 0 : index
    %6 = vector.load %arg5[%c0_5, %c0_6] : memref<128x128xf32, #tpu.memory_space<vmem>>, vector<128x128xf32>
    %7 = arith.addf %5, %6 : vector<128x128xf32>
    %cst_7 = arith.constant 0.000000e+00 : f32
    %8 = vector.broadcast %cst_7 : f32 to vector<128x128xf32>
    %9 = arith.maximumf %7, %8 : vector<128x128xf32>
    %c0_8 = arith.constant 0 : index
    %c0_9 = arith.constant 0 : index
    %10 = vector.load %arg6[%c0_8, %c0_9] : memref<128x128xf32, #tpu.memory_space<vmem>>, vector<128x128xf32>
    tpu.vector_store %arg6[%c0_8, %c0_9], %9 {strides = array<i32>} : memref<128x128xf32, #tpu.memory_space<vmem>>, vector<128x128xf32>,
    return
  }
  func.func @transform_0(%arg0: i32, %arg1: i32) -> (i32, i32) {
    %c0_i32 = arith.constant 0 : i32
    %c0_i32_0 = arith.constant 0 : i32
    return %arg0, %c0_i32 : i32, i32
  }
  func.func @transform_1(%arg0: i32, %arg1: i32) -> (i32, i32) {
    %c0_i32 = arith.constant 0 : i32
    %c0_i32_0 = arith.constant 0 : i32
    return %c0_i32, %arg1 : i32, i32
  }
  func.func @transform_2(%arg0: i32, %arg1: i32) -> (i32, i32) {
    %c0_i32 = arith.constant 0 : i32
    %c0_i32_0 = arith.constant 0 : i32
    return %c0_i32, %arg1 : i32, i32
  }
  func.func @transform_3(%arg0: i32, %arg1: i32) -> (i32, i32) {
    %c0_i32 = arith.constant 0 : i32
    return %arg0, %arg1 : i32, i32
  }
  func.func @transform_4(%arg0: i32, %arg1: i32) -> (i32, i32) {
    %c0_i32 = arith.constant 0 : i32
    return %arg0, %arg1 : i32, i32
  }
}

module attributes {stable_mosaic.version = 11 : i64} {
  func.func @_matmul_fused_kernel(%arg0: i32, %arg1: i32, %arg2: memref<512x512xf32, #tpu.memory_space<vmem>>, %arg3: memref<512x128xf32, #tpu.memory_space<vmem>>, %arg4: memref<1x128xf32, #tpu.memory_space<vmem>>, %arg5: memref<512x128xf32, #tpu.memory_space<vmem>>) attributes {dimension_semantics = [#tpu.dimension_semantics<parallel>, #tpu.dimension_semantics<parallel>], iteration_bounds = array<i64: 1, 1>, scalar_prefetch = 0 : i64, scratch_operands = 0 : i64, tpu.core_type = #tpu.core_type<tc>, window_params = [{transform_indices = @transform_0, window_bounds = array<i64: 512, 512>}, {transform_indices = @transform_1, window_bounds = array<i64: 512, 128>}, {transform_indices = @transform_2, window_bounds = array<i64: 1, 128>}, {transform_indices = @transform_3, window_bounds = array<i64: 512, 128>}]} {
    %c0 = arith.constant 0 : index
    %c0_0 = arith.constant 0 : index
    %0 = vector.load %arg2[%c0, %c0_0] : memref<512x512xf32, #tpu.memory_space<vmem>>, vector<512x512xf32>
    %c0_1 = arith.constant 0 : index
    %c0_2 = arith.constant 0 : index
    %1 = vector.load %arg3[%c0_1, %c0_2] : memref<512x128xf32, #tpu.memory_space<vmem>>, vector<512x128xf32>
    %cst = arith.constant dense<0.000000e+00> : vector<512x128xf32>
    %2 = tpu.matmul %0, %1, %cst {dimension_numbers = #tpu.dot_dimension_numbers<[1], [0], [0], [1], [0, 0, 1, 1], [], []>} : vector<512x512xf32>, vector<512x128xf32>, vector<512x128xf32> -> vector<512x128xf32>
    %c0_3 = arith.constant 0 : index
    %c0_4 = arith.constant 0 : index
    %3 = vector.load %arg4[%c0_3, %c0_4] : memref<1x128xf32, #tpu.memory_space<vmem>>, vector<1x128xf32>
    %4 = vector.broadcast %3 : vector<1x128xf32> to vector<512x128xf32>
    %5 = arith.addf %2, %4 : vector<512x128xf32>
    %cst_5 = arith.constant 0.000000e+00 : f32
    %6 = vector.broadcast %cst_5 : f32 to vector<512x128xf32>
    %7 = arith.maximumf %5, %6 : vector<512x128xf32>
    %c0_6 = arith.constant 0 : index
    %c0_7 = arith.constant 0 : index
    %8 = vector.load %arg5[%c0_6, %c0_7] : memref<512x128xf32, #tpu.memory_space<vmem>>, vector<512x128xf32>
    tpu.vector_store %arg5[%c0_6, %c0_7], %7 {strides = array<i32>} : memref<512x128xf32, #tpu.memory_space<vmem>>, vector<512x128xf32>,
    return
  }
  func.func @transform_0(%arg0: i32, %arg1: i32) -> (i32, i32) {
    %c0_i32 = arith.constant 0 : i32
    %c0_i32_0 = arith.constant 0 : i32
    return %arg0, %c0_i32 : i32, i32
  }
  func.func @transform_1(%arg0: i32, %arg1: i32) -> (i32, i32) {
    %c0_i32 = arith.constant 0 : i32
    %c0_i32_0 = arith.constant 0 : i32
    return %c0_i32, %arg1 : i32, i32
  }
  func.func @transform_2(%arg0: i32, %arg1: i32) -> (i32, i32) {
    %c0_i32 = arith.constant 0 : i32
    %c0_i32_0 = arith.constant 0 : i32
    return %c0_i32, %arg1 : i32, i32
  }
  func.func @transform_3(%arg0: i32, %arg1: i32) -> (i32, i32) {
    %c0_i32 = arith.constant 0 : i32
    return %arg0, %arg1 : i32, i32
  }
}

module attributes {stable_mosaic.version = 11 : i64} {
  func.func @_matmul_fused_kernel(%arg0: i32, %arg1: i32, %arg2: memref<512x128xf32, #tpu.memory_space<vmem>>, %arg3: memref<128x128xf32, #tpu.memory_space<vmem>>, %arg4: memref<1x128xf32, #tpu.memory_space<vmem>>, %arg5: memref<512x128xf32, #tpu.memory_space<vmem>>) attributes {dimension_semantics = [#tpu.dimension_semantics<parallel>, #tpu.dimension_semantics<parallel>], iteration_bounds = array<i64: 1, 1>, scalar_prefetch = 0 : i64, scratch_operands = 0 : i64, tpu.core_type = #tpu.core_type<tc>, window_params = [{transform_indices = @transform_0, window_bounds = array<i64: 512, 128>}, {transform_indices = @transform_1, window_bounds = array<i64: 128, 128>}, {transform_indices = @transform_2, window_bounds = array<i64: 1, 128>}, {transform_indices = @transform_3, window_bounds = array<i64: 512, 128>}]} {
    %c0 = arith.constant 0 : index
    %c0_0 = arith.constant 0 : index
    %0 = vector.load %arg2[%c0, %c0_0] : memref<512x128xf32, #tpu.memory_space<vmem>>, vector<512x128xf32>
    %c0_1 = arith.constant 0 : index
    %c0_2 = arith.constant 0 : index
    %1 = vector.load %arg3[%c0_1, %c0_2] : memref<128x128xf32, #tpu.memory_space<vmem>>, vector<128x128xf32>
    %cst = arith.constant dense<0.000000e+00> : vector<512x128xf32>
    %2 = tpu.matmul %0, %1, %cst {dimension_numbers = #tpu.dot_dimension_numbers<[1], [0], [0], [1], [0, 0, 1, 1], [], []>} : vector<512x128xf32>, vector<128x128xf32>, vector<512x128xf32> -> vector<512x128xf32>
    %c0_3 = arith.constant 0 : index
    %c0_4 = arith.constant 0 : index
    %3 = vector.load %arg4[%c0_3, %c0_4] : memref<1x128xf32, #tpu.memory_space<vmem>>, vector<1x128xf32>
    %4 = vector.broadcast %3 : vector<1x128xf32> to vector<512x128xf32>
    %5 = arith.addf %2, %4 : vector<512x128xf32>
    %c0_5 = arith.constant 0 : index
    %c0_6 = arith.constant 0 : index
    %6 = vector.load %arg5[%c0_5, %c0_6] : memref<512x128xf32, #tpu.memory_space<vmem>>, vector<512x128xf32>
    tpu.vector_store %arg5[%c0_5, %c0_6], %5 {strides = array<i32>} : memref<512x128xf32, #tpu.memory_space<vmem>>, vector<512x128xf32>,
    return
  }
  func.func @transform_0(%arg0: i32, %arg1: i32) -> (i32, i32) {
    %c0_i32 = arith.constant 0 : i32
    %c0_i32_0 = arith.constant 0 : i32
    return %arg0, %c0_i32 : i32, i32
  }
  func.func @transform_1(%arg0: i32, %arg1: i32) -> (i32, i32) {
    %c0_i32 = arith.constant 0 : i32
    %c0_i32_0 = arith.constant 0 : i32
    return %c0_i32, %arg1 : i32, i32
  }
  func.func @transform_2(%arg0: i32, %arg1: i32) -> (i32, i32) {
    %c0_i32 = arith.constant 0 : i32
    %c0_i32_0 = arith.constant 0 : i32
    return %c0_i32, %arg1 : i32, i32
  }
  func.func @transform_3(%arg0: i32, %arg1: i32) -> (i32, i32) {
    %c0_i32 = arith.constant 0 : i32
    return %arg0, %arg1 : i32, i32
  }
}

module attributes {stable_mosaic.version = 11 : i64} {
  func.func @_fusion_kernel(%arg0: memref<4x128xf32, #tpu.memory_space<vmem>>, %arg1: memref<4x128xf32, #tpu.memory_space<vmem>>, %arg2: memref<4x128xf32, #tpu.memory_space<vmem>>, %arg3: memref<4x128xf32, #tpu.memory_space<vmem>>, %arg4: memref<4x128xf32, #tpu.memory_space<vmem>>, %arg5: memref<4x128xf32, #tpu.memory_space<vmem>>, %arg6: memref<4x128xf32, #tpu.memory_space<vmem>>) attributes {dimension_semantics = [], scalar_prefetch = 0 : i64, scratch_operands = 0 : i64, tpu.core_type = #tpu.core_type<tc>} {
    %c0 = arith.constant 0 : index
    %c0_0 = arith.constant 0 : index
    %0 = vector.load %arg1[%c0, %c0_0] : memref<4x128xf32, #tpu.memory_space<vmem>>, vector<4x128xf32>
    %cst = arith.constant 0.000000e+00 : f32
    %1 = vector.broadcast %cst : f32 to vector<4x128xf32>
    %2 = arith.maximumf %0, %1 : vector<4x128xf32>
    %3 = math.absf %0 : vector<4x128xf32>
    %cst_1 = arith.constant 0.000000e+00 : f32
    %4 = vector.broadcast %cst_1 : f32 to vector<4x128xf32>
    %5 = arith.subf %4, %3 : vector<4x128xf32>
    %6 = math.exp %5 : vector<4x128xf32>
    %7 = math.log1p %6 : vector<4x128xf32>
    %8 = arith.addf %2, %7 : vector<4x128xf32>
    %c0_2 = arith.constant 0 : index
    %c0_3 = arith.constant 0 : index
    %9 = vector.load %arg3[%c0_2, %c0_3] : memref<4x128xf32, #tpu.memory_space<vmem>>, vector<4x128xf32>
    %cst_4 = arith.constant 0.000000e+00 : f32
    %10 = vector.broadcast %cst_4 : f32 to vector<4x128xf32>
    %11 = arith.maximumf %9, %10 : vector<4x128xf32>
    %12 = math.absf %9 : vector<4x128xf32>
    %cst_5 = arith.constant 0.000000e+00 : f32
    %13 = vector.broadcast %cst_5 : f32 to vector<4x128xf32>
    %14 = arith.subf %13, %12 : vector<4x128xf32>
    %15 = math.exp %14 : vector<4x128xf32>
    %16 = math.log1p %15 : vector<4x128xf32>
    %17 = arith.addf %11, %16 : vector<4x128xf32>
    %18 = arith.addf %17, %8 : vector<4x128xf32>
    %cst_6 = arith.constant 9.99999997E-7 : f32
    %19 = vector.broadcast %cst_6 : f32 to vector<4x128xf32>
    %20 = arith.addf %18, %19 : vector<4x128xf32>
    %21 = tpu.reciprocal %20 {approx = true} : vector<4x128xf32> -> vector<4x128xf32>
    %22 = arith.mulf %17, %21 : vector<4x128xf32>
    %cst_7 = arith.constant 1.000000e+00 : f32
    %23 = vector.broadcast %cst_7 : f32 to vector<4x128xf32>
    %24 = arith.subf %23, %22 : vector<4x128xf32>
    %c0_8 = arith.constant 0 : index
    %c0_9 = arith.constant 0 : index
    %25 = vector.load %arg0[%c0_8, %c0_9] : memref<4x128xf32, #tpu.memory_space<vmem>>, vector<4x128xf32>
    %26 = arith.mulf %24, %25 : vector<4x128xf32>
    %c0_10 = arith.constant 0 : index
    %c0_11 = arith.constant 0 : index
    %27 = vector.load %arg2[%c0_10, %c0_11] : memref<4x128xf32, #tpu.memory_space<vmem>>, vector<4x128xf32>
    %28 = arith.mulf %22, %27 : vector<4x128xf32>
    %29 = arith.addf %26, %28 : vector<4x128xf32>
    %c0_12 = arith.constant 0 : index
    %c0_13 = arith.constant 0 : index
    %30 = vector.load %arg4[%c0_12, %c0_13] : memref<4x128xf32, #tpu.memory_space<vmem>>, vector<4x128xf32>
    tpu.vector_store %arg4[%c0_12, %c0_13], %29 {strides = array<i32>} : memref<4x128xf32, #tpu.memory_space<vmem>>, vector<4x128xf32>,
    %c0_14 = arith.constant 0 : index
    %c0_15 = arith.constant 0 : index
    %31 = vector.load %arg5[%c0_14, %c0_15] : memref<4x128xf32, #tpu.memory_space<vmem>>, vector<4x128xf32>
    tpu.vector_store %arg5[%c0_14, %c0_15], %8 {strides = array<i32>} : memref<4x128xf32, #tpu.memory_space<vmem>>, vector<4x128xf32>,
    %c0_16 = arith.constant 0 : index
    %c0_17 = arith.constant 0 : index
    %32 = vector.load %arg6[%c0_16, %c0_17] : memref<4x128xf32, #tpu.memory_space<vmem>>, vector<4x128xf32>
    tpu.vector_store %arg6[%c0_16, %c0_17], %22 {strides = array<i32>} : memref<4x128xf32, #tpu.memory_space<vmem>>, vector<4x128xf32>,
    return
  }
}

</mosaic_0001>

<bundles_post_ra>
// kernel: _lambda_.7
= control target key start
LH: loop header
LB: loop body
LE: loop exit
PB: predicated region body
PF: predicated region fallthrough
CT: control target
= control target key end

     0   :  { %s1380_s1 = inlined_call_operand.vmem [shape: f32[128,128], index: 1, kind: input, shape index: {}]   ;;  %s1381_s0 = inlined_call_operand.vmem [shape: f32[512,128], index: 0, kind: input, shape index: {}]   ;;  %s1382_s2 = inlined_call_operand.vmem [shape: f32[1,128], index: 2, kind: input, shape index: {}]   ;;  %s1383_s3 = inlined_call_operand.vmem [shape: f32[512,128], index: 3, kind: output, shape index: {}]  }
   0x1   :  { %v93_v0 = vld [vmem:[%s1380_s1 + $0x78] sm:$0xff]  ;;  %v92_v1 = vld [vmem:[%s1380_s1 + $0x70] sm:$0xff]  ;;  %v91_v2 = vld [vmem:[%s1380_s1 + $0x68] sm:$0xff] }
   0x2   :  { %699 = vmatprep.subr.mxu0 %v93_v0  ;;  %827 = vmatprep.subr.mxu1 %v93_v0  ;;  %v90_v3 = vld [vmem:[%s1380_s1 + $0x60] sm:$0xff]  ;;  %v89_v4 = vld [vmem:[%s1380_s1 + $0x58] sm:$0xff]  ;;  %v88_v5 = vld [vmem:[%s1380_s1 + $0x50] sm:$0xff] }
   0x3   :  { %700 = vmatpush3.msra.mxu0 %v93_v0  ;;  %843 = vmatpush3.msra.mxu1 %v93_v0  ;;  %v87_v6 = vld [vmem:[%s1380_s1 + $0x48] sm:$0xff]  ;;  %v86_v7 = vld [vmem:[%s1380_s1 + $0x40] sm:$0xff]  ;;  %v85_v8 = vld [vmem:[%s1380_s1 + $0x38] sm:$0xff] }
   0x4   :  { %701 = vmatprep.subr.mxu0 %v92_v1  ;;  %828 = vmatprep.subr.mxu1 %v92_v1  ;;  %v84_v9 = vld [vmem:[%s1380_s1 + $0x30] sm:$0xff]  ;;  %v83_v10 = vld [vmem:[%s1380_s1 + $0x28] sm:$0xff]  ;;  %v82_v11 = vld [vmem:[%s1380_s1 + $0x20] sm:$0xff] }
   0x5   :  { %702 = vmatpush3.msra.mxu0 %v92_v1  ;;  %844 = vmatpush3.msra.mxu1 %v92_v1  ;;  %v81_v12 = vld [vmem:[%s1380_s1 + $0x18] sm:$0xff]  ;;  %v80_v13 = vld [vmem:[%s1380_s1 + $0x10] sm:$0xff]  ;;  %v79_v14 = vld [vmem:[%s1380_s1 + $0x8] sm:$0xff] }
   0x6   :  { %703 = vmatprep.subr.mxu0 %v91_v2  ;;  %829 = vmatprep.subr.mxu1 %v91_v2  ;;  %v78_v15 = vld [vmem:[%s1380_s1] sm:$0xff]  ;;  %v15_v18 = vld [vmem:[%s1381_s0 + $0x8] sm:$0xff]  ;;  %v16_v20 = vld [vmem:[%s1381_s0 + $0x10] sm:$0xff] }
   0x7   :  { %704 = vmatpush3.msra.mxu0 %v91_v2  ;;  %845 = vmatpush3.msra.mxu1 %v91_v2  ;;  %v14_v16 = vld [vmem:[%s1381_s0] sm:$0xff]  ;;  %v47_v19 = vld [vmem:[%s1381_s0 + $0x108] sm:$0xff]  ;;  %v48_v21 = vld [vmem:[%s1381_s0 + $0x110] sm:$0xff] }
   0x8   :  { %705 = vmatprep.subr.mxu0 %v90_v3  ;;  %830 = vmatprep.subr.mxu1 %v90_v3  ;;  %v46_v17 = vld [vmem:[%s1381_s0 + $0x100] sm:$0xff]  ;;  %v17_v22 = vld [vmem:[%s1381_s0 + $0x18] sm:$0xff]  ;;  %v19_v26 = vld [vmem:[%s1381_s0 + $0x28] sm:$0xff] }
   0x9   :  { %706 = vmatpush3.msra.mxu0 %v90_v3  ;;  %846 = vmatpush3.msra.mxu1 %v90_v3  ;;  %v49_v23 = vld [vmem:[%s1381_s0 + $0x118] sm:$0xff]  ;;  %v18_v24 = vld [vmem:[%s1381_s0 + $0x20] sm:$0xff]  ;;  %v51_v27 = vld [vmem:[%s1381_s0 + $0x128] sm:$0xff] }
   0xa   :  { %707 = vmatprep.subr.mxu0 %v89_v4  ;;  %831 = vmatprep.subr.mxu1 %v89_v4  ;;  %v50_v25 = vld [vmem:[%s1381_s0 + $0x120] sm:$0xff]  ;;  %v20_v28 = vld [vmem:[%s1381_s0 + $0x30] sm:$0xff]  ;;  %v21_v30 = vld [vmem:[%s1381_s0 + $0x38] sm:$0xff] }
   0xb   :  { %708 = vmatpush3.msra.mxu0 %v89_v4  ;;  %847 = vmatpush3.msra.mxu1 %v89_v4  ;;  %v52_v29 = vld [vmem:[%s1381_s0 + $0x130] sm:$0xff]  ;;  %v53_v31 = vld [vmem:[%s1381_s0 + $0x138] sm:$0xff]  ;;  %v22_v32 = vld [vmem:[%s1381_s0 + $0x40] sm:$0xff] }
   0xc   :  { %709 = vmatprep.subr.mxu0 %v88_v5  ;;  %832 = vmatprep.subr.mxu1 %v88_v5  ;;  %v54_v33 = vld [vmem:[%s1381_s0 + $0x140] sm:$0xff]  ;;  %v23_v34 = vld [vmem:[%s1381_s0 + $0x48] sm:$0xff]  ;;  %v24_v36 = vld [vmem:[%s1381_s0 + $0x50] sm:$0xff] }
   0xd   :  { %710 = vmatpush3.msra.mxu0 %v88_v5  ;;  %848 = vmatpush3.msra.mxu1 %v88_v5  ;;  %v55_v35 = vld [vmem:[%s1381_s0 + $0x148] sm:$0xff]  ;;  %v56_v37 = vld [vmem:[%s1381_s0 + $0x150] sm:$0xff]  ;;  %v25_v38 = vld [vmem:[%s1381_s0 + $0x58] sm:$0xff] }
   0xe   :  { %711 = vmatprep.subr.mxu0 %v87_v6  ;;  %833 = vmatprep.subr.mxu1 %v87_v6  ;;  %v57_v39 = vld [vmem:[%s1381_s0 + $0x158] sm:$0xff]  ;;  %v26_v40 = vld [vmem:[%s1381_s0 + $0x60] sm:$0xff]  ;;  %v27_v42 = vld [vmem:[%s1381_s0 + $0x68] sm:$0xff] }
   0xf   :  { %712 = vmatpush3.msra.mxu0 %v87_v6  ;;  %849 = vmatpush3.msra.mxu1 %v87_v6  ;;  %v58_v41 = vld [vmem:[%s1381_s0 + $0x160] sm:$0xff]  ;;  %v59_v43 = vld [vmem:[%s1381_s0 + $0x168] sm:$0xff]  ;;  %v28_v44 = vld [vmem:[%s1381_s0 + $0x70] sm:$0xff] }
  0x10   :  { %713 = vmatprep.subr.mxu0 %v86_v7  ;;  %834 = vmatprep.subr.mxu1 %v86_v7  ;;  %v60_v45 = vld [vmem:[%s1381_s0 + $0x170] sm:$0xff]  ;;  %v29_v46 = vld [vmem:[%s1381_s0 + $0x78] sm:$0xff]  ;;  %v30_v48 = vld [vmem:[%s1381_s0 + $0x80] sm:$0xff] }
  0x11   :  { %714 = vmatpush3.msra.mxu0 %v86_v7  ;;  %850 = vmatpush3.msra.mxu1 %v86_v7  ;;  %v61_v47 = vld [vmem:[%s1381_s0 + $0x178] sm:$0xff]  ;;  %v62_v49 = vld [vmem:[%s1381_s0 + $0x180] sm:$0xff]  ;;  %v31_v50 = vld [vmem:[%s1381_s0 + $0x88] sm:$0xff] }
  0x12   :  { %715 = vmatprep.subr.mxu0 %v85_v8  ;;  %835 = vmatprep.subr.mxu1 %v85_v8  ;;  %v63_v51 = vld [vmem:[%s1381_s0 + $0x188] sm:$0xff]  ;;  %v32_v52 = vld [vmem:[%s1381_s0 + $0x90] sm:$0xff]  ;;  %v33_v54 = vld [vmem:[%s1381_s0 + $0x98] sm:$0xff] }
  0x13   :  { %716 = vmatpush3.msra.mxu0 %v85_v8  ;;  %851 = vmatpush3.msra.mxu1 %v85_v8  ;;  %v64_v53 = vld [vmem:[%s1381_s0 + $0x190] sm:$0xff]  ;;  %v65_v55 = vld [vmem:[%s1381_s0 + $0x198] sm:$0xff]  ;;  %v34_v56 = vld [vmem:[%s1381_s0 + $0xa0] sm:$0xff] }
  0x14   :  { %717 = vmatprep.subr.mxu0 %v84_v9  ;;  %836 = vmatprep.subr.mxu1 %v84_v9  ;;  %v66_v57 = vld [vmem:[%s1381_s0 + $0x1a0] sm:$0xff]  ;;  %v35_v58 = vld [vmem:[%s1381_s0 + $0xa8] sm:$0xff]  ;;  %v36_v60 = vld [vmem:[%s1381_s0 + $0xb0] sm:$0xff] }
  0x15   :  { %718 = vmatpush3.msra.mxu0 %v84_v9  ;;  %852 = vmatpush3.msra.mxu1 %v84_v9  ;;  %v67_v59 = vld [vmem:[%s1381_s0 + $0x1a8] sm:$0xff]  ;;  %v68_v61 = vld [vmem:[%s1381_s0 + $0x1b0] sm:$0xff]  ;;  %v37_v62 = vld [vmem:[%s1381_s0 + $0xb8] sm:$0xff] }
  0x16   :  { %719 = vmatprep.subr.mxu0 %v83_v10  ;;  %837 = vmatprep.subr.mxu1 %v83_v10  ;;  %v69_v63 = vld [vmem:[%s1381_s0 + $0x1b8] sm:$0xff]  ;;  %v38_v0 = vld [vmem:[%s1381_s0 + $0xc0] sm:$0xff]  ;;  %v39_v2 = vld [vmem:[%s1381_s0 + $0xc8] sm:$0xff] }
  0x17   :  { %720 = vmatpush3.msra.mxu0 %v83_v10  ;;  %853 = vmatpush3.msra.mxu1 %v83_v10  ;;  %v70_v1 = vld [vmem:[%s1381_s0 + $0x1c0] sm:$0xff]  ;;  %v71_v3 = vld [vmem:[%s1381_s0 + $0x1c8] sm:$0xff]  ;;  %v40_v4 = vld [vmem:[%s1381_s0 + $0xd0] sm:$0xff] }
  0x18   :  { %721 = vmatprep.subr.mxu0 %v82_v11  ;;  %838 = vmatprep.subr.mxu1 %v82_v11  ;;  %v72_v5 = vld [vmem:[%s1381_s0 + $0x1d0] sm:$0xff]  ;;  %v41_v6 = vld [vmem:[%s1381_s0 + $0xd8] sm:$0xff]  ;;  %v42_v8 = vld [vmem:[%s1381_s0 + $0xe0] sm:$0xff] }
  0x19   :  { %722 = vmatpush3.msra.mxu0 %v82_v11  ;;  %854 = vmatpush3.msra.mxu1 %v82_v11  ;;  %v73_v7 = vld [vmem:[%s1381_s0 + $0x1d8] sm:$0xff]  ;;  %v74_v9 = vld [vmem:[%s1381_s0 + $0x1e0] sm:$0xff]  ;;  %v43_v10 = vld [vmem:[%s1381_s0 + $0xe8] sm:$0xff] }
  0x1a   :  { %723 = vmatprep.subr.mxu0 %v81_v12  ;;  %839 = vmatprep.subr.mxu1 %v81_v12  ;;  %v75_v11 = vld [vmem:[%s1381_s0 + $0x1e8] sm:$0xff] }
  0x1b   :  { %724 = vmatpush3.msra.mxu0 %v81_v12  ;;  %855 = vmatpush3.msra.mxu1 %v81_v12  ;;  %v44_v12 = vld [vmem:[%s1381_s0 + $0xf0] sm:$0xff] }
  0x1c   :  { %725 = vmatprep.subr.mxu0 %v80_v13  ;;  %840 = vmatprep.subr.mxu1 %v80_v13 }
  0x1d   :  { %726 = vmatpush3.msra.mxu0 %v80_v13  ;;  %856 = vmatpush3.msra.mxu1 %v80_v13  ;;  %v76_v13 = vld [vmem:[%s1381_s0 + $0x1f0] sm:$0xff] }
  0x1e   :  { %727 = vmatprep.subr.mxu0 %v79_v14  ;;  %841 = vmatprep.subr.mxu1 %v79_v14 }
  0x1f   :  { %728 = vmatpush3.msra.mxu0 %v79_v14  ;;  %857 = vmatpush3.msra.mxu1 %v79_v14  ;;  %v45_v14 = vld [vmem:[%s1381_s0 + $0xf8] sm:$0xff] }
  0x20   :  { %729 = vmatprep.subr.mxu0 %v78_v15  ;;  %842 = vmatprep.subr.mxu1 %v78_v15 }
  0x21   :  { %730 = vmatpush3.msra.mxu0 %v78_v15  ;;  %858 = vmatpush3.msra.mxu1 %v78_v15  ;;  %v77_v15 = vld [vmem:[%s1381_s0 + $0x1f8] sm:$0xff] }
  0x22   :  { %731 = vmatprep.mubr.f32.mxu0 %v14_v16  ;;  %779 = vmatprep.mubr.f32.mxu1 %v46_v17  ;;  %v1122_v16 = vld [vmem:[%s1382_s2] ss:$0 sm:$0xff] }
  0x23   :  { %732 = vmatmul.mubr.f32.vlgmr.msra.gmra.mxu0 %v15_v18  ;;  %780 = vmatmul.mubr.f32.vlgmr.msra.gmra.mxu1 %v47_v19 }
  0x24   :  { %734 = vmatprep.mubr.f32.mxu0 %v16_v20  ;;  %782 = vmatprep.mubr.f32.mxu1 %v48_v21 }
  0x27   :  { %735 = vmatmul.mubr.f32.gmra.mxu0 %v17_v22  ;;  %783 = vmatmul.mubr.f32.gmra.mxu1 %v49_v23 }
  0x28   :  { %737 = vmatprep.mubr.f32.mxu0 %v18_v24  ;;  %785 = vmatprep.mubr.f32.mxu1 %v50_v25 }
  0x2b   :  { %738 = vmatmul.mubr.f32.gmra.mxu0 %v19_v26  ;;  %786 = vmatmul.mubr.f32.gmra.mxu1 %v51_v27 }
  0x2c   :  { %740 = vmatprep.mubr.f32.mxu0 %v20_v28  ;;  %788 = vmatprep.mubr.f32.mxu1 %v52_v29 }
  0x2f   :  { %741 = vmatmul.mubr.f32.gmra.mxu0 %v21_v30  ;;  %789 = vmatmul.mubr.f32.gmra.mxu1 %v53_v31 }
  0x30   :  { %743 = vmatprep.mubr.f32.mxu0 %v22_v32  ;;  %791 = vmatprep.mubr.f32.mxu1 %v54_v33 }
  0x33   :  { %744 = vmatmul.mubr.f32.gmra.mxu0 %v23_v34  ;;  %792 = vmatmul.mubr.f32.gmra.mxu1 %v55_v35 }
  0x34   :  { %746 = vmatprep.mubr.f32.mxu0 %v24_v36  ;;  %794 = vmatprep.mubr.f32.mxu1 %v56_v37 }
  0x37   :  { %747 = vmatmul.mubr.f32.gmra.mxu0 %v25_v38  ;;  %795 = vmatmul.mubr.f32.gmra.mxu1 %v57_v39 }
  0x38   :  { %749 = vmatprep.mubr.f32.mxu0 %v26_v40  ;;  %797 = vmatprep.mubr.f32.mxu1 %v58_v41 }
  0x3b   :  { %750 = vmatmul.mubr.f32.gmra.mxu0 %v27_v42  ;;  %798 = vmatmul.mubr.f32.gmra.mxu1 %v59_v43 }
  0x3c   :  { %752 = vmatprep.mubr.f32.mxu0 %v28_v44  ;;  %800 = vmatprep.mubr.f32.mxu1 %v60_v45 }
  0x3f   :  { %753 = vmatmul.mubr.f32.gmra.mxu0 %v29_v46  ;;  %801 = vmatmul.mubr.f32.gmra.mxu1 %v61_v47 }
  0x40   :  { %755 = vmatprep.mubr.f32.mxu0 %v30_v48  ;;  %803 = vmatprep.mubr.f32.mxu1 %v62_v49 }
  0x43   :  { %756 = vmatmul.mubr.f32.gmra.mxu0 %v31_v50  ;;  %804 = vmatmul.mubr.f32.gmra.mxu1 %v63_v51 }
  0x44   :  { %758 = vmatprep.mubr.f32.mxu0 %v32_v52  ;;  %806 = vmatprep.mubr.f32.mxu1 %v64_v53 }
  0x47   :  { %759 = vmatmul.mubr.f32.gmra.mxu0 %v33_v54  ;;  %807 = vmatmul.mubr.f32.gmra.mxu1 %v65_v55 }
  0x48   :  { %761 = vmatprep.mubr.f32.mxu0 %v34_v56  ;;  %809 = vmatprep.mubr.f32.mxu1 %v66_v57 }
  0x4b   :  { %762 = vmatmul.mubr.f32.gmra.mxu0 %v35_v58  ;;  %810 = vmatmul.mubr.f32.gmra.mxu1 %v67_v59 }
  0x4c   :  { %764 = vmatprep.mubr.f32.mxu0 %v36_v60  ;;  %812 = vmatprep.mubr.f32.mxu1 %v68_v61 }
  0x4f   :  { %765 = vmatmul.mubr.f32.gmra.mxu0 %v37_v62  ;;  %813 = vmatmul.mubr.f32.gmra.mxu1 %v69_v63 }
  0x50   :  { %767 = vmatprep.mubr.f32.mxu0 %v38_v0  ;;  %815 = vmatprep.mubr.f32.mxu1 %v70_v1 }
  0x53   :  { %768 = vmatmul.mubr.f32.gmra.mxu0 %v39_v2  ;;  %816 = vmatmul.mubr.f32.gmra.mxu1 %v71_v3 }
  0x54   :  { %770 = vmatprep.mubr.f32.mxu0 %v40_v4  ;;  %818 = vmatprep.mubr.f32.mxu1 %v72_v5 }
  0x57   :  { %771 = vmatmul.mubr.f32.gmra.mxu0 %v41_v6  ;;  %819 = vmatmul.mubr.f32.gmra.mxu1 %v73_v7 }
  0x58   :  { %773 = vmatprep.mubr.f32.mxu0 %v42_v8  ;;  %821 = vmatprep.mubr.f32.mxu1 %v74_v9 }
  0x5b   :  { %774 = vmatmul.mubr.f32.gmra.mxu0 %v43_v10  ;;  %822 = vmatmul.mubr.f32.gmra.mxu1 %v75_v11 }
  0x5c   :  { %776 = vmatprep.mubr.f32.mxu0 %v44_v12  ;;  %824 = vmatprep.mubr.f32.mxu1 %v76_v13 }
  0x5f   :  { %777 = vmatmul.mubr.f32.gmra.mxu0 %v45_v14  ;;  %825 = vmatmul.mubr.f32.gmra.mxu1 %v77_v15 }
  0xe3   :  { %v733_v17 = vpop.f32.mrf.mxu0  ;;  %v781_v18 = vpop.f32.mrf.mxu1 }
  0xe4   :  { %v173_v19 = vadd.f32 %v733_v17, %v1122_v16  ;;  %v333_v20 = vadd.f32 %v781_v18, %v1122_v16 }
  0xe5   :  { %v167_v21 = vpop.f32.mrf.mxu0  ;;  %v327_v22 = vpop.f32.mrf.mxu1 }
  0xe6   :  { %v487_v23 = vmax.f32 %v173_v19, 0.0  ;;  %v519_v24 = vmax.f32 %v333_v20, 0.0  ;;  %v168_v25 = vadd.f32 %v1122_v16, %v167_v21  ;;  %v328_v26 = vadd.f32 %v1122_v16, %v327_v22 }
  0xe7   :  { %v736_v27 = vpop.f32.mrf.mxu0  ;;  %v784_v28 = vpop.f32.mrf.mxu1 }
  0xe8   :  { %551 = vst [vmem:[%s1383_s3 + $0x8] sm:$0xff] %v487_v23  ;;  %583 = vst [vmem:[%s1383_s3 + $0x108] sm:$0xff] %v519_v24  ;;  %v486_v29 = vmax.f32 %v168_v25, 0.0  ;;  %v518_v30 = vmax.f32 %v328_v26, 0.0  ;;  %v183_v31 = vadd.f32 %v736_v27, %v1122_v16  ;;  %v343_v32 = vadd.f32 %v784_v28, %v1122_v16 }
  0xe9   :  { %v177_v33 = vpop.f32.mrf.mxu0  ;;  %v337_v34 = vpop.f32.mrf.mxu1 }
  0xea   :  { %550 = vst [vmem:[%s1383_s3] sm:$0xff] %v486_v29  ;;  %582 = vst [vmem:[%s1383_s3 + $0x100] sm:$0xff] %v518_v30  ;;  %v489_v35 = vmax.f32 %v183_v31, 0.0  ;;  %v521_v36 = vmax.f32 %v343_v32, 0.0  ;;  %v178_v37 = vadd.f32 %v1122_v16, %v177_v33  ;;  %v338_v38 = vadd.f32 %v1122_v16, %v337_v34 }
  0xeb   :  { %v739_v39 = vpop.f32.mrf.mxu0  ;;  %v787_v40 = vpop.f32.mrf.mxu1 }
  0xec   :  { %553 = vst [vmem:[%s1383_s3 + $0x18] sm:$0xff] %v489_v35  ;;  %585 = vst [vmem:[%s1383_s3 + $0x118] sm:$0xff] %v521_v36  ;;  %v488_v41 = vmax.f32 %v178_v37, 0.0  ;;  %v520_v42 = vmax.f32 %v338_v38, 0.0  ;;  %v193_v43 = vadd.f32 %v739_v39, %v1122_v16  ;;  %v353_v44 = vadd.f32 %v787_v40, %v1122_v16 }
  0xed   :  { %v187_v45 = vpop.f32.mrf.mxu0  ;;  %v347_v46 = vpop.f32.mrf.mxu1 }
  0xee   :  { %552 = vst [vmem:[%s1383_s3 + $0x10] sm:$0xff] %v488_v41  ;;  %584 = vst [vmem:[%s1383_s3 + $0x110] sm:$0xff] %v520_v42  ;;  %v491_v47 = vmax.f32 %v193_v43, 0.0  ;;  %v523_v48 = vmax.f32 %v353_v44, 0.0  ;;  %v188_v49 = vadd.f32 %v1122_v16, %v187_v45  ;;  %v348_v50 = vadd.f32 %v1122_v16, %v347_v46 }
  0xef   :  { %v742_v51 = vpop.f32.mrf.mxu0  ;;  %v790_v52 = vpop.f32.mrf.mxu1 }
  0xf0   :  { %555 = vst [vmem:[%s1383_s3 + $0x28] sm:$0xff] %v491_v47  ;;  %587 = vst [vmem:[%s1383_s3 + $0x128] sm:$0xff] %v523_v48  ;;  %v490_v53 = vmax.f32 %v188_v49, 0.0  ;;  %v522_v54 = vmax.f32 %v348_v50, 0.0  ;;  %v203_v55 = vadd.f32 %v742_v51, %v1122_v16  ;;  %v363_v56 = vadd.f32 %v790_v52, %v1122_v16 }
  0xf1   :  { %v197_v57 = vpop.f32.mrf.mxu0  ;;  %v357_v58 = vpop.f32.mrf.mxu1 }
  0xf2   :  { %554 = vst [vmem:[%s1383_s3 + $0x20] sm:$0xff] %v490_v53  ;;  %586 = vst [vmem:[%s1383_s3 + $0x120] sm:$0xff] %v522_v54  ;;  %v493_v59 = vmax.f32 %v203_v55, 0.0  ;;  %v525_v60 = vmax.f32 %v363_v56, 0.0  ;;  %v198_v61 = vadd.f32 %v1122_v16, %v197_v57  ;;  %v358_v62 = vadd.f32 %v1122_v16, %v357_v58 }
  0xf3   :  { %v745_v63 = vpop.f32.mrf.mxu0  ;;  %v793_v0 = vpop.f32.mrf.mxu1 }
  0xf4   :  { %557 = vst [vmem:[%s1383_s3 + $0x38] sm:$0xff] %v493_v59  ;;  %589 = vst [vmem:[%s1383_s3 + $0x138] sm:$0xff] %v525_v60  ;;  %v492_v1 = vmax.f32 %v198_v61, 0.0  ;;  %v524_v2 = vmax.f32 %v358_v62, 0.0  ;;  %v213_v3 = vadd.f32 %v745_v63, %v1122_v16  ;;  %v373_v4 = vadd.f32 %v793_v0, %v1122_v16 }
  0xf5   :  { %v207_v5 = vpop.f32.mrf.mxu0  ;;  %v367_v6 = vpop.f32.mrf.mxu1 }
  0xf6   :  { %556 = vst [vmem:[%s1383_s3 + $0x30] sm:$0xff] %v492_v1  ;;  %588 = vst [vmem:[%s1383_s3 + $0x130] sm:$0xff] %v524_v2  ;;  %v495_v7 = vmax.f32 %v213_v3, 0.0  ;;  %v527_v8 = vmax.f32 %v373_v4, 0.0  ;;  %v208_v9 = vadd.f32 %v1122_v16, %v207_v5  ;;  %v368_v10 = vadd.f32 %v1122_v16, %v367_v6 }
  0xf7   :  { %v748_v11 = vpop.f32.mrf.mxu0  ;;  %v796_v12 = vpop.f32.mrf.mxu1 }
  0xf8   :  { %559 = vst [vmem:[%s1383_s3 + $0x48] sm:$0xff] %v495_v7  ;;  %591 = vst [vmem:[%s1383_s3 + $0x148] sm:$0xff] %v527_v8  ;;  %v494_v13 = vmax.f32 %v208_v9, 0.0  ;;  %v526_v14 = vmax.f32 %v368_v10, 0.0  ;;  %v223_v15 = vadd.f32 %v748_v11, %v1122_v16  ;;  %v383_v17 = vadd.f32 %v796_v12, %v1122_v16 }
  0xf9   :  { %v217_v18 = vpop.f32.mrf.mxu0  ;;  %v377_v19 = vpop.f32.mrf.mxu1 }
  0xfa   :  { %558 = vst [vmem:[%s1383_s3 + $0x40] sm:$0xff] %v494_v13  ;;  %590 = vst [vmem:[%s1383_s3 + $0x140] sm:$0xff] %v526_v14  ;;  %v497_v20 = vmax.f32 %v223_v15, 0.0  ;;  %v529_v21 = vmax.f32 %v383_v17, 0.0  ;;  %v218_v22 = vadd.f32 %v1122_v16, %v217_v18  ;;  %v378_v23 = vadd.f32 %v1122_v16, %v377_v19 }
  0xfb   :  { %v751_v24 = vpop.f32.mrf.mxu0  ;;  %v799_v25 = vpop.f32.mrf.mxu1 }
  0xfc   :  { %561 = vst [vmem:[%s1383_s3 + $0x58] sm:$0xff] %v497_v20  ;;  %593 = vst [vmem:[%s1383_s3 + $0x158] sm:$0xff] %v529_v21  ;;  %v496_v26 = vmax.f32 %v218_v22, 0.0  ;;  %v528_v27 = vmax.f32 %v378_v23, 0.0  ;;  %v233_v28 = vadd.f32 %v751_v24, %v1122_v16  ;;  %v393_v29 = vadd.f32 %v799_v25, %v1122_v16 }
  0xfd   :  { %v227_v30 = vpop.f32.mrf.mxu0  ;;  %v387_v31 = vpop.f32.mrf.mxu1 }
  0xfe   :  { %560 = vst [vmem:[%s1383_s3 + $0x50] sm:$0xff] %v496_v26  ;;  %592 = vst [vmem:[%s1383_s3 + $0x150] sm:$0xff] %v528_v27  ;;  %v499_v32 = vmax.f32 %v233_v28, 0.0  ;;  %v531_v33 = vmax.f32 %v393_v29, 0.0  ;;  %v228_v34 = vadd.f32 %v1122_v16, %v227_v30  ;;  %v388_v35 = vadd.f32 %v1122_v16, %v387_v31 }
  0xff   :  { %v754_v36 = vpop.f32.mrf.mxu0  ;;  %v802_v37 = vpop.f32.mrf.mxu1 }
 0x100   :  { %563 = vst [vmem:[%s1383_s3 + $0x68] sm:$0xff] %v499_v32  ;;  %595 = vst [vmem:[%s1383_s3 + $0x168] sm:$0xff] %v531_v33  ;;  %v498_v38 = vmax.f32 %v228_v34, 0.0  ;;  %v530_v39 = vmax.f32 %v388_v35, 0.0  ;;  %v243_v40 = vadd.f32 %v754_v36, %v1122_v16  ;;  %v403_v41 = vadd.f32 %v802_v37, %v1122_v16 }
 0x101   :  { %v237_v42 = vpop.f32.mrf.mxu0  ;;  %v397_v43 = vpop.f32.mrf.mxu1 }
 0x102   :  { %562 = vst [vmem:[%s1383_s3 + $0x60] sm:$0xff] %v498_v38  ;;  %594 = vst [vmem:[%s1383_s3 + $0x160] sm:$0xff] %v530_v39  ;;  %v501_v44 = vmax.f32 %v243_v40, 0.0  ;;  %v533_v45 = vmax.f32 %v403_v41, 0.0  ;;  %v238_v46 = vadd.f32 %v1122_v16, %v237_v42  ;;  %v398_v47 = vadd.f32 %v1122_v16, %v397_v43 }
 0x103   :  { %v757_v48 = vpop.f32.mrf.mxu0  ;;  %v805_v49 = vpop.f32.mrf.mxu1 }
 0x104   :  { %565 = vst [vmem:[%s1383_s3 + $0x78] sm:$0xff] %v501_v44  ;;  %597 = vst [vmem:[%s1383_s3 + $0x178] sm:$0xff] %v533_v45  ;;  %v500_v50 = vmax.f32 %v238_v46, 0.0  ;;  %v532_v51 = vmax.f32 %v398_v47, 0.0  ;;  %v253_v52 = vadd.f32 %v757_v48, %v1122_v16  ;;  %v413_v53 = vadd.f32 %v805_v49, %v1122_v16 }
 0x105   :  { %v247_v54 = vpop.f32.mrf.mxu0  ;;  %v407_v55 = vpop.f32.mrf.mxu1 }
 0x106   :  { %564 = vst [vmem:[%s1383_s3 + $0x70] sm:$0xff] %v500_v50  ;;  %596 = vst [vmem:[%s1383_s3 + $0x170] sm:$0xff] %v532_v51  ;;  %v503_v56 = vmax.f32 %v253_v52, 0.0  ;;  %v535_v57 = vmax.f32 %v413_v53, 0.0  ;;  %v248_v58 = vadd.f32 %v1122_v16, %v247_v54  ;;  %v408_v59 = vadd.f32 %v1122_v16, %v407_v55 }
 0x107   :  { %v760_v60 = vpop.f32.mrf.mxu0  ;;  %v808_v61 = vpop.f32.mrf.mxu1 }
 0x108   :  { %567 = vst [vmem:[%s1383_s3 + $0x88] sm:$0xff] %v503_v56  ;;  %599 = vst [vmem:[%s1383_s3 + $0x188] sm:$0xff] %v535_v57  ;;  %v502_v62 = vmax.f32 %v248_v58, 0.0  ;;  %v534_v63 = vmax.f32 %v408_v59, 0.0  ;;  %v263_v0 = vadd.f32 %v760_v60, %v1122_v16  ;;  %v423_v1 = vadd.f32 %v808_v61, %v1122_v16 }
 0x109   :  { %v257_v2 = vpop.f32.mrf.mxu0  ;;  %v417_v3 = vpop.f32.mrf.mxu1 }
 0x10a   :  { %566 = vst [vmem:[%s1383_s3 + $0x80] sm:$0xff] %v502_v62  ;;  %598 = vst [vmem:[%s1383_s3 + $0x180] sm:$0xff] %v534_v63  ;;  %v505_v4 = vmax.f32 %v263_v0, 0.0  ;;  %v537_v5 = vmax.f32 %v423_v1, 0.0  ;;  %v258_v6 = vadd.f32 %v1122_v16, %v257_v2  ;;  %v418_v7 = vadd.f32 %v1122_v16, %v417_v3 }
 0x10b   :  { %v763_v8 = vpop.f32.mrf.mxu0  ;;  %v811_v9 = vpop.f32.mrf.mxu1 }
 0x10c   :  { %569 = vst [vmem:[%s1383_s3 + $0x98] sm:$0xff] %v505_v4  ;;  %601 = vst [vmem:[%s1383_s3 + $0x198] sm:$0xff] %v537_v5  ;;  %v504_v10 = vmax.f32 %v258_v6, 0.0  ;;  %v536_v11 = vmax.f32 %v418_v7, 0.0  ;;  %v273_v12 = vadd.f32 %v763_v8, %v1122_v16  ;;  %v433_v13 = vadd.f32 %v811_v9, %v1122_v16 }
 0x10d   :  { %v267_v14 = vpop.f32.mrf.mxu0  ;;  %v427_v15 = vpop.f32.mrf.mxu1 }
 0x10e   :  { %568 = vst [vmem:[%s1383_s3 + $0x90] sm:$0xff] %v504_v10  ;;  %600 = vst [vmem:[%s1383_s3 + $0x190] sm:$0xff] %v536_v11  ;;  %v507_v17 = vmax.f32 %v273_v12, 0.0  ;;  %v539_v18 = vmax.f32 %v433_v13, 0.0  ;;  %v268_v19 = vadd.f32 %v1122_v16, %v267_v14  ;;  %v428_v20 = vadd.f32 %v1122_v16, %v427_v15 }
 0x10f   :  { %v766_v21 = vpop.f32.mrf.mxu0  ;;  %v814_v22 = vpop.f32.mrf.mxu1 }
 0x110   :  { %571 = vst [vmem:[%s1383_s3 + $0xa8] sm:$0xff] %v507_v17  ;;  %603 = vst [vmem:[%s1383_s3 + $0x1a8] sm:$0xff] %v539_v18  ;;  %v506_v23 = vmax.f32 %v268_v19, 0.0  ;;  %v538_v24 = vmax.f32 %v428_v20, 0.0  ;;  %v283_v25 = vadd.f32 %v766_v21, %v1122_v16  ;;  %v443_v26 = vadd.f32 %v814_v22, %v1122_v16 }
 0x111   :  { %v277_v27 = vpop.f32.mrf.mxu0  ;;  %v437_v28 = vpop.f32.mrf.mxu1 }
 0x112   :  { %570 = vst [vmem:[%s1383_s3 + $0xa0] sm:$0xff] %v506_v23  ;;  %602 = vst [vmem:[%s1383_s3 + $0x1a0] sm:$0xff] %v538_v24  ;;  %v509_v29 = vmax.f32 %v283_v25, 0.0  ;;  %v541_v30 = vmax.f32 %v443_v26, 0.0  ;;  %v278_v31 = vadd.f32 %v1122_v16, %v277_v27  ;;  %v438_v32 = vadd.f32 %v1122_v16, %v437_v28 }
 0x113   :  { %v769_v33 = vpop.f32.mrf.mxu0  ;;  %v817_v34 = vpop.f32.mrf.mxu1 }
 0x114   :  { %573 = vst [vmem:[%s1383_s3 + $0xb8] sm:$0xff] %v509_v29  ;;  %605 = vst [vmem:[%s1383_s3 + $0x1b8] sm:$0xff] %v541_v30  ;;  %v508_v35 = vmax.f32 %v278_v31, 0.0  ;;  %v540_v36 = vmax.f32 %v438_v32, 0.0  ;;  %v293_v37 = vadd.f32 %v769_v33, %v1122_v16  ;;  %v453_v38 = vadd.f32 %v817_v34, %v1122_v16 }
 0x115   :  { %v287_v39 = vpop.f32.mrf.mxu0  ;;  %v447_v40 = vpop.f32.mrf.mxu1 }
 0x116   :  { %572 = vst [vmem:[%s1383_s3 + $0xb0] sm:$0xff] %v508_v35  ;;  %604 = vst [vmem:[%s1383_s3 + $0x1b0] sm:$0xff] %v540_v36  ;;  %v511_v41 = vmax.f32 %v293_v37, 0.0  ;;  %v543_v42 = vmax.f32 %v453_v38, 0.0  ;;  %v288_v43 = vadd.f32 %v1122_v16, %v287_v39  ;;  %v448_v44 = vadd.f32 %v1122_v16, %v447_v40 }
 0x117   :  { %v772_v45 = vpop.f32.mrf.mxu0  ;;  %v820_v46 = vpop.f32.mrf.mxu1 }
 0x118   :  { %575 = vst [vmem:[%s1383_s3 + $0xc8] sm:$0xff] %v511_v41  ;;  %607 = vst [vmem:[%s1383_s3 + $0x1c8] sm:$0xff] %v543_v42  ;;  %v510_v47 = vmax.f32 %v288_v43, 0.0  ;;  %v542_v48 = vmax.f32 %v448_v44, 0.0  ;;  %v303_v49 = vadd.f32 %v772_v45, %v1122_v16  ;;  %v463_v50 = vadd.f32 %v820_v46, %v1122_v16 }
 0x119   :  { %v297_v51 = vpop.f32.mrf.mxu0  ;;  %v457_v52 = vpop.f32.mrf.mxu1 }
 0x11a   :  { %574 = vst [vmem:[%s1383_s3 + $0xc0] sm:$0xff] %v510_v47  ;;  %606 = vst [vmem:[%s1383_s3 + $0x1c0] sm:$0xff] %v542_v48  ;;  %v513_v53 = vmax.f32 %v303_v49, 0.0  ;;  %v545_v54 = vmax.f32 %v463_v50, 0.0  ;;  %v298_v55 = vadd.f32 %v1122_v16, %v297_v51  ;;  %v458_v56 = vadd.f32 %v1122_v16, %v457_v52 }
 0x11b   :  { %v775_v57 = vpop.f32.mrf.mxu0  ;;  %v823_v58 = vpop.f32.mrf.mxu1 }
 0x11c   :  { %577 = vst [vmem:[%s1383_s3 + $0xd8] sm:$0xff] %v513_v53  ;;  %609 = vst [vmem:[%s1383_s3 + $0x1d8] sm:$0xff] %v545_v54  ;;  %v512_v59 = vmax.f32 %v298_v55, 0.0  ;;  %v544_v60 = vmax.f32 %v458_v56, 0.0  ;;  %v313_v61 = vadd.f32 %v775_v57, %v1122_v16  ;;  %v473_v62 = vadd.f32 %v823_v58, %v1122_v16 }
 0x11d   :  { %v307_v63 = vpop.f32.mrf.mxu0  ;;  %v467_v0 = vpop.f32.mrf.mxu1 }
 0x11e   :  { %576 = vst [vmem:[%s1383_s3 + $0xd0] sm:$0xff] %v512_v59  ;;  %608 = vst [vmem:[%s1383_s3 + $0x1d0] sm:$0xff] %v544_v60  ;;  %v515_v1 = vmax.f32 %v313_v61, 0.0  ;;  %v547_v2 = vmax.f32 %v473_v62, 0.0  ;;  %v308_v3 = vadd.f32 %v1122_v16, %v307_v63  ;;  %v468_v4 = vadd.f32 %v1122_v16, %v467_v0 }
 0x11f   :  { %v778_v5 = vpop.f32.mrf.mxu0  ;;  %v826_v6 = vpop.f32.mrf.mxu1 }
 0x120   :  { %579 = vst [vmem:[%s1383_s3 + $0xe8] sm:$0xff] %v515_v1  ;;  %611 = vst [vmem:[%s1383_s3 + $0x1e8] sm:$0xff] %v547_v2  ;;  %v514_v7 = vmax.f32 %v308_v3, 0.0  ;;  %v546_v8 = vmax.f32 %v468_v4, 0.0  ;;  %v323_v9 = vadd.f32 %v778_v5, %v1122_v16  ;;  %v483_v10 = vadd.f32 %v826_v6, %v1122_v16 }
 0x121   :  { %v317_v11 = vpop.f32.mrf.mxu0  ;;  %v477_v12 = vpop.f32.mrf.mxu1 }
 0x122   :  { %578 = vst [vmem:[%s1383_s3 + $0xe0] sm:$0xff] %v514_v7  ;;  %610 = vst [vmem:[%s1383_s3 + $0x1e0] sm:$0xff] %v546_v8  ;;  %v517_v13 = vmax.f32 %v323_v9, 0.0  ;;  %v549_v14 = vmax.f32 %v483_v10, 0.0  ;;  %v318_v15 = vadd.f32 %v1122_v16, %v317_v11  ;;  %v478_v17 = vadd.f32 %v1122_v16, %v477_v12 }
 0x124   :  { %581 = vst [vmem:[%s1383_s3 + $0xf8] sm:$0xff] %v517_v13  ;;  %613 = vst [vmem:[%s1383_s3 + $0x1f8] sm:$0xff] %v549_v14  ;;  %v516_v18 = vmax.f32 %v318_v15, 0.0  ;;  %v548_v19 = vmax.f32 %v478_v17, 0.0 }
 0x126   :  { %580 = vst [vmem:[%s1383_s3 + $0xf0] sm:$0xff] %v516_v18  ;;  %612 = vst [vmem:[%s1383_s3 + $0x1f0] sm:$0xff] %v548_v19 }

// kernel: _lambda_.8
= control target key start
LH: loop header
LB: loop body
LE: loop exit
PB: predicated region body
PF: predicated region fallthrough
CT: control target
= control target key end

     0   :  { %s660_s1 = inlined_call_operand.vmem [shape: f32[256,128], index: 1, kind: input, shape index: {}]   ;;  %s661_s0 = inlined_call_operand.vmem [shape: f32[128,256], index: 0, kind: input, shape index: {}]   ;;  %s662_s2 = inlined_call_operand.vmem [shape: f32[1,128], index: 2, kind: input, shape index: {}]   ;;  %s663_s3 = inlined_call_operand.vmem [shape: f32[128,128], index: 3, kind: output, shape index: {}]  }
   0x1   :  { %v77_v0 = vld [vmem:[%s660_s1 + $0xf8] sm:$0xff]  ;;  %v76_v2 = vld [vmem:[%s660_s1 + $0xf0] sm:$0xff]  ;;  %v75_v4 = vld [vmem:[%s660_s1 + $0xe8] sm:$0xff] }
   0x2   :  { %v61_v1 = vld [vmem:[%s660_s1 + $0x78] sm:$0xff]  ;;  %267 = vmatprep.subr.mxu0 %v77_v0  ;;  %347 = vmatprep.subr.mxu1 %v77_v0  ;;  %v60_v3 = vld [vmem:[%s660_s1 + $0x70] sm:$0xff]  ;;  %v59_v5 = vld [vmem:[%s660_s1 + $0x68] sm:$0xff] }
   0x3   :  { %268 = vmatpush3.msra.mxu0 %v61_v1  ;;  %363 = vmatpush3.msra.mxu1 %v61_v1  ;;  %v74_v6 = vld [vmem:[%s660_s1 + $0xe0] sm:$0xff]  ;;  %v73_v8 = vld [vmem:[%s660_s1 + $0xd8] sm:$0xff]  ;;  %v72_v10 = vld [vmem:[%s660_s1 + $0xd0] sm:$0xff] }
   0x4   :  { %269 = vmatprep.subr.mxu0 %v76_v2  ;;  %348 = vmatprep.subr.mxu1 %v76_v2  ;;  %v58_v7 = vld [vmem:[%s660_s1 + $0x60] sm:$0xff]  ;;  %v57_v9 = vld [vmem:[%s660_s1 + $0x58] sm:$0xff]  ;;  %v56_v11 = vld [vmem:[%s660_s1 + $0x50] sm:$0xff] }
   0x5   :  { %270 = vmatpush3.msra.mxu0 %v60_v3  ;;  %364 = vmatpush3.msra.mxu1 %v60_v3  ;;  %v71_v12 = vld [vmem:[%s660_s1 + $0xc8] sm:$0xff]  ;;  %v70_v14 = vld [vmem:[%s660_s1 + $0xc0] sm:$0xff]  ;;  %v69_v16 = vld [vmem:[%s660_s1 + $0xb8] sm:$0xff] }
   0x6   :  { %271 = vmatprep.subr.mxu0 %v75_v4  ;;  %349 = vmatprep.subr.mxu1 %v75_v4  ;;  %v55_v13 = vld [vmem:[%s660_s1 + $0x48] sm:$0xff]  ;;  %v54_v15 = vld [vmem:[%s660_s1 + $0x40] sm:$0xff]  ;;  %v53_v17 = vld [vmem:[%s660_s1 + $0x38] sm:$0xff] }
   0x7   :  { %272 = vmatpush3.msra.mxu0 %v59_v5  ;;  %365 = vmatpush3.msra.mxu1 %v59_v5  ;;  %v68_v18 = vld [vmem:[%s660_s1 + $0xb0] sm:$0xff]  ;;  %v67_v20 = vld [vmem:[%s660_s1 + $0xa8] sm:$0xff]  ;;  %v66_v22 = vld [vmem:[%s660_s1 + $0xa0] sm:$0xff] }
   0x8   :  { %273 = vmatprep.subr.mxu0 %v74_v6  ;;  %350 = vmatprep.subr.mxu1 %v74_v6  ;;  %v52_v19 = vld [vmem:[%s660_s1 + $0x30] sm:$0xff]  ;;  %v51_v21 = vld [vmem:[%s660_s1 + $0x28] sm:$0xff]  ;;  %v50_v23 = vld [vmem:[%s660_s1 + $0x20] sm:$0xff] }
   0x9   :  { %274 = vmatpush3.msra.mxu0 %v58_v7  ;;  %366 = vmatpush3.msra.mxu1 %v58_v7  ;;  %v65_v24 = vld [vmem:[%s660_s1 + $0x98] sm:$0xff]  ;;  %v64_v26 = vld [vmem:[%s660_s1 + $0x90] sm:$0xff]  ;;  %v63_v28 = vld [vmem:[%s660_s1 + $0x88] sm:$0xff] }
   0xa   :  { %275 = vmatprep.subr.mxu0 %v73_v8  ;;  %351 = vmatprep.subr.mxu1 %v73_v8  ;;  %v49_v25 = vld [vmem:[%s660_s1 + $0x18] sm:$0xff]  ;;  %v48_v27 = vld [vmem:[%s660_s1 + $0x10] sm:$0xff]  ;;  %v47_v29 = vld [vmem:[%s660_s1 + $0x8] sm:$0xff] }
   0xb   :  { %276 = vmatpush3.msra.mxu0 %v57_v9  ;;  %367 = vmatpush3.msra.mxu1 %v57_v9  ;;  %v62_v30 = vld [vmem:[%s660_s1 + $0x80] sm:$0xff]  ;;  %v15_v32 = vld [vmem:[%s661_s0 + $0x8] sm:$0xff]  ;;  %v17_v36 = vld [vmem:[%s661_s0 + $0x18] sm:$0xff] }
   0xc   :  { %277 = vmatprep.subr.mxu0 %v72_v10  ;;  %352 = vmatprep.subr.mxu1 %v72_v10  ;;  %v46_v31 = vld [vmem:[%s660_s1] sm:$0xff]  ;;  %v31_v33 = vld [vmem:[%s661_s0 + $0x88] sm:$0xff]  ;;  %v33_v37 = vld [vmem:[%s661_s0 + $0x98] sm:$0xff] }
   0xd   :  { %278 = vmatpush3.msra.mxu0 %v56_v11  ;;  %368 = vmatpush3.msra.mxu1 %v56_v11  ;;  %v14_v34 = vld [vmem:[%s661_s0] sm:$0xff]  ;;  %v16_v38 = vld [vmem:[%s661_s0 + $0x10] sm:$0xff]  ;;  %v19_v40 = vld [vmem:[%s661_s0 + $0x28] sm:$0xff] }
   0xe   :  { %279 = vmatprep.subr.mxu0 %v71_v12  ;;  %353 = vmatprep.subr.mxu1 %v71_v12  ;;  %v30_v35 = vld [vmem:[%s661_s0 + $0x80] sm:$0xff]  ;;  %v32_v39 = vld [vmem:[%s661_s0 + $0x90] sm:$0xff]  ;;  %v35_v41 = vld [vmem:[%s661_s0 + $0xa8] sm:$0xff] }
   0xf   :  { %280 = vmatpush3.msra.mxu0 %v55_v13  ;;  %369 = vmatpush3.msra.mxu1 %v55_v13  ;;  %v18_v42 = vld [vmem:[%s661_s0 + $0x20] sm:$0xff]  ;;  %v21_v44 = vld [vmem:[%s661_s0 + $0x38] sm:$0xff]  ;;  %v20_v46 = vld [vmem:[%s661_s0 + $0x30] sm:$0xff] }
  0x10   :  { %281 = vmatprep.subr.mxu0 %v70_v14  ;;  %354 = vmatprep.subr.mxu1 %v70_v14  ;;  %v34_v43 = vld [vmem:[%s661_s0 + $0xa0] sm:$0xff]  ;;  %v37_v45 = vld [vmem:[%s661_s0 + $0xb8] sm:$0xff]  ;;  %v36_v47 = vld [vmem:[%s661_s0 + $0xb0] sm:$0xff] }
  0x11   :  { %282 = vmatpush3.msra.mxu0 %v54_v15  ;;  %370 = vmatpush3.msra.mxu1 %v54_v15  ;;  %v23_v48 = vld [vmem:[%s661_s0 + $0x48] sm:$0xff]  ;;  %v22_v50 = vld [vmem:[%s661_s0 + $0x40] sm:$0xff]  ;;  %v25_v52 = vld [vmem:[%s661_s0 + $0x58] sm:$0xff] }
  0x12   :  { %283 = vmatprep.subr.mxu0 %v69_v16  ;;  %355 = vmatprep.subr.mxu1 %v69_v16  ;;  %v39_v49 = vld [vmem:[%s661_s0 + $0xc8] sm:$0xff]  ;;  %v38_v51 = vld [vmem:[%s661_s0 + $0xc0] sm:$0xff]  ;;  %v41_v53 = vld [vmem:[%s661_s0 + $0xd8] sm:$0xff] }
  0x13   :  { %284 = vmatpush3.msra.mxu0 %v53_v17  ;;  %371 = vmatpush3.msra.mxu1 %v53_v17  ;;  %v24_v54 = vld [vmem:[%s661_s0 + $0x50] sm:$0xff]  ;;  %v27_v56 = vld [vmem:[%s661_s0 + $0x68] sm:$0xff]  ;;  %v26_v58 = vld [vmem:[%s661_s0 + $0x60] sm:$0xff] }
  0x14   :  { %285 = vmatprep.subr.mxu0 %v68_v18  ;;  %356 = vmatprep.subr.mxu1 %v68_v18  ;;  %v40_v55 = vld [vmem:[%s661_s0 + $0xd0] sm:$0xff]  ;;  %v43_v57 = vld [vmem:[%s661_s0 + $0xe8] sm:$0xff]  ;;  %v42_v59 = vld [vmem:[%s661_s0 + $0xe0] sm:$0xff] }
  0x15   :  { %286 = vmatpush3.msra.mxu0 %v52_v19  ;;  %372 = vmatpush3.msra.mxu1 %v52_v19  ;;  %v29_v60 = vld [vmem:[%s661_s0 + $0x78] sm:$0xff]  ;;  %v28_v62 = vld [vmem:[%s661_s0 + $0x70] sm:$0xff]  ;;  %v594_v2 = vld [vmem:[%s662_s2] ss:$0 sm:$0xff] }
  0x16   :  { %287 = vmatprep.subr.mxu0 %v67_v20  ;;  %357 = vmatprep.subr.mxu1 %v67_v20  ;;  %v45_v61 = vld [vmem:[%s661_s0 + $0xf8] sm:$0xff]  ;;  %v44_v63 = vld [vmem:[%s661_s0 + $0xf0] sm:$0xff] }
  0x17   :  { %288 = vmatpush3.msra.mxu0 %v51_v21  ;;  %373 = vmatpush3.msra.mxu1 %v51_v21 }
  0x18   :  { %289 = vmatprep.subr.mxu0 %v66_v22  ;;  %358 = vmatprep.subr.mxu1 %v66_v22 }
  0x19   :  { %290 = vmatpush3.msra.mxu0 %v50_v23  ;;  %374 = vmatpush3.msra.mxu1 %v50_v23 }
  0x1a   :  { %291 = vmatprep.subr.mxu0 %v65_v24  ;;  %359 = vmatprep.subr.mxu1 %v65_v24 }
  0x1b   :  { %292 = vmatpush3.msra.mxu0 %v49_v25  ;;  %375 = vmatpush3.msra.mxu1 %v49_v25 }
  0x1c   :  { %293 = vmatprep.subr.mxu0 %v64_v26  ;;  %360 = vmatprep.subr.mxu1 %v64_v26 }
  0x1d   :  { %294 = vmatpush3.msra.mxu0 %v48_v27  ;;  %376 = vmatpush3.msra.mxu1 %v48_v27 }
  0x1e   :  { %295 = vmatprep.subr.mxu0 %v63_v28  ;;  %361 = vmatprep.subr.mxu1 %v63_v28 }
  0x1f   :  { %296 = vmatpush3.msra.mxu0 %v47_v29  ;;  %377 = vmatpush3.msra.mxu1 %v47_v29 }
  0x20   :  { %297 = vmatprep.subr.mxu0 %v62_v30  ;;  %362 = vmatprep.subr.mxu1 %v62_v30 }
  0x21   :  { %298 = vmatpush3.msra.mxu0 %v46_v31  ;;  %378 = vmatpush3.msra.mxu1 %v46_v31 }
  0x22   :  { %149 = vmatprep.mubr.f32.mxu0 %v15_v32  ;;  %189 = vmatprep.mubr.f32.mxu1 %v31_v33 }
  0x23   :  { %150 = vmatmul.mubr.f32.vlgmr.msra.gmra.mxu0 %v14_v34  ;;  %190 = vmatmul.mubr.f32.vlgmr.msra.gmra.mxu1 %v30_v35 }
  0x24   :  { %154 = vmatprep.mubr.f32.mxu0 %v17_v36  ;;  %194 = vmatprep.mubr.f32.mxu1 %v33_v37 }
  0x27   :  { %155 = vmatmul.mubr.f32.gmra.mxu0 %v16_v38  ;;  %195 = vmatmul.mubr.f32.gmra.mxu1 %v32_v39 }
  0x28   :  { %159 = vmatprep.mubr.f32.mxu0 %v19_v40  ;;  %199 = vmatprep.mubr.f32.mxu1 %v35_v41 }
  0x2b   :  { %160 = vmatmul.mubr.f32.gmra.mxu0 %v18_v42  ;;  %200 = vmatmul.mubr.f32.gmra.mxu1 %v34_v43 }
  0x2c   :  { %164 = vmatprep.mubr.f32.mxu0 %v21_v44  ;;  %204 = vmatprep.mubr.f32.mxu1 %v37_v45 }
  0x2f   :  { %165 = vmatmul.mubr.f32.gmra.mxu0 %v20_v46  ;;  %205 = vmatmul.mubr.f32.gmra.mxu1 %v36_v47 }
  0x30   :  { %169 = vmatprep.mubr.f32.mxu0 %v23_v48  ;;  %209 = vmatprep.mubr.f32.mxu1 %v39_v49 }
  0x33   :  { %170 = vmatmul.mubr.f32.gmra.mxu0 %v22_v50  ;;  %210 = vmatmul.mubr.f32.gmra.mxu1 %v38_v51 }
  0x34   :  { %174 = vmatprep.mubr.f32.mxu0 %v25_v52  ;;  %214 = vmatprep.mubr.f32.mxu1 %v41_v53 }
  0x37   :  { %175 = vmatmul.mubr.f32.gmra.mxu0 %v24_v54  ;;  %215 = vmatmul.mubr.f32.gmra.mxu1 %v40_v55 }
  0x38   :  { %179 = vmatprep.mubr.f32.mxu0 %v27_v56  ;;  %219 = vmatprep.mubr.f32.mxu1 %v43_v57 }
  0x3b   :  { %180 = vmatmul.mubr.f32.gmra.mxu0 %v26_v58  ;;  %220 = vmatmul.mubr.f32.gmra.mxu1 %v42_v59 }
  0x3c   :  { %184 = vmatprep.mubr.f32.mxu0 %v29_v60  ;;  %224 = vmatprep.mubr.f32.mxu1 %v45_v61 }
  0x3f   :  { %185 = vmatmul.mubr.f32.gmra.mxu0 %v28_v62  ;;  %225 = vmatmul.mubr.f32.gmra.mxu1 %v44_v63 }
  0xe3   :  { %v299_v0 = vpop.f32.mrf.mxu0  ;;  %v323_v1 = vpop.f32.mrf.mxu1 }
  0xe5   :  { %v300_v3 = vpop.f32.mrf.mxu0  ;;  %v324_v4 = vpop.f32.mrf.mxu1 }
  0xe6   :  { %v301_v5 = vadd.f32 %v300_v3, %v299_v0  ;;  %v325_v6 = vadd.f32 %v324_v4, %v323_v1 }
  0xe7   :  { %v302_v7 = vpop.f32.mrf.mxu0  ;;  %v326_v8 = vpop.f32.mrf.mxu1 }
  0xe8   :  { %v152_v9 = vadd.f32 %v301_v5, %v594_v2  ;;  %v192_v10 = vadd.f32 %v325_v6, %v594_v2 }
  0xe9   :  { %v303_v11 = vpop.f32.mrf.mxu0  ;;  %v327_v12 = vpop.f32.mrf.mxu1 }
  0xea   :  { %v230_v13 = vmax.f32 %v152_v9, 0.0  ;;  %v238_v14 = vmax.f32 %v192_v10, 0.0  ;;  %v304_v15 = vadd.f32 %v303_v11, %v302_v7  ;;  %v328_v16 = vadd.f32 %v327_v12, %v326_v8 }
  0xeb   :  { %v305_v17 = vpop.f32.mrf.mxu0  ;;  %v329_v18 = vpop.f32.mrf.mxu1 }
  0xec   :  { %246 = vst [vmem:[%s663_s3] sm:$0xff] %v230_v13  ;;  %254 = vst [vmem:[%s663_s3 + $0x40] sm:$0xff] %v238_v14  ;;  %v157_v19 = vadd.f32 %v304_v15, %v594_v2  ;;  %v197_v20 = vadd.f32 %v328_v16, %v594_v2 }
  0xed   :  { %v306_v21 = vpop.f32.mrf.mxu0  ;;  %v330_v22 = vpop.f32.mrf.mxu1 }
  0xee   :  { %v231_v23 = vmax.f32 %v157_v19, 0.0  ;;  %v239_v24 = vmax.f32 %v197_v20, 0.0  ;;  %v307_v25 = vadd.f32 %v306_v21, %v305_v17  ;;  %v331_v26 = vadd.f32 %v330_v22, %v329_v18 }
  0xef   :  { %v308_v27 = vpop.f32.mrf.mxu0  ;;  %v332_v28 = vpop.f32.mrf.mxu1 }
  0xf0   :  { %247 = vst [vmem:[%s663_s3 + $0x8] sm:$0xff] %v231_v23  ;;  %255 = vst [vmem:[%s663_s3 + $0x48] sm:$0xff] %v239_v24  ;;  %v162_v29 = vadd.f32 %v307_v25, %v594_v2  ;;  %v202_v30 = vadd.f32 %v331_v26, %v594_v2 }
  0xf1   :  { %v309_v31 = vpop.f32.mrf.mxu0  ;;  %v333_v32 = vpop.f32.mrf.mxu1 }
  0xf2   :  { %v232_v33 = vmax.f32 %v162_v29, 0.0  ;;  %v240_v34 = vmax.f32 %v202_v30, 0.0  ;;  %v310_v35 = vadd.f32 %v309_v31, %v308_v27  ;;  %v334_v36 = vadd.f32 %v333_v32, %v332_v28 }
  0xf3   :  { %v311_v37 = vpop.f32.mrf.mxu0  ;;  %v335_v38 = vpop.f32.mrf.mxu1 }
  0xf4   :  { %248 = vst [vmem:[%s663_s3 + $0x10] sm:$0xff] %v232_v33  ;;  %256 = vst [vmem:[%s663_s3 + $0x50] sm:$0xff] %v240_v34  ;;  %v167_v39 = vadd.f32 %v310_v35, %v594_v2  ;;  %v207_v40 = vadd.f32 %v334_v36, %v594_v2 }
  0xf5   :  { %v312_v41 = vpop.f32.mrf.mxu0  ;;  %v336_v42 = vpop.f32.mrf.mxu1 }
  0xf6   :  { %v233_v43 = vmax.f32 %v167_v39, 0.0  ;;  %v241_v44 = vmax.f32 %v207_v40, 0.0  ;;  %v313_v45 = vadd.f32 %v312_v41, %v311_v37  ;;  %v337_v46 = vadd.f32 %v336_v42, %v335_v38 }
  0xf7   :  { %v314_v47 = vpop.f32.mrf.mxu0  ;;  %v338_v48 = vpop.f32.mrf.mxu1 }
  0xf8   :  { %249 = vst [vmem:[%s663_s3 + $0x18] sm:$0xff] %v233_v43  ;;  %257 = vst [vmem:[%s663_s3 + $0x58] sm:$0xff] %v241_v44  ;;  %v172_v49 = vadd.f32 %v313_v45, %v594_v2  ;;  %v212_v50 = vadd.f32 %v337_v46, %v594_v2 }
  0xf9   :  { %v315_v51 = vpop.f32.mrf.mxu0  ;;  %v339_v52 = vpop.f32.mrf.mxu1 }
  0xfa   :  { %v234_v53 = vmax.f32 %v172_v49, 0.0  ;;  %v242_v54 = vmax.f32 %v212_v50, 0.0  ;;  %v316_v55 = vadd.f32 %v315_v51, %v314_v47  ;;  %v340_v56 = vadd.f32 %v339_v52, %v338_v48 }
  0xfb   :  { %v317_v57 = vpop.f32.mrf.mxu0  ;;  %v341_v58 = vpop.f32.mrf.mxu1 }
  0xfc   :  { %250 = vst [vmem:[%s663_s3 + $0x20] sm:$0xff] %v234_v53  ;;  %258 = vst [vmem:[%s663_s3 + $0x60] sm:$0xff] %v242_v54  ;;  %v177_v59 = vadd.f32 %v316_v55, %v594_v2  ;;  %v217_v60 = vadd.f32 %v340_v56, %v594_v2 }
  0xfd   :  { %v318_v61 = vpop.f32.mrf.mxu0  ;;  %v342_v62 = vpop.f32.mrf.mxu1 }
  0xfe   :  { %v235_v63 = vmax.f32 %v177_v59, 0.0  ;;  %v243_v0 = vmax.f32 %v217_v60, 0.0  ;;  %v319_v1 = vadd.f32 %v318_v61, %v317_v57  ;;  %v343_v3 = vadd.f32 %v342_v62, %v341_v58 }
  0xff   :  { %v320_v4 = vpop.f32.mrf.mxu0  ;;  %v344_v5 = vpop.f32.mrf.mxu1 }
 0x100   :  { %251 = vst [vmem:[%s663_s3 + $0x28] sm:$0xff] %v235_v63  ;;  %259 = vst [vmem:[%s663_s3 + $0x68] sm:$0xff] %v243_v0  ;;  %v182_v6 = vadd.f32 %v319_v1, %v594_v2  ;;  %v222_v7 = vadd.f32 %v343_v3, %v594_v2 }
 0x101   :  { %v321_v8 = vpop.f32.mrf.mxu0  ;;  %v345_v9 = vpop.f32.mrf.mxu1 }
 0x102   :  { %v236_v10 = vmax.f32 %v182_v6, 0.0  ;;  %v244_v11 = vmax.f32 %v222_v7, 0.0  ;;  %v322_v12 = vadd.f32 %v321_v8, %v320_v4  ;;  %v346_v13 = vadd.f32 %v345_v9, %v344_v5 }
 0x104   :  { %252 = vst [vmem:[%s663_s3 + $0x30] sm:$0xff] %v236_v10  ;;  %260 = vst [vmem:[%s663_s3 + $0x70] sm:$0xff] %v244_v11  ;;  %v187_v14 = vadd.f32 %v322_v12, %v594_v2  ;;  %v227_v15 = vadd.f32 %v346_v13, %v594_v2 }
 0x106   :  { %v237_v16 = vmax.f32 %v187_v14, 0.0  ;;  %v245_v17 = vmax.f32 %v227_v15, 0.0 }
 0x108   :  { %253 = vst [vmem:[%s663_s3 + $0x38] sm:$0xff] %v237_v16  ;;  %261 = vst [vmem:[%s663_s3 + $0x78] sm:$0xff] %v245_v17 }

// kernel: _lambda_.9
= control target key start
LH: loop header
LB: loop body
LE: loop exit
PB: predicated region body
PF: predicated region fallthrough
CT: control target
= control target key end

     0   :  { %s989_s1 = inlined_call_operand.vmem [shape: f32[384,128], index: 1, kind: input, shape index: {}]   ;;  %s990_s0 = inlined_call_operand.vmem [shape: f32[128,384], index: 0, kind: input, shape index: {}]   ;;  %s991_s2 = inlined_call_operand.vmem [shape: f32[1,128], index: 2, kind: input, shape index: {}]   ;;  %s992_s3 = inlined_call_operand.vmem [shape: f32[128,128], index: 3, kind: output, shape index: {}]  }
   0x1   :  { %v93_v0 = vld [vmem:[%s989_s1 + $0xf8] sm:$0xff]  ;;  %v92_v2 = vld [vmem:[%s989_s1 + $0xf0] sm:$0xff]  ;;  %v91_v5 = vld [vmem:[%s989_s1 + $0xe8] sm:$0xff] }
   0x2   :  { %v77_v1 = vld [vmem:[%s989_s1 + $0x78] sm:$0xff]  ;;  %444 = vmatprep.subr.mxu0 %v93_v0  ;;  %v76_v3 = vld [vmem:[%s989_s1 + $0x70] sm:$0xff]  ;;  %v75_v7 = vld [vmem:[%s989_s1 + $0x68] sm:$0xff] }
   0x3   :  { %v109_v4 = vld [vmem:[%s989_s1 + $0x178] sm:$0xff]  ;;  %445 = vmatpush3.msra.mxu0 %v77_v1  ;;  %v108_v6 = vld [vmem:[%s989_s1 + $0x170] sm:$0xff]  ;;  %v107_v8 = vld [vmem:[%s989_s1 + $0x168] sm:$0xff] }
   0x4   :  { %556 = vmatprep.subr.mxu1 %v109_v4  ;;  %446 = vmatprep.subr.mxu0 %v92_v2  ;;  %v90_v9 = vld [vmem:[%s989_s1 + $0xe0] sm:$0xff]  ;;  %v89_v12 = vld [vmem:[%s989_s1 + $0xd8] sm:$0xff]  ;;  %v88_v15 = vld [vmem:[%s989_s1 + $0xd0] sm:$0xff] }
   0x5   :  { %557 = vmatpush3.msra.mxu1 %v109_v4  ;;  %447 = vmatpush3.msra.mxu0 %v76_v3  ;;  %v74_v10 = vld [vmem:[%s989_s1 + $0x60] sm:$0xff]  ;;  %v73_v13 = vld [vmem:[%s989_s1 + $0x58] sm:$0xff]  ;;  %v72_v16 = vld [vmem:[%s989_s1 + $0x50] sm:$0xff] }
   0x6   :  { %558 = vmatprep.subr.mxu1 %v108_v6  ;;  %448 = vmatprep.subr.mxu0 %v91_v5  ;;  %v106_v11 = vld [vmem:[%s989_s1 + $0x160] sm:$0xff]  ;;  %v105_v14 = vld [vmem:[%s989_s1 + $0x158] sm:$0xff]  ;;  %v104_v17 = vld [vmem:[%s989_s1 + $0x150] sm:$0xff] }
   0x7   :  { %559 = vmatpush3.msra.mxu1 %v108_v6  ;;  %449 = vmatpush3.msra.mxu0 %v75_v7  ;;  %v87_v18 = vld [vmem:[%s989_s1 + $0xc8] sm:$0xff]  ;;  %v86_v21 = vld [vmem:[%s989_s1 + $0xc0] sm:$0xff]  ;;  %v85_v24 = vld [vmem:[%s989_s1 + $0xb8] sm:$0xff] }
   0x8   :  { %560 = vmatprep.subr.mxu1 %v107_v8  ;;  %450 = vmatprep.subr.mxu0 %v90_v9  ;;  %v71_v19 = vld [vmem:[%s989_s1 + $0x48] sm:$0xff]  ;;  %v70_v22 = vld [vmem:[%s989_s1 + $0x40] sm:$0xff]  ;;  %v69_v25 = vld [vmem:[%s989_s1 + $0x38] sm:$0xff] }
   0x9   :  { %561 = vmatpush3.msra.mxu1 %v107_v8  ;;  %451 = vmatpush3.msra.mxu0 %v74_v10  ;;  %v103_v20 = vld [vmem:[%s989_s1 + $0x148] sm:$0xff]  ;;  %v102_v23 = vld [vmem:[%s989_s1 + $0x140] sm:$0xff]  ;;  %v101_v26 = vld [vmem:[%s989_s1 + $0x138] sm:$0xff] }
   0xa   :  { %562 = vmatprep.subr.mxu1 %v106_v11  ;;  %452 = vmatprep.subr.mxu0 %v89_v12  ;;  %v84_v27 = vld [vmem:[%s989_s1 + $0xb0] sm:$0xff]  ;;  %v83_v30 = vld [vmem:[%s989_s1 + $0xa8] sm:$0xff]  ;;  %v82_v33 = vld [vmem:[%s989_s1 + $0xa0] sm:$0xff] }
   0xb   :  { %563 = vmatpush3.msra.mxu1 %v106_v11  ;;  %453 = vmatpush3.msra.mxu0 %v73_v13  ;;  %v68_v28 = vld [vmem:[%s989_s1 + $0x30] sm:$0xff]  ;;  %v67_v31 = vld [vmem:[%s989_s1 + $0x28] sm:$0xff]  ;;  %v66_v34 = vld [vmem:[%s989_s1 + $0x20] sm:$0xff] }
   0xc   :  { %564 = vmatprep.subr.mxu1 %v105_v14  ;;  %454 = vmatprep.subr.mxu0 %v88_v15  ;;  %v100_v29 = vld [vmem:[%s989_s1 + $0x130] sm:$0xff]  ;;  %v99_v32 = vld [vmem:[%s989_s1 + $0x128] sm:$0xff]  ;;  %v98_v35 = vld [vmem:[%s989_s1 + $0x120] sm:$0xff] }
   0xd   :  { %565 = vmatpush3.msra.mxu1 %v105_v14  ;;  %455 = vmatpush3.msra.mxu0 %v72_v16  ;;  %v81_v36 = vld [vmem:[%s989_s1 + $0x98] sm:$0xff]  ;;  %v80_v39 = vld [vmem:[%s989_s1 + $0x90] sm:$0xff]  ;;  %v79_v42 = vld [vmem:[%s989_s1 + $0x88] sm:$0xff] }
   0xe   :  { %566 = vmatprep.subr.mxu1 %v104_v17  ;;  %456 = vmatprep.subr.mxu0 %v87_v18  ;;  %v65_v37 = vld [vmem:[%s989_s1 + $0x18] sm:$0xff]  ;;  %v64_v40 = vld [vmem:[%s989_s1 + $0x10] sm:$0xff]  ;;  %v15_v43 = vld [vmem:[%s990_s0 + $0x8] sm:$0xff] }
   0xf   :  { %567 = vmatpush3.msra.mxu1 %v104_v17  ;;  %457 = vmatpush3.msra.mxu0 %v71_v19  ;;  %v97_v38 = vld [vmem:[%s989_s1 + $0x118] sm:$0xff]  ;;  %v96_v41 = vld [vmem:[%s989_s1 + $0x110] sm:$0xff]  ;;  %v63_v44 = vld [vmem:[%s989_s1 + $0x8] sm:$0xff] }
  0x10   :  { %568 = vmatprep.subr.mxu1 %v103_v20  ;;  %458 = vmatprep.subr.mxu0 %v86_v21  ;;  %v78_v45 = vld [vmem:[%s989_s1 + $0x80] sm:$0xff]  ;;  %v95_v46 = vld [vmem:[%s989_s1 + $0x108] sm:$0xff]  ;;  %v16_v51 = vld [vmem:[%s990_s0 + $0x10] sm:$0xff] }
  0x11   :  { %569 = vmatpush3.msra.mxu1 %v103_v20  ;;  %459 = vmatpush3.msra.mxu0 %v70_v22  ;;  %v62_v47 = vld [vmem:[%s989_s1] sm:$0xff]  ;;  %v19_v52 = vld [vmem:[%s990_s0 + $0x28] sm:$0xff]  ;;  %v17_v53 = vld [vmem:[%s990_s0 + $0x18] sm:$0xff] }
  0x12   :  { %570 = vmatprep.subr.mxu1 %v102_v23  ;;  %460 = vmatprep.subr.mxu0 %v85_v24  ;;  %v14_v48 = vld [vmem:[%s990_s0] sm:$0xff]  ;;  %v21_v55 = vld [vmem:[%s990_s0 + $0x38] sm:$0xff]  ;;  %v20_v57 = vld [vmem:[%s990_s0 + $0x30] sm:$0xff] }
  0x13   :  { %571 = vmatpush3.msra.mxu1 %v102_v23  ;;  %461 = vmatpush3.msra.mxu0 %v69_v25  ;;  %v94_v49 = vld [vmem:[%s989_s1 + $0x100] sm:$0xff]  ;;  %v25_v56 = vld [vmem:[%s990_s0 + $0x58] sm:$0xff]  ;;  %v28_v58 = vld [vmem:[%s990_s0 + $0x70] sm:$0xff] }
  0x14   :  { %572 = vmatprep.subr.mxu1 %v101_v26  ;;  %462 = vmatprep.subr.mxu0 %v84_v27  ;;  %v18_v50 = vld [vmem:[%s990_s0 + $0x20] sm:$0xff]  ;;  %v24_v59 = vld [vmem:[%s990_s0 + $0x50] sm:$0xff]  ;;  %v31_v60 = vld [vmem:[%s990_s0 + $0x88] sm:$0xff] }
  0x15   :  { %573 = vmatpush3.msra.mxu1 %v101_v26  ;;  %463 = vmatpush3.msra.mxu0 %v68_v28  ;;  %v22_v54 = vld [vmem:[%s990_s0 + $0x40] sm:$0xff]  ;;  %v23_v61 = vld [vmem:[%s990_s0 + $0x48] sm:$0xff]  ;;  %v37_v0 = vld [vmem:[%s990_s0 + $0xb8] sm:$0xff] }
  0x16   :  { %574 = vmatprep.subr.mxu1 %v100_v29  ;;  %464 = vmatprep.subr.mxu0 %v83_v30  ;;  %v34_v62 = vld [vmem:[%s990_s0 + $0xa0] sm:$0xff]  ;;  %v27_v63 = vld [vmem:[%s990_s0 + $0x68] sm:$0xff]  ;;  %v40_v2 = vld [vmem:[%s990_s0 + $0xd0] sm:$0xff] }
  0x17   :  { %575 = vmatpush3.msra.mxu1 %v100_v29  ;;  %465 = vmatpush3.msra.mxu0 %v67_v31  ;;  %v26_v1 = vld [vmem:[%s990_s0 + $0x60] sm:$0xff]  ;;  %v43_v4 = vld [vmem:[%s990_s0 + $0xe8] sm:$0xff]  ;;  %v29_v5 = vld [vmem:[%s990_s0 + $0x78] sm:$0xff] }
  0x18   :  { %576 = vmatprep.subr.mxu1 %v99_v32  ;;  %466 = vmatprep.subr.mxu0 %v82_v33  ;;  %v30_v3 = vld [vmem:[%s990_s0 + $0x80] sm:$0xff]  ;;  %v33_v7 = vld [vmem:[%s990_s0 + $0x98] sm:$0xff]  ;;  %v32_v9 = vld [vmem:[%s990_s0 + $0x90] sm:$0xff] }
  0x19   :  { %577 = vmatpush3.msra.mxu1 %v99_v32  ;;  %467 = vmatpush3.msra.mxu0 %v66_v34  ;;  %v46_v6 = vld [vmem:[%s990_s0 + $0x100] sm:$0xff]  ;;  %v49_v8 = vld [vmem:[%s990_s0 + $0x118] sm:$0xff]  ;;  %v52_v10 = vld [vmem:[%s990_s0 + $0x130] sm:$0xff] }
  0x1a   :  { %578 = vmatprep.subr.mxu1 %v98_v35  ;;  %468 = vmatprep.subr.mxu0 %v81_v36  ;;  %v36_v11 = vld [vmem:[%s990_s0 + $0xb0] sm:$0xff]  ;;  %v55_v12 = vld [vmem:[%s990_s0 + $0x148] sm:$0xff]  ;;  %v58_v14 = vld [vmem:[%s990_s0 + $0x160] sm:$0xff] }
  0x1b   :  { %579 = vmatpush3.msra.mxu1 %v98_v35  ;;  %469 = vmatpush3.msra.mxu0 %v65_v37  ;;  %v35_v13 = vld [vmem:[%s990_s0 + $0xa8] sm:$0xff]  ;;  %v61_v16 = vld [vmem:[%s990_s0 + $0x178] sm:$0xff]  ;;  %v38_v17 = vld [vmem:[%s990_s0 + $0xc0] sm:$0xff] }
  0x1c   :  { %580 = vmatprep.subr.mxu1 %v97_v38  ;;  %470 = vmatprep.subr.mxu0 %v80_v39  ;;  %v39_v15 = vld [vmem:[%s990_s0 + $0xc8] sm:$0xff]  ;;  %v42_v18 = vld [vmem:[%s990_s0 + $0xe0] sm:$0xff]  ;;  %v41_v19 = vld [vmem:[%s990_s0 + $0xd8] sm:$0xff] }
  0x1d   :  { %581 = vmatpush3.msra.mxu1 %v97_v38  ;;  %471 = vmatpush3.msra.mxu0 %v64_v40  ;;  %v45_v20 = vld [vmem:[%s990_s0 + $0xf8] sm:$0xff]  ;;  %v44_v21 = vld [vmem:[%s990_s0 + $0xf0] sm:$0xff]  ;;  %v47_v23 = vld [vmem:[%s990_s0 + $0x108] sm:$0xff] }
  0x1e   :  { %582 = vmatprep.subr.mxu1 %v96_v41  ;;  %472 = vmatprep.subr.mxu0 %v79_v42  ;;  %v48_v22 = vld [vmem:[%s990_s0 + $0x110] sm:$0xff]  ;;  %v51_v24 = vld [vmem:[%s990_s0 + $0x128] sm:$0xff]  ;;  %v50_v25 = vld [vmem:[%s990_s0 + $0x120] sm:$0xff] }
  0x1f   :  { %181 = vmatprep.mubr.f32.mxu0 %v15_v43  ;;  %473 = vmatpush3.msra.mxu0 %v63_v44  ;;  %v54_v26 = vld [vmem:[%s990_s0 + $0x140] sm:$0xff]  ;;  %v53_v27 = vld [vmem:[%s990_s0 + $0x138] sm:$0xff]  ;;  %v56_v29 = vld [vmem:[%s990_s0 + $0x150] sm:$0xff] }
  0x20   :  { %583 = vmatpush3.msra.mxu1 %v96_v41  ;;  %474 = vmatprep.subr.mxu0 %v78_v45  ;;  %v57_v28 = vld [vmem:[%s990_s0 + $0x158] sm:$0xff]  ;;  %v60_v30 = vld [vmem:[%s990_s0 + $0x170] sm:$0xff]  ;;  %v59_v31 = vld [vmem:[%s990_s0 + $0x168] sm:$0xff] }
  0x21   :  { %584 = vmatprep.subr.mxu1 %v95_v46  ;;  %475 = vmatpush3.msra.mxu0 %v62_v47  ;;  %v923_v34 = vld [vmem:[%s991_s2] ss:$0 sm:$0xff] }
  0x22   :  { %585 = vmatpush3.msra.mxu1 %v95_v46  ;;  %182 = vmatmul.mubr.f32.vlgmr.msra.gmra.mxu0 %v14_v48 }
  0x23   :  { %586 = vmatprep.subr.mxu1 %v94_v49  ;;  %186 = vmatprep.mubr.f32.mxu0 %v18_v50 }
  0x24   :  { %587 = vmatpush3.msra.mxu1 %v94_v49  ;;  %588 = vmatprep.mubr.f32.mxu1 %v16_v51 }
  0x25   :  { %589 = vmatmul.mubr.f32.vlgmr.msra.gmra.mxu1 %v19_v52 }
  0x26   :  { %187 = vmatmul.mubr.f32.gmra.mxu0 %v17_v53  ;;  %591 = vmatprep.mubr.f32.mxu1 %v22_v54 }
  0x27   :  { %191 = vmatprep.mubr.f32.mxu0 %v21_v55 }
  0x29   :  { %592 = vmatmul.mubr.f32.gmra.mxu1 %v25_v56 }
  0x2a   :  { %192 = vmatmul.mubr.f32.gmra.mxu0 %v20_v57  ;;  %594 = vmatprep.mubr.f32.mxu1 %v28_v58 }
  0x2b   :  { %196 = vmatprep.mubr.f32.mxu0 %v24_v59 }
  0x2d   :  { %595 = vmatmul.mubr.f32.gmra.mxu1 %v31_v60 }
  0x2e   :  { %197 = vmatmul.mubr.f32.gmra.mxu0 %v23_v61  ;;  %597 = vmatprep.mubr.f32.mxu1 %v34_v62 }
  0x2f   :  { %201 = vmatprep.mubr.f32.mxu0 %v27_v63 }
  0x31   :  { %598 = vmatmul.mubr.f32.gmra.mxu1 %v37_v0 }
  0x32   :  { %202 = vmatmul.mubr.f32.gmra.mxu0 %v26_v1  ;;  %600 = vmatprep.mubr.f32.mxu1 %v40_v2 }
  0x33   :  { %206 = vmatprep.mubr.f32.mxu0 %v30_v3 }
  0x35   :  { %601 = vmatmul.mubr.f32.gmra.mxu1 %v43_v4 }
  0x36   :  { %207 = vmatmul.mubr.f32.gmra.mxu0 %v29_v5  ;;  %603 = vmatprep.mubr.f32.mxu1 %v46_v6 }
  0x37   :  { %211 = vmatprep.mubr.f32.mxu0 %v33_v7 }
  0x39   :  { %604 = vmatmul.mubr.f32.gmra.mxu1 %v49_v8 }
  0x3a   :  { %212 = vmatmul.mubr.f32.gmra.mxu0 %v32_v9  ;;  %606 = vmatprep.mubr.f32.mxu1 %v52_v10 }
  0x3b   :  { %216 = vmatprep.mubr.f32.mxu0 %v36_v11 }
  0x3d   :  { %607 = vmatmul.mubr.f32.gmra.mxu1 %v55_v12 }
  0x3e   :  { %217 = vmatmul.mubr.f32.gmra.mxu0 %v35_v13  ;;  %609 = vmatprep.mubr.f32.mxu1 %v58_v14 }
  0x3f   :  { %221 = vmatprep.mubr.f32.mxu0 %v39_v15 }
  0x41   :  { %610 = vmatmul.mubr.f32.gmra.mxu1 %v61_v16 }
  0x42   :  { %222 = vmatmul.mubr.f32.gmra.mxu0 %v38_v17 }
  0x43   :  { %226 = vmatprep.mubr.f32.mxu0 %v42_v18 }
  0x46   :  { %227 = vmatmul.mubr.f32.gmra.mxu0 %v41_v19 }
  0x47   :  { %231 = vmatprep.mubr.f32.mxu0 %v45_v20 }
  0x4a   :  { %232 = vmatmul.mubr.f32.gmra.mxu0 %v44_v21 }
  0x4b   :  { %236 = vmatprep.mubr.f32.mxu0 %v48_v22 }
  0x4e   :  { %237 = vmatmul.mubr.f32.gmra.mxu0 %v47_v23 }
  0x4f   :  { %241 = vmatprep.mubr.f32.mxu0 %v51_v24 }
  0x52   :  { %242 = vmatmul.mubr.f32.gmra.mxu0 %v50_v25 }
  0x53   :  { %246 = vmatprep.mubr.f32.mxu0 %v54_v26 }
  0x56   :  { %247 = vmatmul.mubr.f32.gmra.mxu0 %v53_v27 }
  0x57   :  { %251 = vmatprep.mubr.f32.mxu0 %v57_v28 }
  0x5a   :  { %252 = vmatmul.mubr.f32.gmra.mxu0 %v56_v29 }
  0x5b   :  { %256 = vmatprep.mubr.f32.mxu0 %v60_v30 }
  0x5e   :  { %257 = vmatmul.mubr.f32.gmra.mxu0 %v59_v31 }
  0xe2   :  { %v476_v32 = vpop.f32.mrf.mxu0 }
  0xe4   :  { %v477_v33 = vpop.f32.mrf.mxu0 }
  0xe5   :  { %v478_v35 = vadd.f32 %v477_v33, %v476_v32  ;;  %v590_v36 = vpop.f32.mrf.mxu1 }
  0xe6   :  { %v479_v37 = vpop.f32.mrf.mxu0 }
  0xe7   :  { %v184_v38 = vadd.f32 %v478_v35, %v923_v34  ;;  %v328_v39 = vpop.f32.mrf.mxu1 }
  0xe8   :  { %v480_v40 = vpop.f32.mrf.mxu0 }
  0xe9   :  { %v481_v41 = vadd.f32 %v480_v40, %v479_v37  ;;  %v329_v42 = vadd.f32 %v328_v39, %v184_v38  ;;  %v593_v44 = vpop.f32.mrf.mxu1 }
  0xea   :  { %v482_v43 = vpop.f32.mrf.mxu0 }
  0xeb   :  { %v189_v45 = vadd.f32 %v481_v41, %v923_v34  ;;  %v407_v46 = vmax.f32 %v329_v42, 0.0  ;;  %v338_v51 = vpop.f32.mrf.mxu1 }
  0xec   :  { %v483_v47 = vpop.f32.mrf.mxu0 }
  0xed   :  { %v334_v48 = vadd.f32 %v590_v36, %v189_v45  ;;  %423 = vst [vmem:[%s992_s3] sm:$0xff] %v407_v46  ;;  %v484_v49 = vadd.f32 %v483_v47, %v482_v43  ;;  %v596_v58 = vpop.f32.mrf.mxu1 }
  0xee   :  { %v485_v50 = vpop.f32.mrf.mxu0 }
  0xef   :  { %v408_v52 = vmax.f32 %v334_v48, 0.0  ;;  %v194_v53 = vadd.f32 %v484_v49, %v923_v34  ;;  %v348_v1 = vpop.f32.mrf.mxu1 }
  0xf0   :  { %v486_v54 = vpop.f32.mrf.mxu0 }
  0xf1   :  { %424 = vst [vmem:[%s992_s3 + $0x8] sm:$0xff] %v408_v52  ;;  %v487_v55 = vadd.f32 %v486_v54, %v485_v50  ;;  %v339_v56 = vadd.f32 %v338_v51, %v194_v53  ;;  %v599_v8 = vpop.f32.mrf.mxu1 }
  0xf2   :  { %v488_v57 = vpop.f32.mrf.mxu0 }
  0xf3   :  { %v199_v59 = vadd.f32 %v487_v55, %v923_v34  ;;  %v409_v60 = vmax.f32 %v339_v56, 0.0  ;;  %v358_v15 = vpop.f32.mrf.mxu1 }
  0xf4   :  { %v489_v61 = vpop.f32.mrf.mxu0 }
  0xf5   :  { %v344_v62 = vadd.f32 %v593_v44, %v199_v59  ;;  %425 = vst [vmem:[%s992_s3 + $0x10] sm:$0xff] %v409_v60  ;;  %v490_v63 = vadd.f32 %v489_v61, %v488_v57  ;;  %v602_v22 = vpop.f32.mrf.mxu1 }
  0xf6   :  { %v491_v0 = vpop.f32.mrf.mxu0 }
  0xf7   :  { %v410_v2 = vmax.f32 %v344_v62, 0.0  ;;  %v204_v3 = vadd.f32 %v490_v63, %v923_v34  ;;  %v368_v29 = vpop.f32.mrf.mxu1 }
  0xf8   :  { %v492_v4 = vpop.f32.mrf.mxu0 }
  0xf9   :  { %426 = vst [vmem:[%s992_s3 + $0x18] sm:$0xff] %v410_v2  ;;  %v493_v5 = vadd.f32 %v492_v4, %v491_v0  ;;  %v349_v6 = vadd.f32 %v348_v1, %v204_v3  ;;  %v605_v37 = vpop.f32.mrf.mxu1 }
  0xfa   :  { %v494_v7 = vpop.f32.mrf.mxu0 }
  0xfb   :  { %v209_v9 = vadd.f32 %v493_v5, %v923_v34  ;;  %v411_v10 = vmax.f32 %v349_v6, 0.0  ;;  %v378_v44 = vpop.f32.mrf.mxu1 }
  0xfc   :  { %v495_v11 = vpop.f32.mrf.mxu0 }
  0xfd   :  { %v354_v12 = vadd.f32 %v596_v58, %v209_v9  ;;  %427 = vst [vmem:[%s992_s3 + $0x20] sm:$0xff] %v411_v10  ;;  %v496_v13 = vadd.f32 %v495_v11, %v494_v7  ;;  %v608_v51 = vpop.f32.mrf.mxu1 }
  0xfe   :  { %v497_v14 = vpop.f32.mrf.mxu0 }
  0xff   :  { %v412_v16 = vmax.f32 %v354_v12, 0.0  ;;  %v214_v17 = vadd.f32 %v496_v13, %v923_v34  ;;  %v388_v58 = vpop.f32.mrf.mxu1 }
 0x100   :  { %v498_v18 = vpop.f32.mrf.mxu0 }
 0x101   :  { %428 = vst [vmem:[%s992_s3 + $0x28] sm:$0xff] %v412_v16  ;;  %v499_v19 = vadd.f32 %v498_v18, %v497_v14  ;;  %v359_v20 = vadd.f32 %v358_v15, %v214_v17  ;;  %v611_v1 = vpop.f32.mrf.mxu1 }
 0x102   :  { %v500_v21 = vpop.f32.mrf.mxu0 }
 0x103   :  { %v219_v23 = vadd.f32 %v499_v19, %v923_v34  ;;  %v413_v24 = vmax.f32 %v359_v20, 0.0 }
 0x104   :  { %v501_v25 = vpop.f32.mrf.mxu0 }
 0x105   :  { %v364_v26 = vadd.f32 %v599_v8, %v219_v23  ;;  %429 = vst [vmem:[%s992_s3 + $0x30] sm:$0xff] %v413_v24  ;;  %v502_v27 = vadd.f32 %v501_v25, %v500_v21  ;;  %v398_v8 = vpop.f32.mrf.mxu1 }
 0x106   :  { %v503_v28 = vpop.f32.mrf.mxu0 }
 0x107   :  { %v414_v30 = vmax.f32 %v364_v26, 0.0  ;;  %v224_v31 = vadd.f32 %v502_v27, %v923_v34 }
 0x108   :  { %v504_v32 = vpop.f32.mrf.mxu0 }
 0x109   :  { %430 = vst [vmem:[%s992_s3 + $0x38] sm:$0xff] %v414_v30  ;;  %v505_v33 = vadd.f32 %v504_v32, %v503_v28  ;;  %v369_v35 = vadd.f32 %v368_v29, %v224_v31 }
 0x10a   :  { %v506_v36 = vpop.f32.mrf.mxu0 }
 0x10b   :  { %v229_v38 = vadd.f32 %v505_v33, %v923_v34  ;;  %v415_v39 = vmax.f32 %v369_v35, 0.0 }
 0x10c   :  { %v507_v40 = vpop.f32.mrf.mxu0 }
 0x10d   :  { %v374_v41 = vadd.f32 %v602_v22, %v229_v38  ;;  %431 = vst [vmem:[%s992_s3 + $0x40] sm:$0xff] %v415_v39  ;;  %v508_v42 = vadd.f32 %v507_v40, %v506_v36 }
 0x10e   :  { %v509_v43 = vpop.f32.mrf.mxu0 }
 0x10f   :  { %v416_v45 = vmax.f32 %v374_v41, 0.0  ;;  %v234_v46 = vadd.f32 %v508_v42, %v923_v34 }
 0x110   :  { %v510_v47 = vpop.f32.mrf.mxu0 }
 0x111   :  { %432 = vst [vmem:[%s992_s3 + $0x48] sm:$0xff] %v416_v45  ;;  %v511_v48 = vadd.f32 %v510_v47, %v509_v43  ;;  %v379_v49 = vadd.f32 %v378_v44, %v234_v46 }
 0x112   :  { %v512_v50 = vpop.f32.mrf.mxu0 }
 0x113   :  { %v239_v52 = vadd.f32 %v511_v48, %v923_v34  ;;  %v417_v53 = vmax.f32 %v379_v49, 0.0 }
 0x114   :  { %v513_v54 = vpop.f32.mrf.mxu0 }
 0x115   :  { %v384_v55 = vadd.f32 %v605_v37, %v239_v52  ;;  %433 = vst [vmem:[%s992_s3 + $0x50] sm:$0xff] %v417_v53  ;;  %v514_v56 = vadd.f32 %v513_v54, %v512_v50 }
 0x116   :  { %v515_v57 = vpop.f32.mrf.mxu0 }
 0x117   :  { %v418_v59 = vmax.f32 %v384_v55, 0.0  ;;  %v244_v60 = vadd.f32 %v514_v56, %v923_v34 }
 0x118   :  { %v516_v61 = vpop.f32.mrf.mxu0 }
 0x119   :  { %434 = vst [vmem:[%s992_s3 + $0x58] sm:$0xff] %v418_v59  ;;  %v517_v62 = vadd.f32 %v516_v61, %v515_v57  ;;  %v389_v63 = vadd.f32 %v388_v58, %v244_v60 }
 0x11a   :  { %v518_v0 = vpop.f32.mrf.mxu0 }
 0x11b   :  { %v249_v2 = vadd.f32 %v517_v62, %v923_v34  ;;  %v419_v3 = vmax.f32 %v389_v63, 0.0 }
 0x11c   :  { %v519_v4 = vpop.f32.mrf.mxu0 }
 0x11d   :  { %v394_v5 = vadd.f32 %v608_v51, %v249_v2  ;;  %435 = vst [vmem:[%s992_s3 + $0x60] sm:$0xff] %v419_v3  ;;  %v520_v6 = vadd.f32 %v519_v4, %v518_v0 }
 0x11e   :  { %v521_v7 = vpop.f32.mrf.mxu0 }
 0x11f   :  { %v420_v9 = vmax.f32 %v394_v5, 0.0  ;;  %v254_v10 = vadd.f32 %v520_v6, %v923_v34 }
 0x120   :  { %v522_v11 = vpop.f32.mrf.mxu0 }
 0x121   :  { %436 = vst [vmem:[%s992_s3 + $0x68] sm:$0xff] %v420_v9  ;;  %v523_v12 = vadd.f32 %v522_v11, %v521_v7  ;;  %v399_v13 = vadd.f32 %v398_v8, %v254_v10 }
 0x123   :  { %v259_v14 = vadd.f32 %v523_v12, %v923_v34  ;;  %v421_v15 = vmax.f32 %v399_v13, 0.0 }
 0x125   :  { %v404_v16 = vadd.f32 %v611_v1, %v259_v14  ;;  %437 = vst [vmem:[%s992_s3 + $0x70] sm:$0xff] %v421_v15 }
 0x127   :  { %v422_v17 = vmax.f32 %v404_v16, 0.0 }
 0x129   :  { %438 = vst [vmem:[%s992_s3 + $0x78] sm:$0xff] %v422_v17 }

// kernel: _lambda_.10
= control target key start
LH: loop header
LB: loop body
LE: loop exit
PB: predicated region body
PF: predicated region fallthrough
CT: control target
= control target key end

     0   :  { %s1077_s1 = inlined_call_operand.vmem [shape: f32[384,128], index: 1, kind: input, shape index: {}]   ;;  %s1078_s0 = inlined_call_operand.vmem [shape: f32[128,384], index: 0, kind: input, shape index: {}]   ;;  %s1079_s2 = inlined_call_operand.vmem [shape: f32[1,128], index: 2, kind: input, shape index: {}]   ;;  %s1080_s3 = inlined_call_operand.vmem [shape: f32[128,128], index: 3, kind: input, shape index: {}]   ;;  %s1081_s4 = inlined_call_operand.vmem [shape: f32[128,128], index: 4, kind: output, shape index: {}]  }
   0x1   :  { %v96_v0 = vld [vmem:[%s1077_s1 + $0xf8] sm:$0xff]  ;;  %v95_v2 = vld [vmem:[%s1077_s1 + $0xf0] sm:$0xff]  ;;  %v94_v5 = vld [vmem:[%s1077_s1 + $0xe8] sm:$0xff] }
   0x2   :  { %v80_v1 = vld [vmem:[%s1077_s1 + $0x78] sm:$0xff]  ;;  %479 = vmatprep.subr.mxu0 %v96_v0  ;;  %v79_v3 = vld [vmem:[%s1077_s1 + $0x70] sm:$0xff]  ;;  %v78_v7 = vld [vmem:[%s1077_s1 + $0x68] sm:$0xff] }
   0x3   :  { %v112_v4 = vld [vmem:[%s1077_s1 + $0x178] sm:$0xff]  ;;  %480 = vmatpush3.msra.mxu0 %v80_v1  ;;  %v111_v6 = vld [vmem:[%s1077_s1 + $0x170] sm:$0xff]  ;;  %v110_v8 = vld [vmem:[%s1077_s1 + $0x168] sm:$0xff] }
   0x4   :  { %591 = vmatprep.subr.mxu1 %v112_v4  ;;  %481 = vmatprep.subr.mxu0 %v95_v2  ;;  %v93_v9 = vld [vmem:[%s1077_s1 + $0xe0] sm:$0xff]  ;;  %v92_v12 = vld [vmem:[%s1077_s1 + $0xd8] sm:$0xff]  ;;  %v91_v15 = vld [vmem:[%s1077_s1 + $0xd0] sm:$0xff] }
   0x5   :  { %592 = vmatpush3.msra.mxu1 %v112_v4  ;;  %482 = vmatpush3.msra.mxu0 %v79_v3  ;;  %v77_v10 = vld [vmem:[%s1077_s1 + $0x60] sm:$0xff]  ;;  %v76_v13 = vld [vmem:[%s1077_s1 + $0x58] sm:$0xff]  ;;  %v75_v16 = vld [vmem:[%s1077_s1 + $0x50] sm:$0xff] }
   0x6   :  { %593 = vmatprep.subr.mxu1 %v111_v6  ;;  %483 = vmatprep.subr.mxu0 %v94_v5  ;;  %v109_v11 = vld [vmem:[%s1077_s1 + $0x160] sm:$0xff]  ;;  %v108_v14 = vld [vmem:[%s1077_s1 + $0x158] sm:$0xff]  ;;  %v107_v17 = vld [vmem:[%s1077_s1 + $0x150] sm:$0xff] }
   0x7   :  { %594 = vmatpush3.msra.mxu1 %v111_v6  ;;  %484 = vmatpush3.msra.mxu0 %v78_v7  ;;  %v90_v18 = vld [vmem:[%s1077_s1 + $0xc8] sm:$0xff]  ;;  %v89_v21 = vld [vmem:[%s1077_s1 + $0xc0] sm:$0xff]  ;;  %v88_v24 = vld [vmem:[%s1077_s1 + $0xb8] sm:$0xff] }
   0x8   :  { %595 = vmatprep.subr.mxu1 %v110_v8  ;;  %485 = vmatprep.subr.mxu0 %v93_v9  ;;  %v74_v19 = vld [vmem:[%s1077_s1 + $0x48] sm:$0xff]  ;;  %v73_v22 = vld [vmem:[%s1077_s1 + $0x40] sm:$0xff]  ;;  %v72_v25 = vld [vmem:[%s1077_s1 + $0x38] sm:$0xff] }
   0x9   :  { %596 = vmatpush3.msra.mxu1 %v110_v8  ;;  %486 = vmatpush3.msra.mxu0 %v77_v10  ;;  %v106_v20 = vld [vmem:[%s1077_s1 + $0x148] sm:$0xff]  ;;  %v105_v23 = vld [vmem:[%s1077_s1 + $0x140] sm:$0xff]  ;;  %v104_v26 = vld [vmem:[%s1077_s1 + $0x138] sm:$0xff] }
   0xa   :  { %597 = vmatprep.subr.mxu1 %v109_v11  ;;  %487 = vmatprep.subr.mxu0 %v92_v12  ;;  %v87_v27 = vld [vmem:[%s1077_s1 + $0xb0] sm:$0xff]  ;;  %v86_v30 = vld [vmem:[%s1077_s1 + $0xa8] sm:$0xff]  ;;  %v85_v33 = vld [vmem:[%s1077_s1 + $0xa0] sm:$0xff] }
   0xb   :  { %598 = vmatpush3.msra.mxu1 %v109_v11  ;;  %488 = vmatpush3.msra.mxu0 %v76_v13  ;;  %v71_v28 = vld [vmem:[%s1077_s1 + $0x30] sm:$0xff]  ;;  %v70_v31 = vld [vmem:[%s1077_s1 + $0x28] sm:$0xff]  ;;  %v69_v34 = vld [vmem:[%s1077_s1 + $0x20] sm:$0xff] }
   0xc   :  { %599 = vmatprep.subr.mxu1 %v108_v14  ;;  %489 = vmatprep.subr.mxu0 %v91_v15  ;;  %v103_v29 = vld [vmem:[%s1077_s1 + $0x130] sm:$0xff]  ;;  %v102_v32 = vld [vmem:[%s1077_s1 + $0x128] sm:$0xff]  ;;  %v101_v35 = vld [vmem:[%s1077_s1 + $0x120] sm:$0xff] }
   0xd   :  { %600 = vmatpush3.msra.mxu1 %v108_v14  ;;  %490 = vmatpush3.msra.mxu0 %v75_v16  ;;  %v84_v36 = vld [vmem:[%s1077_s1 + $0x98] sm:$0xff]  ;;  %v83_v39 = vld [vmem:[%s1077_s1 + $0x90] sm:$0xff]  ;;  %v82_v42 = vld [vmem:[%s1077_s1 + $0x88] sm:$0xff] }
   0xe   :  { %601 = vmatprep.subr.mxu1 %v107_v17  ;;  %491 = vmatprep.subr.mxu0 %v90_v18  ;;  %v68_v37 = vld [vmem:[%s1077_s1 + $0x18] sm:$0xff]  ;;  %v67_v40 = vld [vmem:[%s1077_s1 + $0x10] sm:$0xff]  ;;  %v18_v43 = vld [vmem:[%s1078_s0 + $0x8] sm:$0xff] }
   0xf   :  { %602 = vmatpush3.msra.mxu1 %v107_v17  ;;  %492 = vmatpush3.msra.mxu0 %v74_v19  ;;  %v100_v38 = vld [vmem:[%s1077_s1 + $0x118] sm:$0xff]  ;;  %v99_v41 = vld [vmem:[%s1077_s1 + $0x110] sm:$0xff]  ;;  %v66_v44 = vld [vmem:[%s1077_s1 + $0x8] sm:$0xff] }
  0x10   :  { %603 = vmatprep.subr.mxu1 %v106_v20  ;;  %493 = vmatprep.subr.mxu0 %v89_v21  ;;  %v81_v45 = vld [vmem:[%s1077_s1 + $0x80] sm:$0xff]  ;;  %v98_v46 = vld [vmem:[%s1077_s1 + $0x108] sm:$0xff]  ;;  %v19_v51 = vld [vmem:[%s1078_s0 + $0x10] sm:$0xff] }
  0x11   :  { %604 = vmatpush3.msra.mxu1 %v106_v20  ;;  %494 = vmatpush3.msra.mxu0 %v73_v22  ;;  %v65_v47 = vld [vmem:[%s1077_s1] sm:$0xff]  ;;  %v22_v52 = vld [vmem:[%s1078_s0 + $0x28] sm:$0xff]  ;;  %v20_v53 = vld [vmem:[%s1078_s0 + $0x18] sm:$0xff] }
  0x12   :  { %605 = vmatprep.subr.mxu1 %v105_v23  ;;  %495 = vmatprep.subr.mxu0 %v88_v24  ;;  %v17_v48 = vld [vmem:[%s1078_s0] sm:$0xff]  ;;  %v24_v55 = vld [vmem:[%s1078_s0 + $0x38] sm:$0xff]  ;;  %v23_v57 = vld [vmem:[%s1078_s0 + $0x30] sm:$0xff] }
  0x13   :  { %606 = vmatpush3.msra.mxu1 %v105_v23  ;;  %496 = vmatpush3.msra.mxu0 %v72_v25  ;;  %v97_v49 = vld [vmem:[%s1077_s1 + $0x100] sm:$0xff]  ;;  %v28_v56 = vld [vmem:[%s1078_s0 + $0x58] sm:$0xff]  ;;  %v31_v58 = vld [vmem:[%s1078_s0 + $0x70] sm:$0xff] }
  0x14   :  { %607 = vmatprep.subr.mxu1 %v104_v26  ;;  %497 = vmatprep.subr.mxu0 %v87_v27  ;;  %v21_v50 = vld [vmem:[%s1078_s0 + $0x20] sm:$0xff]  ;;  %v27_v59 = vld [vmem:[%s1078_s0 + $0x50] sm:$0xff]  ;;  %v34_v60 = vld [vmem:[%s1078_s0 + $0x88] sm:$0xff] }
  0x15   :  { %608 = vmatpush3.msra.mxu1 %v104_v26  ;;  %498 = vmatpush3.msra.mxu0 %v71_v28  ;;  %v25_v54 = vld [vmem:[%s1078_s0 + $0x40] sm:$0xff]  ;;  %v26_v61 = vld [vmem:[%s1078_s0 + $0x48] sm:$0xff]  ;;  %v40_v0 = vld [vmem:[%s1078_s0 + $0xb8] sm:$0xff] }
  0x16   :  { %609 = vmatprep.subr.mxu1 %v103_v29  ;;  %499 = vmatprep.subr.mxu0 %v86_v30  ;;  %v37_v62 = vld [vmem:[%s1078_s0 + $0xa0] sm:$0xff]  ;;  %v30_v63 = vld [vmem:[%s1078_s0 + $0x68] sm:$0xff]  ;;  %v43_v2 = vld [vmem:[%s1078_s0 + $0xd0] sm:$0xff] }
  0x17   :  { %610 = vmatpush3.msra.mxu1 %v103_v29  ;;  %500 = vmatpush3.msra.mxu0 %v70_v31  ;;  %v29_v1 = vld [vmem:[%s1078_s0 + $0x60] sm:$0xff]  ;;  %v46_v4 = vld [vmem:[%s1078_s0 + $0xe8] sm:$0xff]  ;;  %v32_v5 = vld [vmem:[%s1078_s0 + $0x78] sm:$0xff] }
  0x18   :  { %611 = vmatprep.subr.mxu1 %v102_v32  ;;  %501 = vmatprep.subr.mxu0 %v85_v33  ;;  %v33_v3 = vld [vmem:[%s1078_s0 + $0x80] sm:$0xff]  ;;  %v36_v7 = vld [vmem:[%s1078_s0 + $0x98] sm:$0xff]  ;;  %v35_v9 = vld [vmem:[%s1078_s0 + $0x90] sm:$0xff] }
  0x19   :  { %612 = vmatpush3.msra.mxu1 %v102_v32  ;;  %502 = vmatpush3.msra.mxu0 %v69_v34  ;;  %v49_v6 = vld [vmem:[%s1078_s0 + $0x100] sm:$0xff]  ;;  %v52_v8 = vld [vmem:[%s1078_s0 + $0x118] sm:$0xff]  ;;  %v55_v10 = vld [vmem:[%s1078_s0 + $0x130] sm:$0xff] }
  0x1a   :  { %613 = vmatprep.subr.mxu1 %v101_v35  ;;  %503 = vmatprep.subr.mxu0 %v84_v36  ;;  %v39_v11 = vld [vmem:[%s1078_s0 + $0xb0] sm:$0xff]  ;;  %v58_v12 = vld [vmem:[%s1078_s0 + $0x148] sm:$0xff]  ;;  %v61_v14 = vld [vmem:[%s1078_s0 + $0x160] sm:$0xff] }
  0x1b   :  { %614 = vmatpush3.msra.mxu1 %v101_v35  ;;  %504 = vmatpush3.msra.mxu0 %v68_v37  ;;  %v38_v13 = vld [vmem:[%s1078_s0 + $0xa8] sm:$0xff]  ;;  %v64_v16 = vld [vmem:[%s1078_s0 + $0x178] sm:$0xff]  ;;  %v41_v17 = vld [vmem:[%s1078_s0 + $0xc0] sm:$0xff] }
  0x1c   :  { %615 = vmatprep.subr.mxu1 %v100_v38  ;;  %505 = vmatprep.subr.mxu0 %v83_v39  ;;  %v42_v15 = vld [vmem:[%s1078_s0 + $0xc8] sm:$0xff]  ;;  %v45_v18 = vld [vmem:[%s1078_s0 + $0xe0] sm:$0xff]  ;;  %v44_v19 = vld [vmem:[%s1078_s0 + $0xd8] sm:$0xff] }
  0x1d   :  { %616 = vmatpush3.msra.mxu1 %v100_v38  ;;  %506 = vmatpush3.msra.mxu0 %v67_v40  ;;  %v48_v20 = vld [vmem:[%s1078_s0 + $0xf8] sm:$0xff]  ;;  %v47_v21 = vld [vmem:[%s1078_s0 + $0xf0] sm:$0xff]  ;;  %v50_v23 = vld [vmem:[%s1078_s0 + $0x108] sm:$0xff] }
  0x1e   :  { %617 = vmatprep.subr.mxu1 %v99_v41  ;;  %507 = vmatprep.subr.mxu0 %v82_v42  ;;  %v51_v22 = vld [vmem:[%s1078_s0 + $0x110] sm:$0xff]  ;;  %v54_v24 = vld [vmem:[%s1078_s0 + $0x128] sm:$0xff]  ;;  %v53_v25 = vld [vmem:[%s1078_s0 + $0x120] sm:$0xff] }
  0x1f   :  { %184 = vmatprep.mubr.f32.mxu0 %v18_v43  ;;  %508 = vmatpush3.msra.mxu0 %v66_v44  ;;  %v57_v26 = vld [vmem:[%s1078_s0 + $0x140] sm:$0xff]  ;;  %v56_v27 = vld [vmem:[%s1078_s0 + $0x138] sm:$0xff]  ;;  %v59_v29 = vld [vmem:[%s1078_s0 + $0x150] sm:$0xff] }
  0x20   :  { %618 = vmatpush3.msra.mxu1 %v99_v41  ;;  %509 = vmatprep.subr.mxu0 %v81_v45  ;;  %v60_v28 = vld [vmem:[%s1078_s0 + $0x158] sm:$0xff]  ;;  %v63_v30 = vld [vmem:[%s1078_s0 + $0x170] sm:$0xff]  ;;  %v62_v31 = vld [vmem:[%s1078_s0 + $0x168] sm:$0xff] }
  0x21   :  { %619 = vmatprep.subr.mxu1 %v98_v46  ;;  %510 = vmatpush3.msra.mxu0 %v65_v47  ;;  %v963_v34 = vld [vmem:[%s1079_s2] ss:$0 sm:$0xff] }
  0x22   :  { %620 = vmatpush3.msra.mxu1 %v98_v46  ;;  %185 = vmatmul.mubr.f32.vlgmr.msra.gmra.mxu0 %v17_v48  ;;  %v410_v41 = vld [vmem:[%s1080_s3] sm:$0xff]  ;;  %v411_v48 = vld [vmem:[%s1080_s3 + $0x8] sm:$0xff] }
  0x23   :  { %621 = vmatprep.subr.mxu1 %v97_v49  ;;  %189 = vmatprep.mubr.f32.mxu0 %v21_v50 }
  0x24   :  { %622 = vmatpush3.msra.mxu1 %v97_v49  ;;  %623 = vmatprep.mubr.f32.mxu1 %v19_v51 }
  0x25   :  { %624 = vmatmul.mubr.f32.vlgmr.msra.gmra.mxu1 %v22_v52 }
  0x26   :  { %190 = vmatmul.mubr.f32.gmra.mxu0 %v20_v53  ;;  %626 = vmatprep.mubr.f32.mxu1 %v25_v54 }
  0x27   :  { %194 = vmatprep.mubr.f32.mxu0 %v24_v55 }
  0x29   :  { %627 = vmatmul.mubr.f32.gmra.mxu1 %v28_v56 }
  0x2a   :  { %195 = vmatmul.mubr.f32.gmra.mxu0 %v23_v57  ;;  %629 = vmatprep.mubr.f32.mxu1 %v31_v58  ;;  %v412_v58 = vld [vmem:[%s1080_s3 + $0x10] sm:$0xff] }
  0x2b   :  { %199 = vmatprep.mubr.f32.mxu0 %v27_v59 }
  0x2d   :  { %630 = vmatmul.mubr.f32.gmra.mxu1 %v34_v60 }
  0x2e   :  { %200 = vmatmul.mubr.f32.gmra.mxu0 %v26_v61  ;;  %632 = vmatprep.mubr.f32.mxu1 %v37_v62 }
  0x2f   :  { %204 = vmatprep.mubr.f32.mxu0 %v30_v63 }
  0x31   :  { %633 = vmatmul.mubr.f32.gmra.mxu1 %v40_v0 }
  0x32   :  { %205 = vmatmul.mubr.f32.gmra.mxu0 %v29_v1  ;;  %635 = vmatprep.mubr.f32.mxu1 %v43_v2  ;;  %v413_v2 = vld [vmem:[%s1080_s3 + $0x18] sm:$0xff] }
  0x33   :  { %209 = vmatprep.mubr.f32.mxu0 %v33_v3 }
  0x35   :  { %636 = vmatmul.mubr.f32.gmra.mxu1 %v46_v4 }
  0x36   :  { %210 = vmatmul.mubr.f32.gmra.mxu0 %v32_v5  ;;  %638 = vmatprep.mubr.f32.mxu1 %v49_v6 }
  0x37   :  { %214 = vmatprep.mubr.f32.mxu0 %v36_v7 }
  0x39   :  { %639 = vmatmul.mubr.f32.gmra.mxu1 %v52_v8 }
  0x3a   :  { %215 = vmatmul.mubr.f32.gmra.mxu0 %v35_v9  ;;  %641 = vmatprep.mubr.f32.mxu1 %v55_v10 }
  0x3b   :  { %219 = vmatprep.mubr.f32.mxu0 %v39_v11 }
  0x3d   :  { %642 = vmatmul.mubr.f32.gmra.mxu1 %v58_v12  ;;  %v414_v12 = vld [vmem:[%s1080_s3 + $0x20] sm:$0xff] }
  0x3e   :  { %220 = vmatmul.mubr.f32.gmra.mxu0 %v38_v13  ;;  %644 = vmatprep.mubr.f32.mxu1 %v61_v14 }
  0x3f   :  { %224 = vmatprep.mubr.f32.mxu0 %v42_v15 }
  0x41   :  { %645 = vmatmul.mubr.f32.gmra.mxu1 %v64_v16 }
  0x42   :  { %225 = vmatmul.mubr.f32.gmra.mxu0 %v41_v17 }
  0x43   :  { %229 = vmatprep.mubr.f32.mxu0 %v45_v18 }
  0x46   :  { %230 = vmatmul.mubr.f32.gmra.mxu0 %v44_v19 }
  0x47   :  { %234 = vmatprep.mubr.f32.mxu0 %v48_v20  ;;  %v415_v20 = vld [vmem:[%s1080_s3 + $0x28] sm:$0xff] }
  0x4a   :  { %235 = vmatmul.mubr.f32.gmra.mxu0 %v47_v21 }
  0x4b   :  { %239 = vmatprep.mubr.f32.mxu0 %v51_v22 }
  0x4e   :  { %240 = vmatmul.mubr.f32.gmra.mxu0 %v50_v23 }
  0x4f   :  { %244 = vmatprep.mubr.f32.mxu0 %v54_v24 }
  0x52   :  { %245 = vmatmul.mubr.f32.gmra.mxu0 %v53_v25 }
  0x53   :  { %249 = vmatprep.mubr.f32.mxu0 %v57_v26 }
  0x56   :  { %250 = vmatmul.mubr.f32.gmra.mxu0 %v56_v27 }
  0x57   :  { %254 = vmatprep.mubr.f32.mxu0 %v60_v28 }
  0x5a   :  { %255 = vmatmul.mubr.f32.gmra.mxu0 %v59_v29 }
  0x5b   :  { %259 = vmatprep.mubr.f32.mxu0 %v63_v30  ;;  %v416_v30 = vld [vmem:[%s1080_s3 + $0x30] sm:$0xff] }
  0x5e   :  { %260 = vmatmul.mubr.f32.gmra.mxu0 %v62_v31 }
  0xe2   :  { %v511_v32 = vpop.f32.mrf.mxu0 }
  0xe4   :  { %v512_v33 = vpop.f32.mrf.mxu0 }
  0xe5   :  { %v513_v35 = vadd.f32 %v512_v33, %v511_v32  ;;  %v625_v36 = vpop.f32.mrf.mxu1 }
  0xe6   :  { %v514_v37 = vpop.f32.mrf.mxu0 }
  0xe7   :  { %v187_v38 = vadd.f32 %v513_v35, %v963_v34  ;;  %v331_v39 = vpop.f32.mrf.mxu1 }
  0xe8   :  { %v515_v40 = vpop.f32.mrf.mxu0 }
  0xe9   :  { %v516_v42 = vadd.f32 %v515_v40, %v514_v37  ;;  %v332_v43 = vadd.f32 %v331_v39, %v187_v38  ;;  %v628_v45 = vpop.f32.mrf.mxu1  ;;  %v417_v39 = vld [vmem:[%s1080_s3 + $0x38] sm:$0xff] }
  0xea   :  { %v517_v44 = vpop.f32.mrf.mxu0 }
  0xeb   :  { %v192_v46 = vadd.f32 %v516_v42, %v963_v34  ;;  %v426_v47 = vadd.f32 %v410_v41, %v332_v43  ;;  %v341_v54 = vpop.f32.mrf.mxu1 }
  0xec   :  { %v518_v49 = vpop.f32.mrf.mxu0 }
  0xed   :  { %v337_v50 = vadd.f32 %v625_v36, %v192_v46  ;;  %v442_v51 = vmax.f32 %v426_v47, 0.0  ;;  %v519_v52 = vadd.f32 %v518_v49, %v517_v44  ;;  %v631_v63 = vpop.f32.mrf.mxu1  ;;  %v418_v49 = vld [vmem:[%s1080_s3 + $0x40] sm:$0xff] }
  0xee   :  { %v520_v53 = vpop.f32.mrf.mxu0 }
  0xef   :  { %v427_v55 = vadd.f32 %v411_v48, %v337_v50  ;;  %458 = vst [vmem:[%s1081_s4] sm:$0xff] %v442_v51  ;;  %v197_v56 = vadd.f32 %v519_v52, %v963_v34  ;;  %v351_v8 = vpop.f32.mrf.mxu1 }
  0xf0   :  { %v521_v57 = vpop.f32.mrf.mxu0 }
  0xf1   :  { %v443_v59 = vmax.f32 %v427_v55, 0.0  ;;  %v522_v60 = vadd.f32 %v521_v57, %v520_v53  ;;  %v342_v61 = vadd.f32 %v341_v54, %v197_v56  ;;  %v634_v17 = vpop.f32.mrf.mxu1  ;;  %v419_v57 = vld [vmem:[%s1080_s3 + $0x48] sm:$0xff] }
  0xf2   :  { %v523_v62 = vpop.f32.mrf.mxu0 }
  0xf3   :  { %459 = vst [vmem:[%s1081_s4 + $0x8] sm:$0xff] %v443_v59  ;;  %v202_v0 = vadd.f32 %v522_v60, %v963_v34  ;;  %v428_v1 = vadd.f32 %v412_v58, %v342_v61  ;;  %v361_v26 = vpop.f32.mrf.mxu1 }
  0xf4   :  { %v524_v3 = vpop.f32.mrf.mxu0 }
  0xf5   :  { %v347_v4 = vadd.f32 %v628_v45, %v202_v0  ;;  %v444_v5 = vmax.f32 %v428_v1, 0.0  ;;  %v525_v6 = vadd.f32 %v524_v3, %v523_v62  ;;  %v637_v36 = vpop.f32.mrf.mxu1  ;;  %v420_v3 = vld [vmem:[%s1080_s3 + $0x50] sm:$0xff] }
  0xf6   :  { %v526_v7 = vpop.f32.mrf.mxu0 }
  0xf7   :  { %v429_v9 = vadd.f32 %v413_v2, %v347_v4  ;;  %460 = vst [vmem:[%s1081_s4 + $0x10] sm:$0xff] %v444_v5  ;;  %v207_v10 = vadd.f32 %v525_v6, %v963_v34  ;;  %v371_v45 = vpop.f32.mrf.mxu1 }
  0xf8   :  { %v527_v11 = vpop.f32.mrf.mxu0 }
  0xf9   :  { %v445_v13 = vmax.f32 %v429_v9, 0.0  ;;  %v528_v14 = vadd.f32 %v527_v11, %v526_v7  ;;  %v352_v15 = vadd.f32 %v351_v8, %v207_v10  ;;  %v640_v54 = vpop.f32.mrf.mxu1  ;;  %v421_v11 = vld [vmem:[%s1080_s3 + $0x58] sm:$0xff] }
  0xfa   :  { %v529_v16 = vpop.f32.mrf.mxu0 }
  0xfb   :  { %461 = vst [vmem:[%s1081_s4 + $0x18] sm:$0xff] %v445_v13  ;;  %v212_v18 = vadd.f32 %v528_v14, %v963_v34  ;;  %v430_v19 = vadd.f32 %v414_v12, %v352_v15 }
  0xfc   :  { %v530_v21 = vpop.f32.mrf.mxu0 }
  0xfd   :  { %v357_v22 = vadd.f32 %v631_v63, %v212_v18  ;;  %v446_v23 = vmax.f32 %v430_v19, 0.0  ;;  %v531_v24 = vadd.f32 %v530_v21, %v529_v16  ;;  %v381_v63 = vpop.f32.mrf.mxu1  ;;  %v422_v21 = vld [vmem:[%s1080_s3 + $0x60] sm:$0xff] }
  0xfe   :  { %v532_v25 = vpop.f32.mrf.mxu0 }
  0xff   :  { %v431_v27 = vadd.f32 %v415_v20, %v357_v22  ;;  %462 = vst [vmem:[%s1081_s4 + $0x20] sm:$0xff] %v446_v23  ;;  %v217_v28 = vadd.f32 %v531_v24, %v963_v34  ;;  %v643_v8 = vpop.f32.mrf.mxu1 }
 0x100   :  { %v533_v29 = vpop.f32.mrf.mxu0 }
 0x101   :  { %v447_v31 = vmax.f32 %v431_v27, 0.0  ;;  %v534_v32 = vadd.f32 %v533_v29, %v532_v25  ;;  %v362_v33 = vadd.f32 %v361_v26, %v217_v28  ;;  %v423_v29 = vld [vmem:[%s1080_s3 + $0x68] sm:$0xff] }
 0x102   :  { %v535_v35 = vpop.f32.mrf.mxu0 }
 0x103   :  { %463 = vst [vmem:[%s1081_s4 + $0x28] sm:$0xff] %v447_v31  ;;  %v222_v37 = vadd.f32 %v534_v32, %v963_v34  ;;  %v432_v38 = vadd.f32 %v416_v30, %v362_v33 }
 0x104   :  { %v536_v40 = vpop.f32.mrf.mxu0 }
 0x105   :  { %v367_v41 = vadd.f32 %v634_v17, %v222_v37  ;;  %v448_v42 = vmax.f32 %v432_v38, 0.0  ;;  %v537_v43 = vadd.f32 %v536_v40, %v535_v35  ;;  %v391_v17 = vpop.f32.mrf.mxu1  ;;  %v424_v40 = vld [vmem:[%s1080_s3 + $0x70] sm:$0xff] }
 0x106   :  { %v538_v44 = vpop.f32.mrf.mxu0 }
 0x107   :  { %v433_v46 = vadd.f32 %v417_v39, %v367_v41  ;;  %464 = vst [vmem:[%s1081_s4 + $0x30] sm:$0xff] %v448_v42  ;;  %v227_v47 = vadd.f32 %v537_v43, %v963_v34  ;;  %v646_v26 = vpop.f32.mrf.mxu1 }
 0x108   :  { %v539_v48 = vpop.f32.mrf.mxu0 }
 0x109   :  { %v449_v50 = vmax.f32 %v433_v46, 0.0  ;;  %v540_v51 = vadd.f32 %v539_v48, %v538_v44  ;;  %v372_v52 = vadd.f32 %v371_v45, %v227_v47  ;;  %v425_v46 = vld [vmem:[%s1080_s3 + $0x78] sm:$0xff] }
 0x10a   :  { %v541_v53 = vpop.f32.mrf.mxu0 }
 0x10b   :  { %465 = vst [vmem:[%s1081_s4 + $0x38] sm:$0xff] %v449_v50  ;;  %v232_v55 = vadd.f32 %v540_v51, %v963_v34  ;;  %v434_v56 = vadd.f32 %v418_v49, %v372_v52 }
 0x10c   :  { %v542_v58 = vpop.f32.mrf.mxu0 }
 0x10d   :  { %v377_v59 = vadd.f32 %v637_v36, %v232_v55  ;;  %v450_v60 = vmax.f32 %v434_v56, 0.0  ;;  %v543_v61 = vadd.f32 %v542_v58, %v541_v53  ;;  %v401_v36 = vpop.f32.mrf.mxu1 }
 0x10e   :  { %v544_v62 = vpop.f32.mrf.mxu0 }
 0x10f   :  { %v435_v0 = vadd.f32 %v419_v57, %v377_v59  ;;  %466 = vst [vmem:[%s1081_s4 + $0x40] sm:$0xff] %v450_v60  ;;  %v237_v1 = vadd.f32 %v543_v61, %v963_v34 }
 0x110   :  { %v545_v2 = vpop.f32.mrf.mxu0 }
 0x111   :  { %v451_v4 = vmax.f32 %v435_v0, 0.0  ;;  %v546_v5 = vadd.f32 %v545_v2, %v544_v62  ;;  %v382_v6 = vadd.f32 %v381_v63, %v237_v1 }
 0x112   :  { %v547_v7 = vpop.f32.mrf.mxu0 }
 0x113   :  { %467 = vst [vmem:[%s1081_s4 + $0x48] sm:$0xff] %v451_v4  ;;  %v242_v9 = vadd.f32 %v546_v5, %v963_v34  ;;  %v436_v10 = vadd.f32 %v420_v3, %v382_v6 }
 0x114   :  { %v548_v12 = vpop.f32.mrf.mxu0 }
 0x115   :  { %v387_v13 = vadd.f32 %v640_v54, %v242_v9  ;;  %v452_v14 = vmax.f32 %v436_v10, 0.0  ;;  %v549_v15 = vadd.f32 %v548_v12, %v547_v7 }
 0x116   :  { %v550_v16 = vpop.f32.mrf.mxu0 }
 0x117   :  { %v437_v18 = vadd.f32 %v421_v11, %v387_v13  ;;  %468 = vst [vmem:[%s1081_s4 + $0x50] sm:$0xff] %v452_v14  ;;  %v247_v19 = vadd.f32 %v549_v15, %v963_v34 }
 0x118   :  { %v551_v20 = vpop.f32.mrf.mxu0 }
 0x119   :  { %v453_v22 = vmax.f32 %v437_v18, 0.0  ;;  %v552_v23 = vadd.f32 %v551_v20, %v550_v16  ;;  %v392_v24 = vadd.f32 %v391_v17, %v247_v19 }
 0x11a   :  { %v553_v25 = vpop.f32.mrf.mxu0 }
 0x11b   :  { %469 = vst [vmem:[%s1081_s4 + $0x58] sm:$0xff] %v453_v22  ;;  %v252_v27 = vadd.f32 %v552_v23, %v963_v34  ;;  %v438_v28 = vadd.f32 %v422_v21, %v392_v24 }
 0x11c   :  { %v554_v30 = vpop.f32.mrf.mxu0 }
 0x11d   :  { %v397_v31 = vadd.f32 %v643_v8, %v252_v27  ;;  %v454_v32 = vmax.f32 %v438_v28, 0.0  ;;  %v555_v33 = vadd.f32 %v554_v30, %v553_v25 }
 0x11e   :  { %v556_v35 = vpop.f32.mrf.mxu0 }
 0x11f   :  { %v439_v37 = vadd.f32 %v423_v29, %v397_v31  ;;  %470 = vst [vmem:[%s1081_s4 + $0x60] sm:$0xff] %v454_v32  ;;  %v257_v38 = vadd.f32 %v555_v33, %v963_v34 }
 0x120   :  { %v557_v39 = vpop.f32.mrf.mxu0 }
 0x121   :  { %v455_v41 = vmax.f32 %v439_v37, 0.0  ;;  %v558_v42 = vadd.f32 %v557_v39, %v556_v35  ;;  %v402_v43 = vadd.f32 %v401_v36, %v257_v38 }
 0x123   :  { %471 = vst [vmem:[%s1081_s4 + $0x68] sm:$0xff] %v455_v41  ;;  %v262_v44 = vadd.f32 %v558_v42, %v963_v34  ;;  %v440_v45 = vadd.f32 %v424_v40, %v402_v43 }
 0x125   :  { %v407_v47 = vadd.f32 %v646_v26, %v262_v44  ;;  %v456_v48 = vmax.f32 %v440_v45, 0.0 }
 0x127   :  { %v441_v49 = vadd.f32 %v425_v46, %v407_v47  ;;  %472 = vst [vmem:[%s1081_s4 + $0x70] sm:$0xff] %v456_v48 }
 0x129   :  { %v457_v50 = vmax.f32 %v441_v49, 0.0 }
 0x12b   :  { %473 = vst [vmem:[%s1081_s4 + $0x78] sm:$0xff] %v457_v50 }

// kernel: _lambda_.11
= control target key start
LH: loop header
LB: loop body
LE: loop exit
PB: predicated region body
PF: predicated region fallthrough
CT: control target
= control target key end

     0   :  { %v1246_v0 = vmov 0.0   ;;  %s2557_s1 = inlined_call_operand.vmem [shape: f32[512,128], index: 1, kind: input, shape index: {}]   ;;  %s2558_s0 = inlined_call_operand.vmem [shape: f32[512,512], index: 0, kind: input, shape index: {}]   ;;  %s2559_s2 = inlined_call_operand.vmem [shape: f32[1,128], index: 2, kind: input, shape index: {}]   ;;  %s2560_s3 = inlined_call_operand.vmem [shape: f32[512,128], index: 3, kind: output, shape index: {}]  }
   0x1   :  { %341 = vmatprep.subr.mxu0 %v1246_v0  ;;  %726 = vmatprep.subr.mxu1 %v1246_v0  ;;  %v285_v1 = vld [vmem:[%s2557_s1 + $0x78] sm:$0xff]  ;;  %v284_v3 = vld [vmem:[%s2557_s1 + $0x70] sm:$0xff]  ;;  %v283_v5 = vld [vmem:[%s2557_s1 + $0x68] sm:$0xff] }
   0x2   :  { %v317_v2 = vld [vmem:[%s2557_s1 + $0x178] sm:$0xff]  ;;  %342 = vmatpush1.msra.mxu0 %v285_v1  ;;  %v316_v4 = vld [vmem:[%s2557_s1 + $0x170] sm:$0xff]  ;;  %v315_v6 = vld [vmem:[%s2557_s1 + $0x168] sm:$0xff] }
   0x3   :  { %727 = vmatpush1.msra.mxu1 %v317_v2  ;;  %343 = vmatprep.subr.mxu0 %v1246_v0  ;;  %v282_v7 = vld [vmem:[%s2557_s1 + $0x60] sm:$0xff]  ;;  %v281_v9 = vld [vmem:[%s2557_s1 + $0x58] sm:$0xff]  ;;  %v280_v11 = vld [vmem:[%s2557_s1 + $0x50] sm:$0xff] }
   0x4   :  { %728 = vmatprep.subr.mxu1 %v1246_v0  ;;  %344 = vmatpush1.msra.mxu0 %v284_v3  ;;  %v314_v8 = vld [vmem:[%s2557_s1 + $0x160] sm:$0xff]  ;;  %v313_v10 = vld [vmem:[%s2557_s1 + $0x158] sm:$0xff]  ;;  %v312_v12 = vld [vmem:[%s2557_s1 + $0x150] sm:$0xff] }
   0x5   :  { %729 = vmatpush1.msra.mxu1 %v316_v4  ;;  %345 = vmatprep.subr.mxu0 %v1246_v0  ;;  %v279_v13 = vld [vmem:[%s2557_s1 + $0x48] sm:$0xff]  ;;  %v278_v15 = vld [vmem:[%s2557_s1 + $0x40] sm:$0xff]  ;;  %v277_v17 = vld [vmem:[%s2557_s1 + $0x38] sm:$0xff] }
   0x6   :  { %730 = vmatprep.subr.mxu1 %v1246_v0  ;;  %346 = vmatpush1.msra.mxu0 %v283_v5  ;;  %v311_v14 = vld [vmem:[%s2557_s1 + $0x148] sm:$0xff]  ;;  %v310_v16 = vld [vmem:[%s2557_s1 + $0x140] sm:$0xff]  ;;  %v309_v18 = vld [vmem:[%s2557_s1 + $0x138] sm:$0xff] }
   0x7   :  { %731 = vmatpush1.msra.mxu1 %v315_v6  ;;  %347 = vmatprep.subr.mxu0 %v1246_v0  ;;  %v276_v19 = vld [vmem:[%s2557_s1 + $0x30] sm:$0xff]  ;;  %v275_v21 = vld [vmem:[%s2557_s1 + $0x28] sm:$0xff]  ;;  %v274_v23 = vld [vmem:[%s2557_s1 + $0x20] sm:$0xff] }
   0x8   :  { %732 = vmatprep.subr.mxu1 %v1246_v0  ;;  %348 = vmatpush1.msra.mxu0 %v282_v7  ;;  %v308_v20 = vld [vmem:[%s2557_s1 + $0x130] sm:$0xff]  ;;  %v307_v22 = vld [vmem:[%s2557_s1 + $0x128] sm:$0xff]  ;;  %v306_v24 = vld [vmem:[%s2557_s1 + $0x120] sm:$0xff] }
   0x9   :  { %733 = vmatpush1.msra.mxu1 %v314_v8  ;;  %349 = vmatprep.subr.mxu0 %v1246_v0  ;;  %v273_v25 = vld [vmem:[%s2557_s1 + $0x18] sm:$0xff]  ;;  %v272_v27 = vld [vmem:[%s2557_s1 + $0x10] sm:$0xff]  ;;  %v271_v29 = vld [vmem:[%s2557_s1 + $0x8] sm:$0xff] }
   0xa   :  { %734 = vmatprep.subr.mxu1 %v1246_v0  ;;  %350 = vmatpush1.msra.mxu0 %v281_v9  ;;  %v305_v26 = vld [vmem:[%s2557_s1 + $0x118] sm:$0xff]  ;;  %v304_v28 = vld [vmem:[%s2557_s1 + $0x110] sm:$0xff]  ;;  %v303_v30 = vld [vmem:[%s2557_s1 + $0x108] sm:$0xff] }
   0xb   :  { %735 = vmatpush1.msra.mxu1 %v313_v10  ;;  %351 = vmatprep.subr.mxu0 %v1246_v0  ;;  %v270_v31 = vld [vmem:[%s2557_s1] sm:$0xff]  ;;  %v301_v33 = vld [vmem:[%s2557_s1 + $0xf8] sm:$0xff]  ;;  %v300_v35 = vld [vmem:[%s2557_s1 + $0xf0] sm:$0xff] }
   0xc   :  { %736 = vmatprep.subr.mxu1 %v1246_v0  ;;  %352 = vmatpush1.msra.mxu0 %v280_v11  ;;  %v302_v32 = vld [vmem:[%s2557_s1 + $0x100] sm:$0xff]  ;;  %v333_v34 = vld [vmem:[%s2557_s1 + $0x1f8] sm:$0xff]  ;;  %v332_v36 = vld [vmem:[%s2557_s1 + $0x1f0] sm:$0xff] }
   0xd   :  { %737 = vmatpush1.msra.mxu1 %v312_v12  ;;  %353 = vmatprep.subr.mxu0 %v1246_v0  ;;  %v299_v37 = vld [vmem:[%s2557_s1 + $0xe8] sm:$0xff]  ;;  %v298_v39 = vld [vmem:[%s2557_s1 + $0xe0] sm:$0xff]  ;;  %v297_v41 = vld [vmem:[%s2557_s1 + $0xd8] sm:$0xff] }
   0xe   :  { %738 = vmatprep.subr.mxu1 %v1246_v0  ;;  %354 = vmatpush1.msra.mxu0 %v279_v13  ;;  %v331_v38 = vld [vmem:[%s2557_s1 + $0x1e8] sm:$0xff]  ;;  %v330_v40 = vld [vmem:[%s2557_s1 + $0x1e0] sm:$0xff]  ;;  %v329_v42 = vld [vmem:[%s2557_s1 + $0x1d8] sm:$0xff] }
   0xf   :  { %739 = vmatpush1.msra.mxu1 %v311_v14  ;;  %355 = vmatprep.subr.mxu0 %v1246_v0  ;;  %v296_v43 = vld [vmem:[%s2557_s1 + $0xd0] sm:$0xff]  ;;  %v295_v45 = vld [vmem:[%s2557_s1 + $0xc8] sm:$0xff]  ;;  %v294_v47 = vld [vmem:[%s2557_s1 + $0xc0] sm:$0xff] }
  0x10   :  { %740 = vmatprep.subr.mxu1 %v1246_v0  ;;  %356 = vmatpush1.msra.mxu0 %v278_v15  ;;  %v328_v44 = vld [vmem:[%s2557_s1 + $0x1d0] sm:$0xff]  ;;  %v327_v46 = vld [vmem:[%s2557_s1 + $0x1c8] sm:$0xff]  ;;  %v326_v48 = vld [vmem:[%s2557_s1 + $0x1c0] sm:$0xff] }
  0x11   :  { %741 = vmatpush1.msra.mxu1 %v310_v16  ;;  %357 = vmatprep.subr.mxu0 %v1246_v0  ;;  %v293_v49 = vld [vmem:[%s2557_s1 + $0xb8] sm:$0xff]  ;;  %v292_v51 = vld [vmem:[%s2557_s1 + $0xb0] sm:$0xff]  ;;  %v291_v53 = vld [vmem:[%s2557_s1 + $0xa8] sm:$0xff] }
  0x12   :  { %742 = vmatprep.subr.mxu1 %v1246_v0  ;;  %358 = vmatpush1.msra.mxu0 %v277_v17  ;;  %v325_v50 = vld [vmem:[%s2557_s1 + $0x1b8] sm:$0xff]  ;;  %v324_v52 = vld [vmem:[%s2557_s1 + $0x1b0] sm:$0xff]  ;;  %v323_v54 = vld [vmem:[%s2557_s1 + $0x1a8] sm:$0xff] }
  0x13   :  { %743 = vmatpush1.msra.mxu1 %v309_v18  ;;  %359 = vmatprep.subr.mxu0 %v1246_v0  ;;  %v290_v55 = vld [vmem:[%s2557_s1 + $0xa0] sm:$0xff]  ;;  %v289_v57 = vld [vmem:[%s2557_s1 + $0x98] sm:$0xff]  ;;  %v288_v59 = vld [vmem:[%s2557_s1 + $0x90] sm:$0xff] }
  0x14   :  { %744 = vmatprep.subr.mxu1 %v1246_v0  ;;  %360 = vmatpush1.msra.mxu0 %v276_v19  ;;  %v322_v56 = vld [vmem:[%s2557_s1 + $0x1a0] sm:$0xff]  ;;  %v321_v58 = vld [vmem:[%s2557_s1 + $0x198] sm:$0xff]  ;;  %v320_v60 = vld [vmem:[%s2557_s1 + $0x190] sm:$0xff] }
  0x15   :  { %745 = vmatpush1.msra.mxu1 %v308_v20  ;;  %361 = vmatprep.subr.mxu0 %v1246_v0  ;;  %v287_v61 = vld [vmem:[%s2557_s1 + $0x88] sm:$0xff]  ;;  %v286_v63 = vld [vmem:[%s2557_s1 + $0x80] sm:$0xff]  ;;  %v17_v3 = vld [vmem:[%s2558_s0 + $0x18] sm:$0xff] }
  0x16   :  { %746 = vmatprep.subr.mxu1 %v1246_v0  ;;  %362 = vmatpush1.msra.mxu0 %v275_v21  ;;  %v319_v62 = vld [vmem:[%s2557_s1 + $0x188] sm:$0xff]  ;;  %v318_v2 = vld [vmem:[%s2557_s1 + $0x180] sm:$0xff]  ;;  %v16_v5 = vld [vmem:[%s2558_s0 + $0x10] sm:$0xff] }
  0x17   :  { %747 = vmatpush1.msra.mxu1 %v307_v22  ;;  %363 = vmatprep.subr.mxu0 %v1246_v0  ;;  %v15_v1 = vld [vmem:[%s2558_s0 + $0x8] sm:$0xff]  ;;  %v14_v4 = vld [vmem:[%s2558_s0] sm:$0xff]  ;;  %v21_v7 = vld [vmem:[%s2558_s0 + $0x38] sm:$0xff] }
  0x18   :  { %748 = vmatprep.subr.mxu1 %v1246_v0  ;;  %364 = vmatpush1.msra.mxu0 %v274_v23  ;;  %v19_v6 = vld [vmem:[%s2558_s0 + $0x28] sm:$0xff]  ;;  %v20_v8 = vld [vmem:[%s2558_s0 + $0x30] sm:$0xff]  ;;  %v25_v10 = vld [vmem:[%s2558_s0 + $0x58] sm:$0xff] }
  0x19   :  { %749 = vmatpush1.msra.mxu1 %v306_v24  ;;  %365 = vmatprep.subr.mxu0 %v1246_v0  ;;  %v23_v9 = vld [vmem:[%s2558_s0 + $0x48] sm:$0xff]  ;;  %v22_v11 = vld [vmem:[%s2558_s0 + $0x40] sm:$0xff]  ;;  %v24_v12 = vld [vmem:[%s2558_s0 + $0x50] sm:$0xff] }
  0x1a   :  { %750 = vmatprep.subr.mxu1 %v1246_v0  ;;  %366 = vmatpush1.msra.mxu0 %v273_v25  ;;  %v27_v13 = vld [vmem:[%s2558_s0 + $0x68] sm:$0xff]  ;;  %v29_v14 = vld [vmem:[%s2558_s0 + $0x78] sm:$0xff]  ;;  %v26_v15 = vld [vmem:[%s2558_s0 + $0x60] sm:$0xff] }
  0x1b   :  { %751 = vmatpush1.msra.mxu1 %v305_v26  ;;  %367 = vmatprep.subr.mxu0 %v1246_v0  ;;  %v28_v16 = vld [vmem:[%s2558_s0 + $0x70] sm:$0xff]  ;;  %v31_v17 = vld [vmem:[%s2558_s0 + $0x88] sm:$0xff]  ;;  %v33_v18 = vld [vmem:[%s2558_s0 + $0x98] sm:$0xff] }
  0x1c   :  { %752 = vmatprep.subr.mxu1 %v1246_v0  ;;  %368 = vmatpush1.msra.mxu0 %v272_v27  ;;  %v30_v19 = vld [vmem:[%s2558_s0 + $0x80] sm:$0xff]  ;;  %v32_v20 = vld [vmem:[%s2558_s0 + $0x90] sm:$0xff]  ;;  %v35_v21 = vld [vmem:[%s2558_s0 + $0xa8] sm:$0xff] }
  0x1d   :  { %753 = vmatpush1.msra.mxu1 %v304_v28  ;;  %369 = vmatprep.subr.mxu0 %v1246_v0  ;;  %v37_v22 = vld [vmem:[%s2558_s0 + $0xb8] sm:$0xff]  ;;  %v34_v23 = vld [vmem:[%s2558_s0 + $0xa0] sm:$0xff]  ;;  %v36_v24 = vld [vmem:[%s2558_s0 + $0xb0] sm:$0xff] }
  0x1e   :  { %754 = vmatprep.subr.mxu1 %v1246_v0  ;;  %370 = vmatpush1.msra.mxu0 %v271_v29  ;;  %v39_v25 = vld [vmem:[%s2558_s0 + $0xc8] sm:$0xff]  ;;  %v41_v26 = vld [vmem:[%s2558_s0 + $0xd8] sm:$0xff]  ;;  %v38_v27 = vld [vmem:[%s2558_s0 + $0xc0] sm:$0xff] }
  0x1f   :  { %755 = vmatpush1.msra.mxu1 %v303_v30  ;;  %371 = vmatprep.subr.mxu0 %v1246_v0  ;;  %v40_v28 = vld [vmem:[%s2558_s0 + $0xd0] sm:$0xff]  ;;  %v43_v29 = vld [vmem:[%s2558_s0 + $0xe8] sm:$0xff]  ;;  %v45_v30 = vld [vmem:[%s2558_s0 + $0xf8] sm:$0xff] }
  0x20   :  { %756 = vmatprep.subr.mxu1 %v1246_v0  ;;  %372 = vmatpush1.msra.mxu0 %v270_v31  ;;  %v42_v31 = vld [vmem:[%s2558_s0 + $0xe0] sm:$0xff] }
  0x21   :  { %757 = vmatpush1.msra.mxu1 %v302_v32  ;;  %373 = vmatprep.subr.mxu0 %v1246_v0  ;;  %v44_v32 = vld [vmem:[%s2558_s0 + $0xf0] sm:$0xff] }
  0x22   :  { %758 = vmatprep.subr.mxu1 %v1246_v0  ;;  %374 = vmatpush2.msra.mxu0 %v301_v33  ;;  %v47_v33 = vld [vmem:[%s2558_s0 + $0x108] sm:$0xff] }
  0x23   :  { %759 = vmatpush2.msra.mxu1 %v333_v34  ;;  %375 = vmatprep.subr.mxu0 %v1246_v0  ;;  %v49_v34 = vld [vmem:[%s2558_s0 + $0x118] sm:$0xff] }
  0x24   :  { %760 = vmatprep.subr.mxu1 %v1246_v0  ;;  %376 = vmatpush2.msra.mxu0 %v300_v35  ;;  %v46_v35 = vld [vmem:[%s2558_s0 + $0x100] sm:$0xff] }
  0x25   :  { %761 = vmatpush2.msra.mxu1 %v332_v36  ;;  %377 = vmatprep.subr.mxu0 %v1246_v0  ;;  %v48_v36 = vld [vmem:[%s2558_s0 + $0x110] sm:$0xff] }
  0x26   :  { %762 = vmatprep.subr.mxu1 %v1246_v0  ;;  %378 = vmatpush2.msra.mxu0 %v299_v37  ;;  %v51_v37 = vld [vmem:[%s2558_s0 + $0x128] sm:$0xff] }
  0x27   :  { %763 = vmatpush2.msra.mxu1 %v331_v38  ;;  %379 = vmatprep.subr.mxu0 %v1246_v0  ;;  %v53_v38 = vld [vmem:[%s2558_s0 + $0x138] sm:$0xff] }
  0x28   :  { %764 = vmatprep.subr.mxu1 %v1246_v0  ;;  %380 = vmatpush2.msra.mxu0 %v298_v39  ;;  %v50_v39 = vld [vmem:[%s2558_s0 + $0x120] sm:$0xff] }
  0x29   :  { %765 = vmatpush2.msra.mxu1 %v330_v40  ;;  %381 = vmatprep.subr.mxu0 %v1246_v0  ;;  %v52_v40 = vld [vmem:[%s2558_s0 + $0x130] sm:$0xff] }
  0x2a   :  { %766 = vmatprep.subr.mxu1 %v1246_v0  ;;  %382 = vmatpush2.msra.mxu0 %v297_v41  ;;  %v55_v41 = vld [vmem:[%s2558_s0 + $0x148] sm:$0xff] }
  0x2b   :  { %767 = vmatpush2.msra.mxu1 %v329_v42  ;;  %383 = vmatprep.subr.mxu0 %v1246_v0  ;;  %v57_v42 = vld [vmem:[%s2558_s0 + $0x158] sm:$0xff] }
  0x2c   :  { %768 = vmatprep.subr.mxu1 %v1246_v0  ;;  %384 = vmatpush2.msra.mxu0 %v296_v43  ;;  %v54_v43 = vld [vmem:[%s2558_s0 + $0x140] sm:$0xff] }
  0x2d   :  { %769 = vmatpush2.msra.mxu1 %v328_v44  ;;  %385 = vmatprep.subr.mxu0 %v1246_v0  ;;  %v56_v44 = vld [vmem:[%s2558_s0 + $0x150] sm:$0xff] }
  0x2e   :  { %770 = vmatprep.subr.mxu1 %v1246_v0  ;;  %386 = vmatpush2.msra.mxu0 %v295_v45  ;;  %v59_v45 = vld [vmem:[%s2558_s0 + $0x168] sm:$0xff] }
  0x2f   :  { %771 = vmatpush2.msra.mxu1 %v327_v46  ;;  %387 = vmatprep.subr.mxu0 %v1246_v0  ;;  %v61_v46 = vld [vmem:[%s2558_s0 + $0x178] sm:$0xff] }
  0x30   :  { %772 = vmatprep.subr.mxu1 %v1246_v0  ;;  %388 = vmatpush2.msra.mxu0 %v294_v47  ;;  %v58_v47 = vld [vmem:[%s2558_s0 + $0x160] sm:$0xff] }
  0x31   :  { %773 = vmatpush2.msra.mxu1 %v326_v48  ;;  %389 = vmatprep.subr.mxu0 %v1246_v0  ;;  %v60_v48 = vld [vmem:[%s2558_s0 + $0x170] sm:$0xff] }
  0x32   :  { %774 = vmatprep.subr.mxu1 %v1246_v0  ;;  %390 = vmatpush2.msra.mxu0 %v293_v49  ;;  %v63_v49 = vld [vmem:[%s2558_s0 + $0x188] sm:$0xff] }
  0x33   :  { %775 = vmatpush2.msra.mxu1 %v325_v50  ;;  %391 = vmatprep.subr.mxu0 %v1246_v0  ;;  %v65_v50 = vld [vmem:[%s2558_s0 + $0x198] sm:$0xff] }
  0x34   :  { %776 = vmatprep.subr.mxu1 %v1246_v0  ;;  %392 = vmatpush2.msra.mxu0 %v292_v51  ;;  %v62_v51 = vld [vmem:[%s2558_s0 + $0x180] sm:$0xff] }
  0x35   :  { %777 = vmatpush2.msra.mxu1 %v324_v52  ;;  %393 = vmatprep.subr.mxu0 %v1246_v0  ;;  %v64_v52 = vld [vmem:[%s2558_s0 + $0x190] sm:$0xff] }
  0x36   :  { %778 = vmatprep.subr.mxu1 %v1246_v0  ;;  %394 = vmatpush2.msra.mxu0 %v291_v53  ;;  %v67_v53 = vld [vmem:[%s2558_s0 + $0x1a8] sm:$0xff] }
  0x37   :  { %779 = vmatpush2.msra.mxu1 %v323_v54  ;;  %395 = vmatprep.subr.mxu0 %v1246_v0  ;;  %v69_v54 = vld [vmem:[%s2558_s0 + $0x1b8] sm:$0xff] }
  0x38   :  { %780 = vmatprep.subr.mxu1 %v1246_v0  ;;  %396 = vmatpush2.msra.mxu0 %v290_v55  ;;  %v66_v55 = vld [vmem:[%s2558_s0 + $0x1a0] sm:$0xff] }
  0x39   :  { %781 = vmatpush2.msra.mxu1 %v322_v56  ;;  %397 = vmatprep.subr.mxu0 %v1246_v0  ;;  %v68_v56 = vld [vmem:[%s2558_s0 + $0x1b0] sm:$0xff] }
  0x3a   :  { %782 = vmatprep.subr.mxu1 %v1246_v0  ;;  %398 = vmatpush2.msra.mxu0 %v289_v57  ;;  %v71_v57 = vld [vmem:[%s2558_s0 + $0x1c8] sm:$0xff] }
  0x3b   :  { %783 = vmatpush2.msra.mxu1 %v321_v58  ;;  %399 = vmatprep.subr.mxu0 %v1246_v0  ;;  %v73_v58 = vld [vmem:[%s2558_s0 + $0x1d8] sm:$0xff] }
  0x3c   :  { %784 = vmatprep.subr.mxu1 %v1246_v0  ;;  %400 = vmatpush2.msra.mxu0 %v288_v59  ;;  %v70_v59 = vld [vmem:[%s2558_s0 + $0x1c0] sm:$0xff] }
  0x3d   :  { %785 = vmatpush2.msra.mxu1 %v320_v60  ;;  %401 = vmatprep.subr.mxu0 %v1246_v0  ;;  %v72_v60 = vld [vmem:[%s2558_s0 + $0x1d0] sm:$0xff] }
  0x3e   :  { %786 = vmatprep.subr.mxu1 %v1246_v0  ;;  %402 = vmatpush2.msra.mxu0 %v287_v61  ;;  %v75_v61 = vld [vmem:[%s2558_s0 + $0x1e8] sm:$0xff] }
  0x3f   :  { %787 = vmatpush2.msra.mxu1 %v319_v62  ;;  %403 = vmatprep.subr.mxu0 %v1246_v0  ;;  %v77_v62 = vld [vmem:[%s2558_s0 + $0x1f8] sm:$0xff] }
  0x40   :  { %788 = vmatprep.subr.mxu1 %v1246_v0  ;;  %404 = vmatpush2.msra.mxu0 %v286_v63  ;;  %v18_v0 = vld [vmem:[%s2558_s0 + $0x20] sm:$0xff] }
  0x41   :  { %405 = vmatprep.mubr.f32.mxu0 %v15_v1  ;;  %789 = vmatpush2.msra.mxu1 %v318_v2  ;;  %v74_v63 = vld [vmem:[%s2558_s0 + $0x1e0] sm:$0xff]  ;;  %v76_v1 = vld [vmem:[%s2558_s0 + $0x1f0] sm:$0xff]  ;;  %v79_v2 = vld [vmem:[%s2558_s0 + $0x208] sm:$0xff] }
  0x42   :  { %790 = vmatprep.mubr.f32.mxu1 %v17_v3  ;;  %406 = vmatmul.mubr.f32.vlgmr.msra.gmra.mxu0 %v14_v4  ;;  %v81_v3 = vld [vmem:[%s2558_s0 + $0x218] sm:$0xff]  ;;  %v78_v4 = vld [vmem:[%s2558_s0 + $0x200] sm:$0xff] }
  0x43   :  { %791 = vmatmul.mubr.f32.vlgmr.msra.gmra.mxu1 %v16_v5  ;;  %410 = vmatprep.mubr.f32.mxu0 %v19_v6  ;;  %v80_v5 = vld [vmem:[%s2558_s0 + $0x210] sm:$0xff]  ;;  %v83_v6 = vld [vmem:[%s2558_s0 + $0x228] sm:$0xff] }
  0x44   :  { %795 = vmatprep.mubr.f32.mxu1 %v21_v7  ;;  %v85_v7 = vld [vmem:[%s2558_s0 + $0x238] sm:$0xff] }
  0x46   :  { %411 = vmatmul.mubr.f32.gmra.mxu0 %v18_v0  ;;  %v82_v0 = vld [vmem:[%s2558_s0 + $0x220] sm:$0xff] }
  0x47   :  { %796 = vmatmul.mubr.f32.gmra.mxu1 %v20_v8  ;;  %415 = vmatprep.mubr.f32.mxu0 %v23_v9  ;;  %v84_v8 = vld [vmem:[%s2558_s0 + $0x230] sm:$0xff]  ;;  %v87_v9 = vld [vmem:[%s2558_s0 + $0x248] sm:$0xff] }
  0x48   :  { %800 = vmatprep.mubr.f32.mxu1 %v25_v10  ;;  %v89_v10 = vld [vmem:[%s2558_s0 + $0x258] sm:$0xff] }
  0x4a   :  { %416 = vmatmul.mubr.f32.gmra.mxu0 %v22_v11  ;;  %v86_v11 = vld [vmem:[%s2558_s0 + $0x240] sm:$0xff] }
  0x4b   :  { %801 = vmatmul.mubr.f32.gmra.mxu1 %v24_v12  ;;  %420 = vmatprep.mubr.f32.mxu0 %v27_v13  ;;  %v88_v12 = vld [vmem:[%s2558_s0 + $0x250] sm:$0xff]  ;;  %v91_v13 = vld [vmem:[%s2558_s0 + $0x268] sm:$0xff] }
  0x4c   :  { %805 = vmatprep.mubr.f32.mxu1 %v29_v14  ;;  %v93_v14 = vld [vmem:[%s2558_s0 + $0x278] sm:$0xff] }
  0x4e   :  { %421 = vmatmul.mubr.f32.gmra.mxu0 %v26_v15  ;;  %v90_v15 = vld [vmem:[%s2558_s0 + $0x260] sm:$0xff] }
  0x4f   :  { %806 = vmatmul.mubr.f32.gmra.mxu1 %v28_v16  ;;  %425 = vmatprep.mubr.f32.mxu0 %v31_v17  ;;  %v92_v16 = vld [vmem:[%s2558_s0 + $0x270] sm:$0xff]  ;;  %v95_v17 = vld [vmem:[%s2558_s0 + $0x288] sm:$0xff] }
  0x50   :  { %810 = vmatprep.mubr.f32.mxu1 %v33_v18  ;;  %v97_v18 = vld [vmem:[%s2558_s0 + $0x298] sm:$0xff] }
  0x52   :  { %426 = vmatmul.mubr.f32.gmra.mxu0 %v30_v19  ;;  %v94_v19 = vld [vmem:[%s2558_s0 + $0x280] sm:$0xff] }
  0x53   :  { %811 = vmatmul.mubr.f32.gmra.mxu1 %v32_v20  ;;  %430 = vmatprep.mubr.f32.mxu0 %v35_v21  ;;  %v96_v20 = vld [vmem:[%s2558_s0 + $0x290] sm:$0xff]  ;;  %v99_v21 = vld [vmem:[%s2558_s0 + $0x2a8] sm:$0xff] }
  0x54   :  { %815 = vmatprep.mubr.f32.mxu1 %v37_v22  ;;  %v101_v22 = vld [vmem:[%s2558_s0 + $0x2b8] sm:$0xff] }
  0x56   :  { %431 = vmatmul.mubr.f32.gmra.mxu0 %v34_v23  ;;  %v98_v23 = vld [vmem:[%s2558_s0 + $0x2a0] sm:$0xff] }
  0x57   :  { %816 = vmatmul.mubr.f32.gmra.mxu1 %v36_v24  ;;  %435 = vmatprep.mubr.f32.mxu0 %v39_v25  ;;  %v100_v24 = vld [vmem:[%s2558_s0 + $0x2b0] sm:$0xff]  ;;  %v103_v25 = vld [vmem:[%s2558_s0 + $0x2c8] sm:$0xff] }
  0x58   :  { %820 = vmatprep.mubr.f32.mxu1 %v41_v26  ;;  %v105_v26 = vld [vmem:[%s2558_s0 + $0x2d8] sm:$0xff] }
  0x5a   :  { %436 = vmatmul.mubr.f32.gmra.mxu0 %v38_v27  ;;  %v102_v27 = vld [vmem:[%s2558_s0 + $0x2c0] sm:$0xff] }
  0x5b   :  { %821 = vmatmul.mubr.f32.gmra.mxu1 %v40_v28  ;;  %440 = vmatprep.mubr.f32.mxu0 %v43_v29  ;;  %v104_v28 = vld [vmem:[%s2558_s0 + $0x2d0] sm:$0xff]  ;;  %v107_v29 = vld [vmem:[%s2558_s0 + $0x2e8] sm:$0xff] }
  0x5c   :  { %825 = vmatprep.mubr.f32.mxu1 %v45_v30  ;;  %v109_v30 = vld [vmem:[%s2558_s0 + $0x2f8] sm:$0xff] }
  0x5e   :  { %441 = vmatmul.mubr.f32.gmra.mxu0 %v42_v31  ;;  %v106_v31 = vld [vmem:[%s2558_s0 + $0x2e0] sm:$0xff] }
  0x5f   :  { %826 = vmatmul.mubr.f32.gmra.mxu1 %v44_v32  ;;  %445 = vmatprep.mubr.f32.mxu0 %v47_v33  ;;  %v108_v32 = vld [vmem:[%s2558_s0 + $0x2f0] sm:$0xff]  ;;  %v111_v33 = vld [vmem:[%s2558_s0 + $0x308] sm:$0xff] }
  0x60   :  { %830 = vmatprep.mubr.f32.mxu1 %v49_v34  ;;  %v113_v34 = vld [vmem:[%s2558_s0 + $0x318] sm:$0xff] }
  0x62   :  { %446 = vmatmul.mubr.f32.gmra.mxu0 %v46_v35  ;;  %v110_v35 = vld [vmem:[%s2558_s0 + $0x300] sm:$0xff] }
  0x63   :  { %831 = vmatmul.mubr.f32.gmra.mxu1 %v48_v36  ;;  %450 = vmatprep.mubr.f32.mxu0 %v51_v37  ;;  %v112_v36 = vld [vmem:[%s2558_s0 + $0x310] sm:$0xff]  ;;  %v115_v37 = vld [vmem:[%s2558_s0 + $0x328] sm:$0xff] }
  0x64   :  { %835 = vmatprep.mubr.f32.mxu1 %v53_v38  ;;  %v117_v38 = vld [vmem:[%s2558_s0 + $0x338] sm:$0xff] }
  0x66   :  { %451 = vmatmul.mubr.f32.gmra.mxu0 %v50_v39  ;;  %v114_v39 = vld [vmem:[%s2558_s0 + $0x320] sm:$0xff] }
  0x67   :  { %836 = vmatmul.mubr.f32.gmra.mxu1 %v52_v40  ;;  %455 = vmatprep.mubr.f32.mxu0 %v55_v41  ;;  %v116_v40 = vld [vmem:[%s2558_s0 + $0x330] sm:$0xff]  ;;  %v119_v41 = vld [vmem:[%s2558_s0 + $0x348] sm:$0xff] }
  0x68   :  { %840 = vmatprep.mubr.f32.mxu1 %v57_v42  ;;  %v121_v42 = vld [vmem:[%s2558_s0 + $0x358] sm:$0xff] }
  0x6a   :  { %456 = vmatmul.mubr.f32.gmra.mxu0 %v54_v43  ;;  %v118_v43 = vld [vmem:[%s2558_s0 + $0x340] sm:$0xff] }
  0x6b   :  { %841 = vmatmul.mubr.f32.gmra.mxu1 %v56_v44  ;;  %460 = vmatprep.mubr.f32.mxu0 %v59_v45  ;;  %v120_v44 = vld [vmem:[%s2558_s0 + $0x350] sm:$0xff]  ;;  %v123_v45 = vld [vmem:[%s2558_s0 + $0x368] sm:$0xff] }
  0x6c   :  { %845 = vmatprep.mubr.f32.mxu1 %v61_v46  ;;  %v125_v46 = vld [vmem:[%s2558_s0 + $0x378] sm:$0xff] }
  0x6e   :  { %461 = vmatmul.mubr.f32.gmra.mxu0 %v58_v47  ;;  %v122_v47 = vld [vmem:[%s2558_s0 + $0x360] sm:$0xff] }
  0x6f   :  { %846 = vmatmul.mubr.f32.gmra.mxu1 %v60_v48  ;;  %465 = vmatprep.mubr.f32.mxu0 %v63_v49  ;;  %v124_v48 = vld [vmem:[%s2558_s0 + $0x370] sm:$0xff]  ;;  %v127_v49 = vld [vmem:[%s2558_s0 + $0x388] sm:$0xff] }
  0x70   :  { %850 = vmatprep.mubr.f32.mxu1 %v65_v50  ;;  %v129_v50 = vld [vmem:[%s2558_s0 + $0x398] sm:$0xff] }
  0x72   :  { %466 = vmatmul.mubr.f32.gmra.mxu0 %v62_v51  ;;  %v126_v51 = vld [vmem:[%s2558_s0 + $0x380] sm:$0xff] }
  0x73   :  { %851 = vmatmul.mubr.f32.gmra.mxu1 %v64_v52  ;;  %470 = vmatprep.mubr.f32.mxu0 %v67_v53  ;;  %v128_v52 = vld [vmem:[%s2558_s0 + $0x390] sm:$0xff]  ;;  %v131_v53 = vld [vmem:[%s2558_s0 + $0x3a8] sm:$0xff] }
  0x74   :  { %855 = vmatprep.mubr.f32.mxu1 %v69_v54  ;;  %v133_v54 = vld [vmem:[%s2558_s0 + $0x3b8] sm:$0xff] }
  0x76   :  { %471 = vmatmul.mubr.f32.gmra.mxu0 %v66_v55  ;;  %v130_v55 = vld [vmem:[%s2558_s0 + $0x3a0] sm:$0xff] }
  0x77   :  { %856 = vmatmul.mubr.f32.gmra.mxu1 %v68_v56  ;;  %475 = vmatprep.mubr.f32.mxu0 %v71_v57  ;;  %v132_v56 = vld [vmem:[%s2558_s0 + $0x3b0] sm:$0xff]  ;;  %v135_v57 = vld [vmem:[%s2558_s0 + $0x3c8] sm:$0xff] }
  0x78   :  { %860 = vmatprep.mubr.f32.mxu1 %v73_v58  ;;  %v137_v58 = vld [vmem:[%s2558_s0 + $0x3d8] sm:$0xff] }
  0x7a   :  { %476 = vmatmul.mubr.f32.gmra.mxu0 %v70_v59  ;;  %v134_v59 = vld [vmem:[%s2558_s0 + $0x3c0] sm:$0xff] }
  0x7b   :  { %861 = vmatmul.mubr.f32.gmra.mxu1 %v72_v60  ;;  %480 = vmatprep.mubr.f32.mxu0 %v75_v61  ;;  %v136_v60 = vld [vmem:[%s2558_s0 + $0x3d0] sm:$0xff]  ;;  %v139_v61 = vld [vmem:[%s2558_s0 + $0x3e8] sm:$0xff] }
  0x7c   :  { %865 = vmatprep.mubr.f32.mxu1 %v77_v62  ;;  %v141_v62 = vld [vmem:[%s2558_s0 + $0x3f8] sm:$0xff] }
  0x7e   :  { %481 = vmatmul.mubr.f32.gmra.mxu0 %v74_v63  ;;  %v138_v63 = vld [vmem:[%s2558_s0 + $0x3e0] sm:$0xff] }
  0x7f   :  { %866 = vmatmul.mubr.f32.gmra.mxu1 %v76_v1  ;;  %485 = vmatprep.mubr.f32.mxu0 %v79_v2  ;;  %v140_v1 = vld [vmem:[%s2558_s0 + $0x3f0] sm:$0xff]  ;;  %v143_v2 = vld [vmem:[%s2558_s0 + $0x408] sm:$0xff] }
  0x80   :  { %870 = vmatprep.mubr.f32.mxu1 %v81_v3  ;;  %v145_v3 = vld [vmem:[%s2558_s0 + $0x418] sm:$0xff] }
  0x82   :  { %486 = vmatmul.mubr.f32.gmra.mxu0 %v78_v4  ;;  %v142_v4 = vld [vmem:[%s2558_s0 + $0x400] sm:$0xff] }
  0x83   :  { %871 = vmatmul.mubr.f32.gmra.mxu1 %v80_v5  ;;  %490 = vmatprep.mubr.f32.mxu0 %v83_v6  ;;  %v144_v5 = vld [vmem:[%s2558_s0 + $0x410] sm:$0xff]  ;;  %v147_v6 = vld [vmem:[%s2558_s0 + $0x428] sm:$0xff] }
  0x84   :  { %875 = vmatprep.mubr.f32.mxu1 %v85_v7  ;;  %v149_v7 = vld [vmem:[%s2558_s0 + $0x438] sm:$0xff] }
  0x86   :  { %491 = vmatmul.mubr.f32.gmra.mxu0 %v82_v0  ;;  %v146_v0 = vld [vmem:[%s2558_s0 + $0x420] sm:$0xff] }
  0x87   :  { %876 = vmatmul.mubr.f32.gmra.mxu1 %v84_v8  ;;  %495 = vmatprep.mubr.f32.mxu0 %v87_v9  ;;  %v148_v8 = vld [vmem:[%s2558_s0 + $0x430] sm:$0xff]  ;;  %v151_v9 = vld [vmem:[%s2558_s0 + $0x448] sm:$0xff] }
  0x88   :  { %880 = vmatprep.mubr.f32.mxu1 %v89_v10  ;;  %v153_v10 = vld [vmem:[%s2558_s0 + $0x458] sm:$0xff] }
  0x8a   :  { %496 = vmatmul.mubr.f32.gmra.mxu0 %v86_v11  ;;  %v150_v11 = vld [vmem:[%s2558_s0 + $0x440] sm:$0xff] }
  0x8b   :  { %881 = vmatmul.mubr.f32.gmra.mxu1 %v88_v12  ;;  %500 = vmatprep.mubr.f32.mxu0 %v91_v13  ;;  %v152_v12 = vld [vmem:[%s2558_s0 + $0x450] sm:$0xff]  ;;  %v155_v13 = vld [vmem:[%s2558_s0 + $0x468] sm:$0xff] }
  0x8c   :  { %885 = vmatprep.mubr.f32.mxu1 %v93_v14  ;;  %v157_v14 = vld [vmem:[%s2558_s0 + $0x478] sm:$0xff] }
  0x8e   :  { %501 = vmatmul.mubr.f32.gmra.mxu0 %v90_v15  ;;  %v154_v15 = vld [vmem:[%s2558_s0 + $0x460] sm:$0xff] }
  0x8f   :  { %886 = vmatmul.mubr.f32.gmra.mxu1 %v92_v16  ;;  %505 = vmatprep.mubr.f32.mxu0 %v95_v17  ;;  %v156_v16 = vld [vmem:[%s2558_s0 + $0x470] sm:$0xff]  ;;  %v159_v17 = vld [vmem:[%s2558_s0 + $0x488] sm:$0xff] }
  0x90   :  { %890 = vmatprep.mubr.f32.mxu1 %v97_v18  ;;  %v161_v18 = vld [vmem:[%s2558_s0 + $0x498] sm:$0xff] }
  0x92   :  { %506 = vmatmul.mubr.f32.gmra.mxu0 %v94_v19  ;;  %v158_v19 = vld [vmem:[%s2558_s0 + $0x480] sm:$0xff] }
  0x93   :  { %891 = vmatmul.mubr.f32.gmra.mxu1 %v96_v20  ;;  %510 = vmatprep.mubr.f32.mxu0 %v99_v21  ;;  %v160_v20 = vld [vmem:[%s2558_s0 + $0x490] sm:$0xff]  ;;  %v163_v21 = vld [vmem:[%s2558_s0 + $0x4a8] sm:$0xff] }
  0x94   :  { %895 = vmatprep.mubr.f32.mxu1 %v101_v22  ;;  %v165_v22 = vld [vmem:[%s2558_s0 + $0x4b8] sm:$0xff] }
  0x96   :  { %511 = vmatmul.mubr.f32.gmra.mxu0 %v98_v23  ;;  %v162_v23 = vld [vmem:[%s2558_s0 + $0x4a0] sm:$0xff] }
  0x97   :  { %896 = vmatmul.mubr.f32.gmra.mxu1 %v100_v24  ;;  %515 = vmatprep.mubr.f32.mxu0 %v103_v25  ;;  %v164_v24 = vld [vmem:[%s2558_s0 + $0x4b0] sm:$0xff]  ;;  %v167_v25 = vld [vmem:[%s2558_s0 + $0x4c8] sm:$0xff] }
  0x98   :  { %900 = vmatprep.mubr.f32.mxu1 %v105_v26  ;;  %v169_v26 = vld [vmem:[%s2558_s0 + $0x4d8] sm:$0xff] }
  0x9a   :  { %516 = vmatmul.mubr.f32.gmra.mxu0 %v102_v27  ;;  %v166_v27 = vld [vmem:[%s2558_s0 + $0x4c0] sm:$0xff] }
  0x9b   :  { %901 = vmatmul.mubr.f32.gmra.mxu1 %v104_v28  ;;  %520 = vmatprep.mubr.f32.mxu0 %v107_v29  ;;  %v168_v28 = vld [vmem:[%s2558_s0 + $0x4d0] sm:$0xff]  ;;  %v171_v29 = vld [vmem:[%s2558_s0 + $0x4e8] sm:$0xff] }
  0x9c   :  { %905 = vmatprep.mubr.f32.mxu1 %v109_v30  ;;  %v173_v30 = vld [vmem:[%s2558_s0 + $0x4f8] sm:$0xff] }
  0x9e   :  { %521 = vmatmul.mubr.f32.gmra.mxu0 %v106_v31  ;;  %v170_v31 = vld [vmem:[%s2558_s0 + $0x4e0] sm:$0xff] }
  0x9f   :  { %906 = vmatmul.mubr.f32.gmra.mxu1 %v108_v32  ;;  %525 = vmatprep.mubr.f32.mxu0 %v111_v33  ;;  %v172_v32 = vld [vmem:[%s2558_s0 + $0x4f0] sm:$0xff]  ;;  %v175_v33 = vld [vmem:[%s2558_s0 + $0x508] sm:$0xff] }
  0xa0   :  { %910 = vmatprep.mubr.f32.mxu1 %v113_v34  ;;  %v177_v34 = vld [vmem:[%s2558_s0 + $0x518] sm:$0xff] }
  0xa2   :  { %526 = vmatmul.mubr.f32.gmra.mxu0 %v110_v35  ;;  %v174_v35 = vld [vmem:[%s2558_s0 + $0x500] sm:$0xff] }
  0xa3   :  { %911 = vmatmul.mubr.f32.gmra.mxu1 %v112_v36  ;;  %530 = vmatprep.mubr.f32.mxu0 %v115_v37  ;;  %v176_v36 = vld [vmem:[%s2558_s0 + $0x510] sm:$0xff]  ;;  %v179_v37 = vld [vmem:[%s2558_s0 + $0x528] sm:$0xff] }
  0xa4   :  { %915 = vmatprep.mubr.f32.mxu1 %v117_v38  ;;  %v181_v38 = vld [vmem:[%s2558_s0 + $0x538] sm:$0xff] }
  0xa6   :  { %531 = vmatmul.mubr.f32.gmra.mxu0 %v114_v39  ;;  %v178_v39 = vld [vmem:[%s2558_s0 + $0x520] sm:$0xff] }
  0xa7   :  { %916 = vmatmul.mubr.f32.gmra.mxu1 %v116_v40  ;;  %535 = vmatprep.mubr.f32.mxu0 %v119_v41  ;;  %v180_v40 = vld [vmem:[%s2558_s0 + $0x530] sm:$0xff]  ;;  %v183_v41 = vld [vmem:[%s2558_s0 + $0x548] sm:$0xff] }
  0xa8   :  { %920 = vmatprep.mubr.f32.mxu1 %v121_v42  ;;  %v185_v42 = vld [vmem:[%s2558_s0 + $0x558] sm:$0xff] }
  0xaa   :  { %536 = vmatmul.mubr.f32.gmra.mxu0 %v118_v43  ;;  %v182_v43 = vld [vmem:[%s2558_s0 + $0x540] sm:$0xff] }
  0xab   :  { %921 = vmatmul.mubr.f32.gmra.mxu1 %v120_v44  ;;  %540 = vmatprep.mubr.f32.mxu0 %v123_v45  ;;  %v184_v44 = vld [vmem:[%s2558_s0 + $0x550] sm:$0xff]  ;;  %v187_v45 = vld [vmem:[%s2558_s0 + $0x568] sm:$0xff] }
  0xac   :  { %925 = vmatprep.mubr.f32.mxu1 %v125_v46  ;;  %v189_v46 = vld [vmem:[%s2558_s0 + $0x578] sm:$0xff] }
  0xae   :  { %541 = vmatmul.mubr.f32.gmra.mxu0 %v122_v47  ;;  %v186_v47 = vld [vmem:[%s2558_s0 + $0x560] sm:$0xff] }
  0xaf   :  { %926 = vmatmul.mubr.f32.gmra.mxu1 %v124_v48  ;;  %545 = vmatprep.mubr.f32.mxu0 %v127_v49  ;;  %v188_v48 = vld [vmem:[%s2558_s0 + $0x570] sm:$0xff]  ;;  %v191_v49 = vld [vmem:[%s2558_s0 + $0x588] sm:$0xff] }
  0xb0   :  { %930 = vmatprep.mubr.f32.mxu1 %v129_v50  ;;  %v193_v50 = vld [vmem:[%s2558_s0 + $0x598] sm:$0xff] }
  0xb2   :  { %546 = vmatmul.mubr.f32.gmra.mxu0 %v126_v51  ;;  %v190_v51 = vld [vmem:[%s2558_s0 + $0x580] sm:$0xff] }
  0xb3   :  { %931 = vmatmul.mubr.f32.gmra.mxu1 %v128_v52  ;;  %550 = vmatprep.mubr.f32.mxu0 %v131_v53  ;;  %v192_v52 = vld [vmem:[%s2558_s0 + $0x590] sm:$0xff]  ;;  %v195_v53 = vld [vmem:[%s2558_s0 + $0x5a8] sm:$0xff] }
  0xb4   :  { %935 = vmatprep.mubr.f32.mxu1 %v133_v54  ;;  %v197_v54 = vld [vmem:[%s2558_s0 + $0x5b8] sm:$0xff] }
  0xb6   :  { %551 = vmatmul.mubr.f32.gmra.mxu0 %v130_v55  ;;  %v194_v55 = vld [vmem:[%s2558_s0 + $0x5a0] sm:$0xff] }
  0xb7   :  { %936 = vmatmul.mubr.f32.gmra.mxu1 %v132_v56  ;;  %555 = vmatprep.mubr.f32.mxu0 %v135_v57  ;;  %v196_v56 = vld [vmem:[%s2558_s0 + $0x5b0] sm:$0xff]  ;;  %v199_v57 = vld [vmem:[%s2558_s0 + $0x5c8] sm:$0xff] }
  0xb8   :  { %940 = vmatprep.mubr.f32.mxu1 %v137_v58  ;;  %v201_v58 = vld [vmem:[%s2558_s0 + $0x5d8] sm:$0xff] }
  0xba   :  { %556 = vmatmul.mubr.f32.gmra.mxu0 %v134_v59  ;;  %v198_v59 = vld [vmem:[%s2558_s0 + $0x5c0] sm:$0xff] }
  0xbb   :  { %941 = vmatmul.mubr.f32.gmra.mxu1 %v136_v60  ;;  %560 = vmatprep.mubr.f32.mxu0 %v139_v61  ;;  %v200_v60 = vld [vmem:[%s2558_s0 + $0x5d0] sm:$0xff]  ;;  %v203_v61 = vld [vmem:[%s2558_s0 + $0x5e8] sm:$0xff] }
  0xbc   :  { %945 = vmatprep.mubr.f32.mxu1 %v141_v62  ;;  %v205_v62 = vld [vmem:[%s2558_s0 + $0x5f8] sm:$0xff] }
  0xbe   :  { %561 = vmatmul.mubr.f32.gmra.mxu0 %v138_v63  ;;  %v202_v63 = vld [vmem:[%s2558_s0 + $0x5e0] sm:$0xff] }
  0xbf   :  { %946 = vmatmul.mubr.f32.gmra.mxu1 %v140_v1  ;;  %565 = vmatprep.mubr.f32.mxu0 %v143_v2  ;;  %v204_v1 = vld [vmem:[%s2558_s0 + $0x5f0] sm:$0xff]  ;;  %v207_v2 = vld [vmem:[%s2558_s0 + $0x608] sm:$0xff] }
  0xc0   :  { %950 = vmatprep.mubr.f32.mxu1 %v145_v3  ;;  %v209_v3 = vld [vmem:[%s2558_s0 + $0x618] sm:$0xff] }
  0xc2   :  { %566 = vmatmul.mubr.f32.gmra.mxu0 %v142_v4  ;;  %v206_v4 = vld [vmem:[%s2558_s0 + $0x600] sm:$0xff] }
  0xc3   :  { %951 = vmatmul.mubr.f32.gmra.mxu1 %v144_v5  ;;  %570 = vmatprep.mubr.f32.mxu0 %v147_v6  ;;  %v208_v5 = vld [vmem:[%s2558_s0 + $0x610] sm:$0xff]  ;;  %v2114_v6 = vld [vmem:[%s2559_s2] ss:$0 sm:$0xff] }
  0xc4   :  { %955 = vmatprep.mubr.f32.mxu1 %v149_v7  ;;  %v211_v7 = vld [vmem:[%s2558_s0 + $0x628] sm:$0xff] }
  0xc6   :  { %571 = vmatmul.mubr.f32.gmra.mxu0 %v146_v0  ;;  %v213_v0 = vld [vmem:[%s2558_s0 + $0x638] sm:$0xff] }
  0xc7   :  { %956 = vmatmul.mubr.f32.gmra.mxu1 %v148_v8  ;;  %575 = vmatprep.mubr.f32.mxu0 %v151_v9 }
  0xc8   :  { %960 = vmatprep.mubr.f32.mxu1 %v153_v10 }
  0xca   :  { %576 = vmatmul.mubr.f32.gmra.mxu0 %v150_v11  ;;  %v210_v11 = vld [vmem:[%s2558_s0 + $0x620] sm:$0xff] }
  0xcb   :  { %961 = vmatmul.mubr.f32.gmra.mxu1 %v152_v12  ;;  %580 = vmatprep.mubr.f32.mxu0 %v155_v13  ;;  %v212_v12 = vld [vmem:[%s2558_s0 + $0x630] sm:$0xff] }
  0xcc   :  { %965 = vmatprep.mubr.f32.mxu1 %v157_v14 }
  0xce   :  { %581 = vmatmul.mubr.f32.gmra.mxu0 %v154_v15  ;;  %v215_v15 = vld [vmem:[%s2558_s0 + $0x648] sm:$0xff] }
  0xcf   :  { %966 = vmatmul.mubr.f32.gmra.mxu1 %v156_v16  ;;  %585 = vmatprep.mubr.f32.mxu0 %v159_v17  ;;  %v217_v16 = vld [vmem:[%s2558_s0 + $0x658] sm:$0xff] }
  0xd0   :  { %970 = vmatprep.mubr.f32.mxu1 %v161_v18 }
  0xd2   :  { %586 = vmatmul.mubr.f32.gmra.mxu0 %v158_v19 }
  0xd3   :  { %971 = vmatmul.mubr.f32.gmra.mxu1 %v160_v20  ;;  %590 = vmatprep.mubr.f32.mxu0 %v163_v21 }
  0xd4   :  { %975 = vmatprep.mubr.f32.mxu1 %v165_v22  ;;  %v214_v22 = vld [vmem:[%s2558_s0 + $0x640] sm:$0xff] }
  0xd6   :  { %591 = vmatmul.mubr.f32.gmra.mxu0 %v162_v23  ;;  %v216_v23 = vld [vmem:[%s2558_s0 + $0x650] sm:$0xff] }
  0xd7   :  { %976 = vmatmul.mubr.f32.gmra.mxu1 %v164_v24  ;;  %595 = vmatprep.mubr.f32.mxu0 %v167_v25 }
  0xd8   :  { %980 = vmatprep.mubr.f32.mxu1 %v169_v26  ;;  %v219_v26 = vld [vmem:[%s2558_s0 + $0x668] sm:$0xff] }
  0xda   :  { %596 = vmatmul.mubr.f32.gmra.mxu0 %v166_v27  ;;  %v221_v27 = vld [vmem:[%s2558_s0 + $0x678] sm:$0xff] }
  0xdb   :  { %981 = vmatmul.mubr.f32.gmra.mxu1 %v168_v28  ;;  %600 = vmatprep.mubr.f32.mxu0 %v171_v29 }
  0xdc   :  { %985 = vmatprep.mubr.f32.mxu1 %v173_v30 }
  0xde   :  { %601 = vmatmul.mubr.f32.gmra.mxu0 %v170_v31 }
  0xdf   :  { %986 = vmatmul.mubr.f32.gmra.mxu1 %v172_v32  ;;  %605 = vmatprep.mubr.f32.mxu0 %v175_v33  ;;  %v218_v33 = vld [vmem:[%s2558_s0 + $0x660] sm:$0xff] }
  0xe0   :  { %990 = vmatprep.mubr.f32.mxu1 %v177_v34  ;;  %v220_v34 = vld [vmem:[%s2558_s0 + $0x670] sm:$0xff] }
  0xe2   :  { %606 = vmatmul.mubr.f32.gmra.mxu0 %v174_v35 }
  0xe3   :  { %991 = vmatmul.mubr.f32.gmra.mxu1 %v176_v36  ;;  %610 = vmatprep.mubr.f32.mxu0 %v179_v37  ;;  %v223_v37 = vld [vmem:[%s2558_s0 + $0x688] sm:$0xff] }
  0xe4   :  { %995 = vmatprep.mubr.f32.mxu1 %v181_v38  ;;  %v225_v38 = vld [vmem:[%s2558_s0 + $0x698] sm:$0xff] }
  0xe6   :  { %611 = vmatmul.mubr.f32.gmra.mxu0 %v178_v39 }
  0xe7   :  { %996 = vmatmul.mubr.f32.gmra.mxu1 %v180_v40  ;;  %615 = vmatprep.mubr.f32.mxu0 %v183_v41 }
  0xe8   :  { %1000 = vmatprep.mubr.f32.mxu1 %v185_v42 }
  0xea   :  { %616 = vmatmul.mubr.f32.gmra.mxu0 %v182_v43 }
  0xeb   :  { %1001 = vmatmul.mubr.f32.gmra.mxu1 %v184_v44  ;;  %620 = vmatprep.mubr.f32.mxu0 %v187_v45  ;;  %v222_v44 = vld [vmem:[%s2558_s0 + $0x680] sm:$0xff]  ;;  %v224_v45 = vld [vmem:[%s2558_s0 + $0x690] sm:$0xff] }
  0xec   :  { %1005 = vmatprep.mubr.f32.mxu1 %v189_v46 }
  0xee   :  { %621 = vmatmul.mubr.f32.gmra.mxu0 %v186_v47 }
  0xef   :  { %1006 = vmatmul.mubr.f32.gmra.mxu1 %v188_v48  ;;  %625 = vmatprep.mubr.f32.mxu0 %v191_v49  ;;  %v227_v48 = vld [vmem:[%s2558_s0 + $0x6a8] sm:$0xff]  ;;  %v229_v49 = vld [vmem:[%s2558_s0 + $0x6b8] sm:$0xff] }
  0xf0   :  { %1010 = vmatprep.mubr.f32.mxu1 %v193_v50 }
  0xf2   :  { %626 = vmatmul.mubr.f32.gmra.mxu0 %v190_v51 }
  0xf3   :  { %1011 = vmatmul.mubr.f32.gmra.mxu1 %v192_v52  ;;  %630 = vmatprep.mubr.f32.mxu0 %v195_v53 }
  0xf4   :  { %1015 = vmatprep.mubr.f32.mxu1 %v197_v54 }
  0xf6   :  { %631 = vmatmul.mubr.f32.gmra.mxu0 %v194_v55  ;;  %v226_v55 = vld [vmem:[%s2558_s0 + $0x6a0] sm:$0xff] }
  0xf7   :  { %1016 = vmatmul.mubr.f32.gmra.mxu1 %v196_v56  ;;  %635 = vmatprep.mubr.f32.mxu0 %v199_v57  ;;  %v228_v56 = vld [vmem:[%s2558_s0 + $0x6b0] sm:$0xff] }
  0xf8   :  { %1020 = vmatprep.mubr.f32.mxu1 %v201_v58 }
  0xfa   :  { %636 = vmatmul.mubr.f32.gmra.mxu0 %v198_v59  ;;  %v231_v59 = vld [vmem:[%s2558_s0 + $0x6c8] sm:$0xff] }
  0xfb   :  { %1021 = vmatmul.mubr.f32.gmra.mxu1 %v200_v60  ;;  %640 = vmatprep.mubr.f32.mxu0 %v203_v61  ;;  %v233_v60 = vld [vmem:[%s2558_s0 + $0x6d8] sm:$0xff] }
  0xfc   :  { %1025 = vmatprep.mubr.f32.mxu1 %v205_v62 }
  0xfe   :  { %641 = vmatmul.mubr.f32.gmra.mxu0 %v202_v63 }
  0xff   :  { %1026 = vmatmul.mubr.f32.gmra.mxu1 %v204_v1  ;;  %645 = vmatprep.mubr.f32.mxu0 %v207_v2 }
 0x100   :  { %1030 = vmatprep.mubr.f32.mxu1 %v209_v3  ;;  %v230_v3 = vld [vmem:[%s2558_s0 + $0x6c0] sm:$0xff] }
 0x102   :  { %v407_v8 = vpop.f32.mrf.mxu0  ;;  %646 = vmatmul.mubr.f32.gmra.mxu0 %v206_v4  ;;  %v232_v4 = vld [vmem:[%s2558_s0 + $0x6d0] sm:$0xff] }
 0x103   :  { %v792_v9 = vpop.f32.mrf.mxu1  ;;  %1031 = vmatmul.mubr.f32.gmra.mxu1 %v208_v5  ;;  %v408_v10 = vadd.f32 %v2114_v6, %v407_v8  ;;  %650 = vmatprep.mubr.f32.mxu0 %v211_v7  ;;  %v237_v8 = vld [vmem:[%s2558_s0 + $0x6f8] sm:$0xff] }
 0x104   :  { %1035 = vmatprep.mubr.f32.mxu1 %v213_v0  ;;  %v409_v13 = vpop.f32.mrf.mxu0  ;;  %v235_v0 = vld [vmem:[%s2558_s0 + $0x6e8] sm:$0xff] }
 0x105   :  { %v794_v14 = vpop.f32.mrf.mxu1  ;;  %v793_v17 = vadd.f32 %v792_v9, %v408_v10 }
 0x106   :  { %v412_v18 = vpop.f32.mrf.mxu0  ;;  %651 = vmatmul.mubr.f32.gmra.mxu0 %v210_v11  ;;  %v234_v14 = vld [vmem:[%s2558_s0 + $0x6e0] sm:$0xff] }
 0x107   :  { %v797_v19 = vpop.f32.mrf.mxu1  ;;  %1036 = vmatmul.mubr.f32.gmra.mxu1 %v212_v12  ;;  %v1111_v20 = vmax.f32 %v793_v17, 0.0  ;;  %v413_v21 = vadd.f32 %v2114_v6, %v412_v18  ;;  %655 = vmatprep.mubr.f32.mxu0 %v215_v15  ;;  %v236_v15 = vld [vmem:[%s2558_s0 + $0x6f0] sm:$0xff]  ;;  %v239_v18 = vld [vmem:[%s2558_s0 + $0x708] sm:$0xff] }
 0x108   :  { %1040 = vmatprep.mubr.f32.mxu1 %v217_v16  ;;  %v414_v24 = vpop.f32.mrf.mxu0 }
 0x109   :  { %v799_v25 = vpop.f32.mrf.mxu1  ;;  %1175 = vst [vmem:[%s2560_s3] sm:$0xff] %v1111_v20  ;;  %v798_v28 = vadd.f32 %v797_v19, %v413_v21  ;;  %v241_v19 = vld [vmem:[%s2558_s0 + $0x718] sm:$0xff] }
 0x10a   :  { %v417_v29 = vpop.f32.mrf.mxu0  ;;  %656 = vmatmul.mubr.f32.gmra.mxu0 %v214_v22  ;;  %v238_v25 = vld [vmem:[%s2558_s0 + $0x700] sm:$0xff] }
 0x10b   :  { %v802_v30 = vpop.f32.mrf.mxu1  ;;  %1041 = vmatmul.mubr.f32.gmra.mxu1 %v216_v23  ;;  %v1112_v31 = vmax.f32 %v798_v28, 0.0  ;;  %v418_v32 = vadd.f32 %v2114_v6, %v417_v29  ;;  %660 = vmatprep.mubr.f32.mxu0 %v219_v26  ;;  %v240_v26 = vld [vmem:[%s2558_s0 + $0x710] sm:$0xff]  ;;  %v243_v29 = vld [vmem:[%s2558_s0 + $0x728] sm:$0xff] }
 0x10c   :  { %1045 = vmatprep.mubr.f32.mxu1 %v221_v27  ;;  %v419_v35 = vpop.f32.mrf.mxu0 }
 0x10d   :  { %v804_v36 = vpop.f32.mrf.mxu1  ;;  %1176 = vst [vmem:[%s2560_s3 + $0x8] sm:$0xff] %v1112_v31  ;;  %v803_v39 = vadd.f32 %v802_v30, %v418_v32  ;;  %v245_v30 = vld [vmem:[%s2558_s0 + $0x738] sm:$0xff] }
 0x10e   :  { %v422_v40 = vpop.f32.mrf.mxu0  ;;  %661 = vmatmul.mubr.f32.gmra.mxu0 %v218_v33  ;;  %v242_v36 = vld [vmem:[%s2558_s0 + $0x720] sm:$0xff] }
 0x10f   :  { %v807_v41 = vpop.f32.mrf.mxu1  ;;  %1046 = vmatmul.mubr.f32.gmra.mxu1 %v220_v34  ;;  %v1113_v42 = vmax.f32 %v803_v39, 0.0  ;;  %v423_v43 = vadd.f32 %v2114_v6, %v422_v40  ;;  %665 = vmatprep.mubr.f32.mxu0 %v223_v37  ;;  %v244_v37 = vld [vmem:[%s2558_s0 + $0x730] sm:$0xff]  ;;  %v247_v40 = vld [vmem:[%s2558_s0 + $0x748] sm:$0xff] }
 0x110   :  { %1050 = vmatprep.mubr.f32.mxu1 %v225_v38  ;;  %v424_v46 = vpop.f32.mrf.mxu0 }
 0x111   :  { %v809_v47 = vpop.f32.mrf.mxu1  ;;  %1177 = vst [vmem:[%s2560_s3 + $0x10] sm:$0xff] %v1113_v42  ;;  %v808_v50 = vadd.f32 %v807_v41, %v423_v43  ;;  %v249_v41 = vld [vmem:[%s2558_s0 + $0x758] sm:$0xff] }
 0x112   :  { %v427_v51 = vpop.f32.mrf.mxu0  ;;  %666 = vmatmul.mubr.f32.gmra.mxu0 %v222_v44  ;;  %v246_v47 = vld [vmem:[%s2558_s0 + $0x740] sm:$0xff] }
 0x113   :  { %v812_v52 = vpop.f32.mrf.mxu1  ;;  %1051 = vmatmul.mubr.f32.gmra.mxu1 %v224_v45  ;;  %v1114_v53 = vmax.f32 %v808_v50, 0.0  ;;  %v428_v54 = vadd.f32 %v2114_v6, %v427_v51  ;;  %670 = vmatprep.mubr.f32.mxu0 %v227_v48  ;;  %v248_v48 = vld [vmem:[%s2558_s0 + $0x750] sm:$0xff]  ;;  %v251_v51 = vld [vmem:[%s2558_s0 + $0x768] sm:$0xff] }
 0x114   :  { %1055 = vmatprep.mubr.f32.mxu1 %v229_v49  ;;  %v429_v57 = vpop.f32.mrf.mxu0 }
 0x115   :  { %v814_v58 = vpop.f32.mrf.mxu1  ;;  %1178 = vst [vmem:[%s2560_s3 + $0x18] sm:$0xff] %v1114_v53  ;;  %v813_v61 = vadd.f32 %v812_v52, %v428_v54  ;;  %v253_v52 = vld [vmem:[%s2558_s0 + $0x778] sm:$0xff] }
 0x116   :  { %v432_v62 = vpop.f32.mrf.mxu0  ;;  %671 = vmatmul.mubr.f32.gmra.mxu0 %v226_v55  ;;  %v250_v58 = vld [vmem:[%s2558_s0 + $0x760] sm:$0xff] }
 0x117   :  { %v817_v63 = vpop.f32.mrf.mxu1  ;;  %1056 = vmatmul.mubr.f32.gmra.mxu1 %v228_v56  ;;  %v1115_v1 = vmax.f32 %v813_v61, 0.0  ;;  %v433_v2 = vadd.f32 %v2114_v6, %v432_v62  ;;  %675 = vmatprep.mubr.f32.mxu0 %v231_v59  ;;  %v252_v59 = vld [vmem:[%s2558_s0 + $0x770] sm:$0xff]  ;;  %v255_v62 = vld [vmem:[%s2558_s0 + $0x788] sm:$0xff] }
 0x118   :  { %1060 = vmatprep.mubr.f32.mxu1 %v233_v60  ;;  %v434_v5 = vpop.f32.mrf.mxu0 }
 0x119   :  { %v819_v7 = vpop.f32.mrf.mxu1  ;;  %1179 = vst [vmem:[%s2560_s3 + $0x20] sm:$0xff] %v1115_v1  ;;  %v818_v9 = vadd.f32 %v817_v63, %v433_v2  ;;  %v257_v63 = vld [vmem:[%s2558_s0 + $0x798] sm:$0xff] }
 0x11a   :  { %v437_v10 = vpop.f32.mrf.mxu0  ;;  %676 = vmatmul.mubr.f32.gmra.mxu0 %v230_v3  ;;  %v254_v7 = vld [vmem:[%s2558_s0 + $0x780] sm:$0xff] }
 0x11b   :  { %v822_v11 = vpop.f32.mrf.mxu1  ;;  %1061 = vmatmul.mubr.f32.gmra.mxu1 %v232_v4  ;;  %v1116_v12 = vmax.f32 %v818_v9, 0.0  ;;  %v438_v13 = vadd.f32 %v2114_v6, %v437_v10  ;;  %680 = vmatprep.mubr.f32.mxu0 %v235_v0  ;;  %v256_v0 = vld [vmem:[%s2558_s0 + $0x790] sm:$0xff]  ;;  %v259_v10 = vld [vmem:[%s2558_s0 + $0x7a8] sm:$0xff] }
 0x11c   :  { %1065 = vmatprep.mubr.f32.mxu1 %v237_v8  ;;  %v439_v16 = vpop.f32.mrf.mxu0 }
 0x11d   :  { %v824_v17 = vpop.f32.mrf.mxu1  ;;  %1180 = vst [vmem:[%s2560_s3 + $0x28] sm:$0xff] %v1116_v12  ;;  %v823_v20 = vadd.f32 %v822_v11, %v438_v13  ;;  %v261_v11 = vld [vmem:[%s2558_s0 + $0x7b8] sm:$0xff] }
 0x11e   :  { %v442_v21 = vpop.f32.mrf.mxu0  ;;  %681 = vmatmul.mubr.f32.gmra.mxu0 %v234_v14  ;;  %v258_v17 = vld [vmem:[%s2558_s0 + $0x7a0] sm:$0xff] }
 0x11f   :  { %v827_v22 = vpop.f32.mrf.mxu1  ;;  %1066 = vmatmul.mubr.f32.gmra.mxu1 %v236_v15  ;;  %v1117_v23 = vmax.f32 %v823_v20, 0.0  ;;  %v443_v24 = vadd.f32 %v2114_v6, %v442_v21  ;;  %685 = vmatprep.mubr.f32.mxu0 %v239_v18  ;;  %v260_v18 = vld [vmem:[%s2558_s0 + $0x7b0] sm:$0xff]  ;;  %v263_v21 = vld [vmem:[%s2558_s0 + $0x7c8] sm:$0xff] }
 0x120   :  { %1070 = vmatprep.mubr.f32.mxu1 %v241_v19  ;;  %v444_v27 = vpop.f32.mrf.mxu0 }
 0x121   :  { %v829_v28 = vpop.f32.mrf.mxu1  ;;  %1181 = vst [vmem:[%s2560_s3 + $0x30] sm:$0xff] %v1117_v23  ;;  %v828_v31 = vadd.f32 %v827_v22, %v443_v24  ;;  %v265_v22 = vld [vmem:[%s2558_s0 + $0x7d8] sm:$0xff] }
 0x122   :  { %v447_v32 = vpop.f32.mrf.mxu0  ;;  %686 = vmatmul.mubr.f32.gmra.mxu0 %v238_v25  ;;  %v262_v28 = vld [vmem:[%s2558_s0 + $0x7c0] sm:$0xff] }
 0x123   :  { %v832_v33 = vpop.f32.mrf.mxu1  ;;  %1071 = vmatmul.mubr.f32.gmra.mxu1 %v240_v26  ;;  %v1118_v34 = vmax.f32 %v828_v31, 0.0  ;;  %v448_v35 = vadd.f32 %v2114_v6, %v447_v32  ;;  %690 = vmatprep.mubr.f32.mxu0 %v243_v29  ;;  %v264_v29 = vld [vmem:[%s2558_s0 + $0x7d0] sm:$0xff]  ;;  %v267_v32 = vld [vmem:[%s2558_s0 + $0x7e8] sm:$0xff] }
 0x124   :  { %1075 = vmatprep.mubr.f32.mxu1 %v245_v30  ;;  %v449_v38 = vpop.f32.mrf.mxu0 }
 0x125   :  { %v834_v39 = vpop.f32.mrf.mxu1  ;;  %1182 = vst [vmem:[%s2560_s3 + $0x38] sm:$0xff] %v1118_v34  ;;  %v833_v42 = vadd.f32 %v832_v33, %v448_v35  ;;  %v269_v33 = vld [vmem:[%s2558_s0 + $0x7f8] sm:$0xff] }
 0x126   :  { %v452_v43 = vpop.f32.mrf.mxu0  ;;  %691 = vmatmul.mubr.f32.gmra.mxu0 %v242_v36  ;;  %v266_v39 = vld [vmem:[%s2558_s0 + $0x7e0] sm:$0xff] }
 0x127   :  { %v837_v44 = vpop.f32.mrf.mxu1  ;;  %1076 = vmatmul.mubr.f32.gmra.mxu1 %v244_v37  ;;  %v1119_v45 = vmax.f32 %v833_v42, 0.0  ;;  %v453_v46 = vadd.f32 %v2114_v6, %v452_v43  ;;  %695 = vmatprep.mubr.f32.mxu0 %v247_v40  ;;  %v268_v40 = vld [vmem:[%s2558_s0 + $0x7f0] sm:$0xff] }
 0x128   :  { %1080 = vmatprep.mubr.f32.mxu1 %v249_v41  ;;  %v454_v49 = vpop.f32.mrf.mxu0 }
 0x129   :  { %v839_v50 = vpop.f32.mrf.mxu1  ;;  %1183 = vst [vmem:[%s2560_s3 + $0x40] sm:$0xff] %v1119_v45  ;;  %v838_v53 = vadd.f32 %v837_v44, %v453_v46 }
 0x12a   :  { %v457_v54 = vpop.f32.mrf.mxu0  ;;  %696 = vmatmul.mubr.f32.gmra.mxu0 %v246_v47 }
 0x12b   :  { %v842_v55 = vpop.f32.mrf.mxu1  ;;  %1081 = vmatmul.mubr.f32.gmra.mxu1 %v248_v48  ;;  %v1120_v56 = vmax.f32 %v838_v53, 0.0  ;;  %v458_v57 = vadd.f32 %v2114_v6, %v457_v54  ;;  %700 = vmatprep.mubr.f32.mxu0 %v251_v51 }
 0x12c   :  { %1085 = vmatprep.mubr.f32.mxu1 %v253_v52  ;;  %v459_v60 = vpop.f32.mrf.mxu0 }
 0x12d   :  { %v844_v61 = vpop.f32.mrf.mxu1  ;;  %1184 = vst [vmem:[%s2560_s3 + $0x48] sm:$0xff] %v1120_v56  ;;  %v843_v1 = vadd.f32 %v842_v55, %v458_v57 }
 0x12e   :  { %v462_v2 = vpop.f32.mrf.mxu0  ;;  %701 = vmatmul.mubr.f32.gmra.mxu0 %v250_v58 }
 0x12f   :  { %v847_v3 = vpop.f32.mrf.mxu1  ;;  %1086 = vmatmul.mubr.f32.gmra.mxu1 %v252_v59  ;;  %v1121_v4 = vmax.f32 %v843_v1, 0.0  ;;  %v463_v5 = vadd.f32 %v2114_v6, %v462_v2  ;;  %705 = vmatprep.mubr.f32.mxu0 %v255_v62 }
 0x130   :  { %1090 = vmatprep.mubr.f32.mxu1 %v257_v63  ;;  %v464_v8 = vpop.f32.mrf.mxu0 }
 0x131   :  { %v849_v9 = vpop.f32.mrf.mxu1  ;;  %1185 = vst [vmem:[%s2560_s3 + $0x50] sm:$0xff] %v1121_v4  ;;  %v848_v12 = vadd.f32 %v847_v3, %v463_v5 }
 0x132   :  { %v467_v13 = vpop.f32.mrf.mxu0  ;;  %706 = vmatmul.mubr.f32.gmra.mxu0 %v254_v7 }
 0x133   :  { %v852_v14 = vpop.f32.mrf.mxu1  ;;  %1091 = vmatmul.mubr.f32.gmra.mxu1 %v256_v0  ;;  %v1122_v15 = vmax.f32 %v848_v12, 0.0  ;;  %v468_v16 = vadd.f32 %v2114_v6, %v467_v13  ;;  %710 = vmatprep.mubr.f32.mxu0 %v259_v10 }
 0x134   :  { %1095 = vmatprep.mubr.f32.mxu1 %v261_v11  ;;  %v469_v19 = vpop.f32.mrf.mxu0 }
 0x135   :  { %v854_v20 = vpop.f32.mrf.mxu1  ;;  %1186 = vst [vmem:[%s2560_s3 + $0x58] sm:$0xff] %v1122_v15  ;;  %v853_v23 = vadd.f32 %v852_v14, %v468_v16 }
 0x136   :  { %v472_v24 = vpop.f32.mrf.mxu0  ;;  %711 = vmatmul.mubr.f32.gmra.mxu0 %v258_v17 }
 0x137   :  { %v857_v25 = vpop.f32.mrf.mxu1  ;;  %1096 = vmatmul.mubr.f32.gmra.mxu1 %v260_v18  ;;  %v1123_v26 = vmax.f32 %v853_v23, 0.0  ;;  %v473_v27 = vadd.f32 %v2114_v6, %v472_v24  ;;  %715 = vmatprep.mubr.f32.mxu0 %v263_v21 }
 0x138   :  { %1100 = vmatprep.mubr.f32.mxu1 %v265_v22  ;;  %v474_v30 = vpop.f32.mrf.mxu0 }
 0x139   :  { %v859_v31 = vpop.f32.mrf.mxu1  ;;  %1187 = vst [vmem:[%s2560_s3 + $0x60] sm:$0xff] %v1123_v26  ;;  %v858_v34 = vadd.f32 %v857_v25, %v473_v27 }
 0x13a   :  { %v477_v35 = vpop.f32.mrf.mxu0  ;;  %716 = vmatmul.mubr.f32.gmra.mxu0 %v262_v28 }
 0x13b   :  { %v862_v36 = vpop.f32.mrf.mxu1  ;;  %1101 = vmatmul.mubr.f32.gmra.mxu1 %v264_v29  ;;  %v1124_v37 = vmax.f32 %v858_v34, 0.0  ;;  %v478_v38 = vadd.f32 %v2114_v6, %v477_v35  ;;  %720 = vmatprep.mubr.f32.mxu0 %v267_v32 }
 0x13c   :  { %1105 = vmatprep.mubr.f32.mxu1 %v269_v33  ;;  %v479_v41 = vpop.f32.mrf.mxu0 }
 0x13d   :  { %v864_v42 = vpop.f32.mrf.mxu1  ;;  %1188 = vst [vmem:[%s2560_s3 + $0x68] sm:$0xff] %v1124_v37  ;;  %v863_v43 = vadd.f32 %v862_v36, %v478_v38 }
 0x13e   :  { %v482_v44 = vpop.f32.mrf.mxu0  ;;  %721 = vmatmul.mubr.f32.gmra.mxu0 %v266_v39 }
 0x13f   :  { %v867_v45 = vpop.f32.mrf.mxu1  ;;  %1106 = vmatmul.mubr.f32.gmra.mxu1 %v268_v40  ;;  %v1125_v46 = vmax.f32 %v863_v43, 0.0  ;;  %v483_v47 = vadd.f32 %v2114_v6, %v482_v44 }
 0x140   :  { %v484_v48 = vpop.f32.mrf.mxu0 }
 0x141   :  { %v869_v49 = vpop.f32.mrf.mxu1  ;;  %1189 = vst [vmem:[%s2560_s3 + $0x70] sm:$0xff] %v1125_v46  ;;  %v868_v50 = vadd.f32 %v867_v45, %v483_v47 }
 0x142   :  { %v487_v51 = vpop.f32.mrf.mxu0 }
 0x143   :  { %v872_v52 = vpop.f32.mrf.mxu1  ;;  %v1126_v53 = vmax.f32 %v868_v50, 0.0  ;;  %v488_v54 = vadd.f32 %v2114_v6, %v487_v51 }
 0x144   :  { %v489_v55 = vpop.f32.mrf.mxu0 }
 0x145   :  { %v874_v56 = vpop.f32.mrf.mxu1  ;;  %1190 = vst [vmem:[%s2560_s3 + $0x78] sm:$0xff] %v1126_v53  ;;  %v873_v57 = vadd.f32 %v872_v52, %v488_v54 }
 0x146   :  { %v492_v58 = vpop.f32.mrf.mxu0 }
 0x147   :  { %v877_v59 = vpop.f32.mrf.mxu1  ;;  %v1127_v60 = vmax.f32 %v873_v57, 0.0  ;;  %v493_v61 = vadd.f32 %v2114_v6, %v492_v58 }
 0x148   :  { %v494_v62 = vpop.f32.mrf.mxu0 }
 0x149   :  { %v879_v63 = vpop.f32.mrf.mxu1  ;;  %1191 = vst [vmem:[%s2560_s3 + $0x80] sm:$0xff] %v1127_v60  ;;  %v878_v1 = vadd.f32 %v877_v59, %v493_v61 }
 0x14a   :  { %v497_v2 = vpop.f32.mrf.mxu0 }
 0x14b   :  { %v882_v3 = vpop.f32.mrf.mxu1  ;;  %v1128_v4 = vmax.f32 %v878_v1, 0.0  ;;  %v498_v5 = vadd.f32 %v2114_v6, %v497_v2 }
 0x14c   :  { %v499_v7 = vpop.f32.mrf.mxu0 }
 0x14d   :  { %v884_v0 = vpop.f32.mrf.mxu1  ;;  %1192 = vst [vmem:[%s2560_s3 + $0x88] sm:$0xff] %v1128_v4  ;;  %v883_v8 = vadd.f32 %v882_v3, %v498_v5 }
 0x14e   :  { %v502_v9 = vpop.f32.mrf.mxu0 }
 0x14f   :  { %v887_v10 = vpop.f32.mrf.mxu1  ;;  %v1129_v11 = vmax.f32 %v883_v8, 0.0  ;;  %v503_v12 = vadd.f32 %v2114_v6, %v502_v9 }
 0x150   :  { %v504_v13 = vpop.f32.mrf.mxu0 }
 0x151   :  { %v889_v14 = vpop.f32.mrf.mxu1  ;;  %1193 = vst [vmem:[%s2560_s3 + $0x90] sm:$0xff] %v1129_v11  ;;  %v888_v15 = vadd.f32 %v887_v10, %v503_v12 }
 0x152   :  { %v507_v16 = vpop.f32.mrf.mxu0 }
 0x153   :  { %v892_v17 = vpop.f32.mrf.mxu1  ;;  %v1130_v18 = vmax.f32 %v888_v15, 0.0  ;;  %v508_v19 = vadd.f32 %v2114_v6, %v507_v16 }
 0x154   :  { %v509_v20 = vpop.f32.mrf.mxu0 }
 0x155   :  { %v894_v21 = vpop.f32.mrf.mxu1  ;;  %1194 = vst [vmem:[%s2560_s3 + $0x98] sm:$0xff] %v1130_v18  ;;  %v893_v22 = vadd.f32 %v892_v17, %v508_v19 }
 0x156   :  { %v512_v23 = vpop.f32.mrf.mxu0 }
 0x157   :  { %v897_v24 = vpop.f32.mrf.mxu1  ;;  %v1131_v25 = vmax.f32 %v893_v22, 0.0  ;;  %v513_v26 = vadd.f32 %v2114_v6, %v512_v23 }
 0x158   :  { %v514_v27 = vpop.f32.mrf.mxu0 }
 0x159   :  { %v899_v28 = vpop.f32.mrf.mxu1  ;;  %1195 = vst [vmem:[%s2560_s3 + $0xa0] sm:$0xff] %v1131_v25  ;;  %v898_v29 = vadd.f32 %v897_v24, %v513_v26 }
 0x15a   :  { %v517_v30 = vpop.f32.mrf.mxu0 }
 0x15b   :  { %v902_v31 = vpop.f32.mrf.mxu1  ;;  %v1132_v32 = vmax.f32 %v898_v29, 0.0  ;;  %v518_v33 = vadd.f32 %v2114_v6, %v517_v30 }
 0x15c   :  { %v519_v34 = vpop.f32.mrf.mxu0 }
 0x15d   :  { %v904_v35 = vpop.f32.mrf.mxu1  ;;  %1196 = vst [vmem:[%s2560_s3 + $0xa8] sm:$0xff] %v1132_v32  ;;  %v903_v36 = vadd.f32 %v902_v31, %v518_v33 }
 0x15e   :  { %v522_v37 = vpop.f32.mrf.mxu0 }
 0x15f   :  { %v907_v38 = vpop.f32.mrf.mxu1  ;;  %v1133_v39 = vmax.f32 %v903_v36, 0.0  ;;  %v523_v40 = vadd.f32 %v2114_v6, %v522_v37 }
 0x160   :  { %v524_v41 = vpop.f32.mrf.mxu0 }
 0x161   :  { %v909_v42 = vpop.f32.mrf.mxu1  ;;  %1197 = vst [vmem:[%s2560_s3 + $0xb0] sm:$0xff] %v1133_v39  ;;  %v908_v43 = vadd.f32 %v907_v38, %v523_v40 }
 0x162   :  { %v527_v44 = vpop.f32.mrf.mxu0 }
 0x163   :  { %v912_v45 = vpop.f32.mrf.mxu1  ;;  %v1134_v46 = vmax.f32 %v908_v43, 0.0  ;;  %v528_v47 = vadd.f32 %v2114_v6, %v527_v44 }
 0x164   :  { %v529_v48 = vpop.f32.mrf.mxu0 }
 0x165   :  { %v914_v49 = vpop.f32.mrf.mxu1  ;;  %1198 = vst [vmem:[%s2560_s3 + $0xb8] sm:$0xff] %v1134_v46  ;;  %v913_v50 = vadd.f32 %v912_v45, %v528_v47 }
 0x166   :  { %v532_v51 = vpop.f32.mrf.mxu0 }
 0x167   :  { %v917_v52 = vpop.f32.mrf.mxu1  ;;  %v1135_v53 = vmax.f32 %v913_v50, 0.0  ;;  %v533_v54 = vadd.f32 %v2114_v6, %v532_v51 }
 0x168   :  { %v534_v55 = vpop.f32.mrf.mxu0 }
 0x169   :  { %v919_v56 = vpop.f32.mrf.mxu1  ;;  %1199 = vst [vmem:[%s2560_s3 + $0xc0] sm:$0xff] %v1135_v53  ;;  %v918_v57 = vadd.f32 %v917_v52, %v533_v54 }
 0x16a   :  { %v537_v58 = vpop.f32.mrf.mxu0 }
 0x16b   :  { %v922_v59 = vpop.f32.mrf.mxu1  ;;  %v1136_v60 = vmax.f32 %v918_v57, 0.0  ;;  %v538_v61 = vadd.f32 %v2114_v6, %v537_v58 }
 0x16c   :  { %v539_v62 = vpop.f32.mrf.mxu0 }
 0x16d   :  { %v924_v63 = vpop.f32.mrf.mxu1  ;;  %1200 = vst [vmem:[%s2560_s3 + $0xc8] sm:$0xff] %v1136_v60  ;;  %v923_v1 = vadd.f32 %v922_v59, %v538_v61 }
 0x16e   :  { %v542_v2 = vpop.f32.mrf.mxu0 }
 0x16f   :  { %v927_v3 = vpop.f32.mrf.mxu1  ;;  %v1137_v4 = vmax.f32 %v923_v1, 0.0  ;;  %v543_v5 = vadd.f32 %v2114_v6, %v542_v2 }
 0x170   :  { %v544_v7 = vpop.f32.mrf.mxu0 }
 0x171   :  { %v929_v0 = vpop.f32.mrf.mxu1  ;;  %1201 = vst [vmem:[%s2560_s3 + $0xd0] sm:$0xff] %v1137_v4  ;;  %v928_v8 = vadd.f32 %v927_v3, %v543_v5 }
 0x172   :  { %v547_v9 = vpop.f32.mrf.mxu0 }
 0x173   :  { %v932_v10 = vpop.f32.mrf.mxu1  ;;  %v1138_v11 = vmax.f32 %v928_v8, 0.0  ;;  %v548_v12 = vadd.f32 %v2114_v6, %v547_v9 }
 0x174   :  { %v549_v13 = vpop.f32.mrf.mxu0 }
 0x175   :  { %v934_v14 = vpop.f32.mrf.mxu1  ;;  %1202 = vst [vmem:[%s2560_s3 + $0xd8] sm:$0xff] %v1138_v11  ;;  %v933_v15 = vadd.f32 %v932_v10, %v548_v12 }
 0x176   :  { %v552_v16 = vpop.f32.mrf.mxu0 }
 0x177   :  { %v937_v17 = vpop.f32.mrf.mxu1  ;;  %v1139_v18 = vmax.f32 %v933_v15, 0.0  ;;  %v553_v19 = vadd.f32 %v2114_v6, %v552_v16 }
 0x178   :  { %v554_v20 = vpop.f32.mrf.mxu0 }
 0x179   :  { %v939_v21 = vpop.f32.mrf.mxu1  ;;  %1203 = vst [vmem:[%s2560_s3 + $0xe0] sm:$0xff] %v1139_v18  ;;  %v938_v22 = vadd.f32 %v937_v17, %v553_v19 }
 0x17a   :  { %v557_v23 = vpop.f32.mrf.mxu0 }
 0x17b   :  { %v942_v24 = vpop.f32.mrf.mxu1  ;;  %v1140_v25 = vmax.f32 %v938_v22, 0.0  ;;  %v558_v26 = vadd.f32 %v2114_v6, %v557_v23 }
 0x17c   :  { %v559_v27 = vpop.f32.mrf.mxu0 }
 0x17d   :  { %v944_v28 = vpop.f32.mrf.mxu1  ;;  %1204 = vst [vmem:[%s2560_s3 + $0xe8] sm:$0xff] %v1140_v25  ;;  %v943_v29 = vadd.f32 %v942_v24, %v558_v26 }
 0x17e   :  { %v562_v30 = vpop.f32.mrf.mxu0 }
 0x17f   :  { %v947_v31 = vpop.f32.mrf.mxu1  ;;  %v1141_v32 = vmax.f32 %v943_v29, 0.0  ;;  %v563_v33 = vadd.f32 %v2114_v6, %v562_v30 }
 0x180   :  { %v564_v34 = vpop.f32.mrf.mxu0 }
 0x181   :  { %v949_v35 = vpop.f32.mrf.mxu1  ;;  %1205 = vst [vmem:[%s2560_s3 + $0xf0] sm:$0xff] %v1141_v32  ;;  %v948_v36 = vadd.f32 %v947_v31, %v563_v33 }
 0x182   :  { %v567_v37 = vpop.f32.mrf.mxu0 }
 0x183   :  { %v952_v38 = vpop.f32.mrf.mxu1  ;;  %v1142_v39 = vmax.f32 %v948_v36, 0.0  ;;  %v568_v40 = vadd.f32 %v2114_v6, %v567_v37 }
 0x184   :  { %v569_v41 = vpop.f32.mrf.mxu0 }
 0x185   :  { %v954_v42 = vpop.f32.mrf.mxu1  ;;  %1206 = vst [vmem:[%s2560_s3 + $0xf8] sm:$0xff] %v1142_v39  ;;  %v953_v43 = vadd.f32 %v952_v38, %v568_v40 }
 0x186   :  { %v572_v44 = vpop.f32.mrf.mxu0 }
 0x187   :  { %v957_v45 = vpop.f32.mrf.mxu1  ;;  %v1143_v46 = vmax.f32 %v953_v43, 0.0  ;;  %v573_v47 = vadd.f32 %v2114_v6, %v572_v44 }
 0x188   :  { %v574_v48 = vpop.f32.mrf.mxu0 }
 0x189   :  { %v959_v49 = vpop.f32.mrf.mxu1  ;;  %1207 = vst [vmem:[%s2560_s3 + $0x100] sm:$0xff] %v1143_v46  ;;  %v958_v50 = vadd.f32 %v957_v45, %v573_v47 }
 0x18a   :  { %v577_v51 = vpop.f32.mrf.mxu0 }
 0x18b   :  { %v962_v52 = vpop.f32.mrf.mxu1  ;;  %v1144_v53 = vmax.f32 %v958_v50, 0.0  ;;  %v578_v54 = vadd.f32 %v2114_v6, %v577_v51 }
 0x18c   :  { %v579_v55 = vpop.f32.mrf.mxu0 }
 0x18d   :  { %v964_v56 = vpop.f32.mrf.mxu1  ;;  %1208 = vst [vmem:[%s2560_s3 + $0x108] sm:$0xff] %v1144_v53  ;;  %v963_v57 = vadd.f32 %v962_v52, %v578_v54 }
 0x18e   :  { %v582_v58 = vpop.f32.mrf.mxu0 }
 0x18f   :  { %v967_v59 = vpop.f32.mrf.mxu1  ;;  %v1145_v60 = vmax.f32 %v963_v57, 0.0  ;;  %v583_v61 = vadd.f32 %v2114_v6, %v582_v58 }
 0x190   :  { %v584_v62 = vpop.f32.mrf.mxu0 }
 0x191   :  { %v969_v63 = vpop.f32.mrf.mxu1  ;;  %1209 = vst [vmem:[%s2560_s3 + $0x110] sm:$0xff] %v1145_v60  ;;  %v968_v1 = vadd.f32 %v967_v59, %v583_v61 }
 0x192   :  { %v587_v2 = vpop.f32.mrf.mxu0 }
 0x193   :  { %v972_v3 = vpop.f32.mrf.mxu1  ;;  %v1146_v4 = vmax.f32 %v968_v1, 0.0  ;;  %v588_v5 = vadd.f32 %v2114_v6, %v587_v2 }
 0x194   :  { %v589_v7 = vpop.f32.mrf.mxu0 }
 0x195   :  { %v974_v0 = vpop.f32.mrf.mxu1  ;;  %1210 = vst [vmem:[%s2560_s3 + $0x118] sm:$0xff] %v1146_v4  ;;  %v973_v8 = vadd.f32 %v972_v3, %v588_v5 }
 0x196   :  { %v592_v9 = vpop.f32.mrf.mxu0 }
 0x197   :  { %v977_v10 = vpop.f32.mrf.mxu1  ;;  %v1147_v11 = vmax.f32 %v973_v8, 0.0  ;;  %v593_v12 = vadd.f32 %v2114_v6, %v592_v9 }
 0x198   :  { %v594_v13 = vpop.f32.mrf.mxu0 }
 0x199   :  { %v979_v14 = vpop.f32.mrf.mxu1  ;;  %1211 = vst [vmem:[%s2560_s3 + $0x120] sm:$0xff] %v1147_v11  ;;  %v978_v15 = vadd.f32 %v977_v10, %v593_v12 }
 0x19a   :  { %v597_v16 = vpop.f32.mrf.mxu0 }
 0x19b   :  { %v982_v17 = vpop.f32.mrf.mxu1  ;;  %v1148_v18 = vmax.f32 %v978_v15, 0.0  ;;  %v598_v19 = vadd.f32 %v2114_v6, %v597_v16 }
 0x19c   :  { %v599_v20 = vpop.f32.mrf.mxu0 }
 0x19d   :  { %v984_v21 = vpop.f32.mrf.mxu1  ;;  %1212 = vst [vmem:[%s2560_s3 + $0x128] sm:$0xff] %v1148_v18  ;;  %v983_v22 = vadd.f32 %v982_v17, %v598_v19 }
 0x19e   :  { %v602_v23 = vpop.f32.mrf.mxu0 }
 0x19f   :  { %v987_v24 = vpop.f32.mrf.mxu1  ;;  %v1149_v25 = vmax.f32 %v983_v22, 0.0  ;;  %v603_v26 = vadd.f32 %v2114_v6, %v602_v23 }
 0x1a0   :  { %v604_v27 = vpop.f32.mrf.mxu0 }
 0x1a1   :  { %v989_v28 = vpop.f32.mrf.mxu1  ;;  %1213 = vst [vmem:[%s2560_s3 + $0x130] sm:$0xff] %v1149_v25  ;;  %v988_v29 = vadd.f32 %v987_v24, %v603_v26 }
 0x1a2   :  { %v607_v30 = vpop.f32.mrf.mxu0 }
 0x1a3   :  { %v992_v31 = vpop.f32.mrf.mxu1  ;;  %v1150_v32 = vmax.f32 %v988_v29, 0.0  ;;  %v608_v33 = vadd.f32 %v2114_v6, %v607_v30 }
 0x1a4   :  { %v609_v34 = vpop.f32.mrf.mxu0 }
 0x1a5   :  { %v994_v35 = vpop.f32.mrf.mxu1  ;;  %1214 = vst [vmem:[%s2560_s3 + $0x138] sm:$0xff] %v1150_v32  ;;  %v993_v36 = vadd.f32 %v992_v31, %v608_v33  ;;  %v2492_v33 = vld [vmem:[%s2559_s2] ss:$0 sm:$0xff] }
 0x1a6   :  { %v612_v37 = vpop.f32.mrf.mxu0 }
 0x1a7   :  { %v997_v38 = vpop.f32.mrf.mxu1  ;;  %v1151_v39 = vmax.f32 %v993_v36, 0.0  ;;  %v613_v40 = vadd.f32 %v2114_v6, %v612_v37 }
 0x1a8   :  { %v614_v41 = vpop.f32.mrf.mxu0 }
 0x1a9   :  { %v999_v42 = vpop.f32.mrf.mxu1  ;;  %1215 = vst [vmem:[%s2560_s3 + $0x140] sm:$0xff] %v1151_v39  ;;  %v998_v43 = vadd.f32 %v997_v38, %v613_v40 }
 0x1aa   :  { %v617_v44 = vpop.f32.mrf.mxu0 }
 0x1ab   :  { %v1002_v45 = vpop.f32.mrf.mxu1  ;;  %v1152_v46 = vmax.f32 %v998_v43, 0.0  ;;  %v618_v47 = vadd.f32 %v2114_v6, %v617_v44 }
 0x1ac   :  { %v619_v48 = vpop.f32.mrf.mxu0 }
 0x1ad   :  { %v1004_v49 = vpop.f32.mrf.mxu1  ;;  %1216 = vst [vmem:[%s2560_s3 + $0x148] sm:$0xff] %v1152_v46  ;;  %v1003_v50 = vadd.f32 %v1002_v45, %v618_v47 }
 0x1ae   :  { %v622_v51 = vpop.f32.mrf.mxu0 }
 0x1af   :  { %v1007_v52 = vpop.f32.mrf.mxu1  ;;  %v1153_v53 = vmax.f32 %v1003_v50, 0.0  ;;  %v623_v54 = vadd.f32 %v2114_v6, %v622_v51 }
 0x1b0   :  { %v624_v55 = vpop.f32.mrf.mxu0 }
 0x1b1   :  { %v1009_v56 = vpop.f32.mrf.mxu1  ;;  %1217 = vst [vmem:[%s2560_s3 + $0x150] sm:$0xff] %v1153_v53  ;;  %v1008_v57 = vadd.f32 %v1007_v52, %v623_v54 }
 0x1b2   :  { %v627_v58 = vpop.f32.mrf.mxu0 }
 0x1b3   :  { %v1012_v59 = vpop.f32.mrf.mxu1  ;;  %v1154_v60 = vmax.f32 %v1008_v57, 0.0  ;;  %v628_v61 = vadd.f32 %v2114_v6, %v627_v58 }
 0x1b4   :  { %v629_v62 = vpop.f32.mrf.mxu0 }
 0x1b5   :  { %v1014_v63 = vpop.f32.mrf.mxu1  ;;  %1218 = vst [vmem:[%s2560_s3 + $0x158] sm:$0xff] %v1154_v60  ;;  %v1013_v1 = vadd.f32 %v1012_v59, %v628_v61 }
 0x1b6   :  { %v632_v2 = vpop.f32.mrf.mxu0 }
 0x1b7   :  { %v1017_v3 = vpop.f32.mrf.mxu1  ;;  %v1155_v4 = vmax.f32 %v1013_v1, 0.0  ;;  %v633_v5 = vadd.f32 %v2114_v6, %v632_v2 }
 0x1b8   :  { %v634_v7 = vpop.f32.mrf.mxu0 }
 0x1b9   :  { %v1019_v0 = vpop.f32.mrf.mxu1  ;;  %1219 = vst [vmem:[%s2560_s3 + $0x160] sm:$0xff] %v1155_v4  ;;  %v1018_v8 = vadd.f32 %v1017_v3, %v633_v5 }
 0x1ba   :  { %v637_v9 = vpop.f32.mrf.mxu0 }
 0x1bb   :  { %v1022_v10 = vpop.f32.mrf.mxu1  ;;  %v1156_v11 = vmax.f32 %v1018_v8, 0.0  ;;  %v638_v12 = vadd.f32 %v2114_v6, %v637_v9 }
 0x1bc   :  { %v639_v13 = vpop.f32.mrf.mxu0 }
 0x1bd   :  { %v1024_v14 = vpop.f32.mrf.mxu1  ;;  %1220 = vst [vmem:[%s2560_s3 + $0x168] sm:$0xff] %v1156_v11  ;;  %v1023_v15 = vadd.f32 %v1022_v10, %v638_v12 }
 0x1be   :  { %v642_v16 = vpop.f32.mrf.mxu0 }
 0x1bf   :  { %v1027_v17 = vpop.f32.mrf.mxu1  ;;  %v1157_v18 = vmax.f32 %v1023_v15, 0.0  ;;  %v643_v19 = vadd.f32 %v2114_v6, %v642_v16 }
 0x1c0   :  { %v644_v20 = vpop.f32.mrf.mxu0 }
 0x1c1   :  { %v1029_v21 = vpop.f32.mrf.mxu1  ;;  %1221 = vst [vmem:[%s2560_s3 + $0x170] sm:$0xff] %v1157_v18  ;;  %v1028_v22 = vadd.f32 %v1027_v17, %v643_v19 }
 0x1c2   :  { %v647_v23 = vpop.f32.mrf.mxu0 }
 0x1c3   :  { %v1032_v24 = vpop.f32.mrf.mxu1  ;;  %v1158_v25 = vmax.f32 %v1028_v22, 0.0  ;;  %v648_v26 = vadd.f32 %v2114_v6, %v647_v23 }
 0x1c4   :  { %v649_v27 = vpop.f32.mrf.mxu0 }
 0x1c5   :  { %v1034_v28 = vpop.f32.mrf.mxu1  ;;  %1222 = vst [vmem:[%s2560_s3 + $0x178] sm:$0xff] %v1158_v25  ;;  %v1033_v29 = vadd.f32 %v1032_v24, %v648_v26 }
 0x1c6   :  { %v652_v30 = vpop.f32.mrf.mxu0 }
 0x1c7   :  { %v1037_v31 = vpop.f32.mrf.mxu1  ;;  %v1159_v32 = vmax.f32 %v1033_v29, 0.0  ;;  %v653_v34 = vadd.f32 %v2492_v33, %v652_v30 }
 0x1c8   :  { %v654_v35 = vpop.f32.mrf.mxu0 }
 0x1c9   :  { %v1039_v36 = vpop.f32.mrf.mxu1  ;;  %1223 = vst [vmem:[%s2560_s3 + $0x180] sm:$0xff] %v1159_v32  ;;  %v1038_v6 = vadd.f32 %v1037_v31, %v653_v34 }
 0x1ca   :  { %v657_v37 = vpop.f32.mrf.mxu0 }
 0x1cb   :  { %v1042_v38 = vpop.f32.mrf.mxu1  ;;  %v1160_v39 = vmax.f32 %v1038_v6, 0.0  ;;  %v658_v40 = vadd.f32 %v2492_v33, %v657_v37 }
 0x1cc   :  { %v659_v41 = vpop.f32.mrf.mxu0 }
 0x1cd   :  { %v1044_v42 = vpop.f32.mrf.mxu1  ;;  %1224 = vst [vmem:[%s2560_s3 + $0x188] sm:$0xff] %v1160_v39  ;;  %v1043_v43 = vadd.f32 %v1042_v38, %v658_v40 }
 0x1ce   :  { %v662_v44 = vpop.f32.mrf.mxu0 }
 0x1cf   :  { %v1047_v45 = vpop.f32.mrf.mxu1  ;;  %v1161_v46 = vmax.f32 %v1043_v43, 0.0  ;;  %v663_v47 = vadd.f32 %v2492_v33, %v662_v44 }
 0x1d0   :  { %v664_v48 = vpop.f32.mrf.mxu0 }
 0x1d1   :  { %v1049_v49 = vpop.f32.mrf.mxu1  ;;  %1225 = vst [vmem:[%s2560_s3 + $0x190] sm:$0xff] %v1161_v46  ;;  %v1048_v50 = vadd.f32 %v1047_v45, %v663_v47 }
 0x1d2   :  { %v667_v51 = vpop.f32.mrf.mxu0 }
 0x1d3   :  { %v1052_v52 = vpop.f32.mrf.mxu1  ;;  %v1162_v53 = vmax.f32 %v1048_v50, 0.0  ;;  %v668_v54 = vadd.f32 %v2492_v33, %v667_v51 }
 0x1d4   :  { %v669_v55 = vpop.f32.mrf.mxu0 }
 0x1d5   :  { %v1054_v56 = vpop.f32.mrf.mxu1  ;;  %1226 = vst [vmem:[%s2560_s3 + $0x198] sm:$0xff] %v1162_v53  ;;  %v1053_v57 = vadd.f32 %v1052_v52, %v668_v54 }
 0x1d6   :  { %v672_v58 = vpop.f32.mrf.mxu0 }
 0x1d7   :  { %v1057_v59 = vpop.f32.mrf.mxu1  ;;  %v1163_v60 = vmax.f32 %v1053_v57, 0.0  ;;  %v673_v61 = vadd.f32 %v2492_v33, %v672_v58 }
 0x1d8   :  { %v674_v62 = vpop.f32.mrf.mxu0 }
 0x1d9   :  { %v1059_v63 = vpop.f32.mrf.mxu1  ;;  %1227 = vst [vmem:[%s2560_s3 + $0x1a0] sm:$0xff] %v1163_v60  ;;  %v1058_v1 = vadd.f32 %v1057_v59, %v673_v61 }
 0x1da   :  { %v677_v2 = vpop.f32.mrf.mxu0 }
 0x1db   :  { %v1062_v3 = vpop.f32.mrf.mxu1  ;;  %v1164_v4 = vmax.f32 %v1058_v1, 0.0  ;;  %v678_v5 = vadd.f32 %v2492_v33, %v677_v2 }
 0x1dc   :  { %v679_v7 = vpop.f32.mrf.mxu0 }
 0x1dd   :  { %v1064_v0 = vpop.f32.mrf.mxu1  ;;  %1228 = vst [vmem:[%s2560_s3 + $0x1a8] sm:$0xff] %v1164_v4  ;;  %v1063_v8 = vadd.f32 %v1062_v3, %v678_v5 }
 0x1de   :  { %v682_v9 = vpop.f32.mrf.mxu0 }
 0x1df   :  { %v1067_v10 = vpop.f32.mrf.mxu1  ;;  %v1165_v11 = vmax.f32 %v1063_v8, 0.0  ;;  %v683_v12 = vadd.f32 %v2492_v33, %v682_v9 }
 0x1e0   :  { %v684_v13 = vpop.f32.mrf.mxu0 }
 0x1e1   :  { %v1069_v14 = vpop.f32.mrf.mxu1  ;;  %1229 = vst [vmem:[%s2560_s3 + $0x1b0] sm:$0xff] %v1165_v11  ;;  %v1068_v15 = vadd.f32 %v1067_v10, %v683_v12 }
 0x1e2   :  { %v687_v16 = vpop.f32.mrf.mxu0 }
 0x1e3   :  { %v1072_v17 = vpop.f32.mrf.mxu1  ;;  %v1166_v18 = vmax.f32 %v1068_v15, 0.0  ;;  %v688_v19 = vadd.f32 %v2492_v33, %v687_v16 }
 0x1e4   :  { %v689_v20 = vpop.f32.mrf.mxu0 }
 0x1e5   :  { %v1074_v21 = vpop.f32.mrf.mxu1  ;;  %1230 = vst [vmem:[%s2560_s3 + $0x1b8] sm:$0xff] %v1166_v18  ;;  %v1073_v22 = vadd.f32 %v1072_v17, %v688_v19 }
 0x1e6   :  { %v692_v23 = vpop.f32.mrf.mxu0 }
 0x1e7   :  { %v1077_v24 = vpop.f32.mrf.mxu1  ;;  %v1167_v25 = vmax.f32 %v1073_v22, 0.0  ;;  %v693_v26 = vadd.f32 %v2492_v33, %v692_v23 }
 0x1e8   :  { %v694_v27 = vpop.f32.mrf.mxu0 }
 0x1e9   :  { %v1079_v28 = vpop.f32.mrf.mxu1  ;;  %1231 = vst [vmem:[%s2560_s3 + $0x1c0] sm:$0xff] %v1167_v25  ;;  %v1078_v29 = vadd.f32 %v1077_v24, %v693_v26 }
 0x1ea   :  { %v697_v30 = vpop.f32.mrf.mxu0 }
 0x1eb   :  { %v1082_v31 = vpop.f32.mrf.mxu1  ;;  %v1168_v32 = vmax.f32 %v1078_v29, 0.0  ;;  %v698_v34 = vadd.f32 %v2492_v33, %v697_v30 }
 0x1ec   :  { %v699_v35 = vpop.f32.mrf.mxu0 }
 0x1ed   :  { %v1084_v36 = vpop.f32.mrf.mxu1  ;;  %1232 = vst [vmem:[%s2560_s3 + $0x1c8] sm:$0xff] %v1168_v32  ;;  %v1083_v6 = vadd.f32 %v1082_v31, %v698_v34 }
 0x1ee   :  { %v702_v37 = vpop.f32.mrf.mxu0 }
 0x1ef   :  { %v1087_v38 = vpop.f32.mrf.mxu1  ;;  %v1169_v39 = vmax.f32 %v1083_v6, 0.0  ;;  %v703_v40 = vadd.f32 %v2492_v33, %v702_v37 }
 0x1f0   :  { %v704_v41 = vpop.f32.mrf.mxu0 }
 0x1f1   :  { %v1089_v42 = vpop.f32.mrf.mxu1  ;;  %1233 = vst [vmem:[%s2560_s3 + $0x1d0] sm:$0xff] %v1169_v39  ;;  %v1088_v43 = vadd.f32 %v1087_v38, %v703_v40 }
 0x1f2   :  { %v707_v44 = vpop.f32.mrf.mxu0 }
 0x1f3   :  { %v1092_v45 = vpop.f32.mrf.mxu1  ;;  %v1170_v46 = vmax.f32 %v1088_v43, 0.0  ;;  %v708_v47 = vadd.f32 %v2492_v33, %v707_v44 }
 0x1f4   :  { %v709_v48 = vpop.f32.mrf.mxu0 }
 0x1f5   :  { %v1094_v49 = vpop.f32.mrf.mxu1  ;;  %1234 = vst [vmem:[%s2560_s3 + $0x1d8] sm:$0xff] %v1170_v46  ;;  %v1093_v50 = vadd.f32 %v1092_v45, %v708_v47 }
 0x1f6   :  { %v712_v51 = vpop.f32.mrf.mxu0 }
 0x1f7   :  { %v1097_v52 = vpop.f32.mrf.mxu1  ;;  %v1171_v53 = vmax.f32 %v1093_v50, 0.0  ;;  %v713_v54 = vadd.f32 %v2492_v33, %v712_v51 }
 0x1f8   :  { %v714_v55 = vpop.f32.mrf.mxu0 }
 0x1f9   :  { %v1099_v56 = vpop.f32.mrf.mxu1  ;;  %1235 = vst [vmem:[%s2560_s3 + $0x1e0] sm:$0xff] %v1171_v53  ;;  %v1098_v57 = vadd.f32 %v1097_v52, %v713_v54 }
 0x1fa   :  { %v717_v58 = vpop.f32.mrf.mxu0 }
 0x1fb   :  { %v1102_v59 = vpop.f32.mrf.mxu1  ;;  %v1172_v60 = vmax.f32 %v1098_v57, 0.0  ;;  %v718_v61 = vadd.f32 %v2492_v33, %v717_v58 }
 0x1fc   :  { %v719_v62 = vpop.f32.mrf.mxu0 }
 0x1fd   :  { %v1104_v63 = vpop.f32.mrf.mxu1  ;;  %1236 = vst [vmem:[%s2560_s3 + $0x1e8] sm:$0xff] %v1172_v60  ;;  %v1103_v1 = vadd.f32 %v1102_v59, %v718_v61 }
 0x1fe   :  { %v722_v2 = vpop.f32.mrf.mxu0 }
 0x1ff   :  { %v1107_v3 = vpop.f32.mrf.mxu1  ;;  %v1173_v4 = vmax.f32 %v1103_v1, 0.0  ;;  %v723_v5 = vadd.f32 %v2492_v33, %v722_v2 }
 0x200   :  { %v724_v7 = vpop.f32.mrf.mxu0 }
 0x201   :  { %v1109_v0 = vpop.f32.mrf.mxu1  ;;  %1237 = vst [vmem:[%s2560_s3 + $0x1f0] sm:$0xff] %v1173_v4  ;;  %v1108_v8 = vadd.f32 %v1107_v3, %v723_v5 }
 0x203   :  { %v1174_v9 = vmax.f32 %v1108_v8, 0.0 }
 0x205   :  { %1238 = vst [vmem:[%s2560_s3 + $0x1f8] sm:$0xff] %v1174_v9 }

// kernel: _lambda_.12
= control target key start
LH: loop header
LB: loop body
LE: loop exit
PB: predicated region body
PF: predicated region fallthrough
CT: control target
= control target key end

     0   :  { %s1316_s1 = inlined_call_operand.vmem [shape: f32[128,128], index: 1, kind: input, shape index: {}]   ;;  %s1317_s0 = inlined_call_operand.vmem [shape: f32[512,128], index: 0, kind: input, shape index: {}]   ;;  %s1318_s2 = inlined_call_operand.vmem [shape: f32[1,128], index: 2, kind: input, shape index: {}]   ;;  %s1319_s3 = inlined_call_operand.vmem [shape: f32[512,128], index: 3, kind: output, shape index: {}]  }
   0x1   :  { %v93_v0 = vld [vmem:[%s1316_s1 + $0x78] sm:$0xff]  ;;  %v92_v1 = vld [vmem:[%s1316_s1 + $0x70] sm:$0xff]  ;;  %v91_v2 = vld [vmem:[%s1316_s1 + $0x68] sm:$0xff] }
   0x2   :  { %635 = vmatprep.subr.mxu0 %v93_v0  ;;  %763 = vmatprep.subr.mxu1 %v93_v0  ;;  %v90_v3 = vld [vmem:[%s1316_s1 + $0x60] sm:$0xff]  ;;  %v89_v4 = vld [vmem:[%s1316_s1 + $0x58] sm:$0xff]  ;;  %v88_v5 = vld [vmem:[%s1316_s1 + $0x50] sm:$0xff] }
   0x3   :  { %636 = vmatpush3.msra.mxu0 %v93_v0  ;;  %779 = vmatpush3.msra.mxu1 %v93_v0  ;;  %v87_v6 = vld [vmem:[%s1316_s1 + $0x48] sm:$0xff]  ;;  %v86_v7 = vld [vmem:[%s1316_s1 + $0x40] sm:$0xff]  ;;  %v85_v8 = vld [vmem:[%s1316_s1 + $0x38] sm:$0xff] }
   0x4   :  { %637 = vmatprep.subr.mxu0 %v92_v1  ;;  %764 = vmatprep.subr.mxu1 %v92_v1  ;;  %v84_v9 = vld [vmem:[%s1316_s1 + $0x30] sm:$0xff]  ;;  %v83_v10 = vld [vmem:[%s1316_s1 + $0x28] sm:$0xff]  ;;  %v82_v11 = vld [vmem:[%s1316_s1 + $0x20] sm:$0xff] }
   0x5   :  { %638 = vmatpush3.msra.mxu0 %v92_v1  ;;  %780 = vmatpush3.msra.mxu1 %v92_v1  ;;  %v81_v12 = vld [vmem:[%s1316_s1 + $0x18] sm:$0xff]  ;;  %v80_v13 = vld [vmem:[%s1316_s1 + $0x10] sm:$0xff]  ;;  %v79_v14 = vld [vmem:[%s1316_s1 + $0x8] sm:$0xff] }
   0x6   :  { %639 = vmatprep.subr.mxu0 %v91_v2  ;;  %765 = vmatprep.subr.mxu1 %v91_v2  ;;  %v78_v15 = vld [vmem:[%s1316_s1] sm:$0xff]  ;;  %v15_v18 = vld [vmem:[%s1317_s0 + $0x8] sm:$0xff]  ;;  %v16_v20 = vld [vmem:[%s1317_s0 + $0x10] sm:$0xff] }
   0x7   :  { %640 = vmatpush3.msra.mxu0 %v91_v2  ;;  %781 = vmatpush3.msra.mxu1 %v91_v2  ;;  %v14_v16 = vld [vmem:[%s1317_s0] sm:$0xff]  ;;  %v47_v19 = vld [vmem:[%s1317_s0 + $0x108] sm:$0xff]  ;;  %v48_v21 = vld [vmem:[%s1317_s0 + $0x110] sm:$0xff] }
   0x8   :  { %641 = vmatprep.subr.mxu0 %v90_v3  ;;  %766 = vmatprep.subr.mxu1 %v90_v3  ;;  %v46_v17 = vld [vmem:[%s1317_s0 + $0x100] sm:$0xff]  ;;  %v17_v22 = vld [vmem:[%s1317_s0 + $0x18] sm:$0xff]  ;;  %v19_v26 = vld [vmem:[%s1317_s0 + $0x28] sm:$0xff] }
   0x9   :  { %642 = vmatpush3.msra.mxu0 %v90_v3  ;;  %782 = vmatpush3.msra.mxu1 %v90_v3  ;;  %v49_v23 = vld [vmem:[%s1317_s0 + $0x118] sm:$0xff]  ;;  %v18_v24 = vld [vmem:[%s1317_s0 + $0x20] sm:$0xff]  ;;  %v51_v27 = vld [vmem:[%s1317_s0 + $0x128] sm:$0xff] }
   0xa   :  { %643 = vmatprep.subr.mxu0 %v89_v4  ;;  %767 = vmatprep.subr.mxu1 %v89_v4  ;;  %v50_v25 = vld [vmem:[%s1317_s0 + $0x120] sm:$0xff]  ;;  %v20_v28 = vld [vmem:[%s1317_s0 + $0x30] sm:$0xff]  ;;  %v21_v30 = vld [vmem:[%s1317_s0 + $0x38] sm:$0xff] }
   0xb   :  { %644 = vmatpush3.msra.mxu0 %v89_v4  ;;  %783 = vmatpush3.msra.mxu1 %v89_v4  ;;  %v52_v29 = vld [vmem:[%s1317_s0 + $0x130] sm:$0xff]  ;;  %v53_v31 = vld [vmem:[%s1317_s0 + $0x138] sm:$0xff]  ;;  %v22_v32 = vld [vmem:[%s1317_s0 + $0x40] sm:$0xff] }
   0xc   :  { %645 = vmatprep.subr.mxu0 %v88_v5  ;;  %768 = vmatprep.subr.mxu1 %v88_v5  ;;  %v54_v33 = vld [vmem:[%s1317_s0 + $0x140] sm:$0xff]  ;;  %v23_v34 = vld [vmem:[%s1317_s0 + $0x48] sm:$0xff]  ;;  %v24_v36 = vld [vmem:[%s1317_s0 + $0x50] sm:$0xff] }
   0xd   :  { %646 = vmatpush3.msra.mxu0 %v88_v5  ;;  %784 = vmatpush3.msra.mxu1 %v88_v5  ;;  %v55_v35 = vld [vmem:[%s1317_s0 + $0x148] sm:$0xff]  ;;  %v56_v37 = vld [vmem:[%s1317_s0 + $0x150] sm:$0xff]  ;;  %v25_v38 = vld [vmem:[%s1317_s0 + $0x58] sm:$0xff] }
   0xe   :  { %647 = vmatprep.subr.mxu0 %v87_v6  ;;  %769 = vmatprep.subr.mxu1 %v87_v6  ;;  %v57_v39 = vld [vmem:[%s1317_s0 + $0x158] sm:$0xff]  ;;  %v26_v40 = vld [vmem:[%s1317_s0 + $0x60] sm:$0xff]  ;;  %v27_v42 = vld [vmem:[%s1317_s0 + $0x68] sm:$0xff] }
   0xf   :  { %648 = vmatpush3.msra.mxu0 %v87_v6  ;;  %785 = vmatpush3.msra.mxu1 %v87_v6  ;;  %v58_v41 = vld [vmem:[%s1317_s0 + $0x160] sm:$0xff]  ;;  %v59_v43 = vld [vmem:[%s1317_s0 + $0x168] sm:$0xff]  ;;  %v28_v44 = vld [vmem:[%s1317_s0 + $0x70] sm:$0xff] }
  0x10   :  { %649 = vmatprep.subr.mxu0 %v86_v7  ;;  %770 = vmatprep.subr.mxu1 %v86_v7  ;;  %v60_v45 = vld [vmem:[%s1317_s0 + $0x170] sm:$0xff]  ;;  %v29_v46 = vld [vmem:[%s1317_s0 + $0x78] sm:$0xff]  ;;  %v30_v48 = vld [vmem:[%s1317_s0 + $0x80] sm:$0xff] }
  0x11   :  { %650 = vmatpush3.msra.mxu0 %v86_v7  ;;  %786 = vmatpush3.msra.mxu1 %v86_v7  ;;  %v61_v47 = vld [vmem:[%s1317_s0 + $0x178] sm:$0xff]  ;;  %v62_v49 = vld [vmem:[%s1317_s0 + $0x180] sm:$0xff]  ;;  %v31_v50 = vld [vmem:[%s1317_s0 + $0x88] sm:$0xff] }
  0x12   :  { %651 = vmatprep.subr.mxu0 %v85_v8  ;;  %771 = vmatprep.subr.mxu1 %v85_v8  ;;  %v63_v51 = vld [vmem:[%s1317_s0 + $0x188] sm:$0xff]  ;;  %v32_v52 = vld [vmem:[%s1317_s0 + $0x90] sm:$0xff]  ;;  %v33_v54 = vld [vmem:[%s1317_s0 + $0x98] sm:$0xff] }
  0x13   :  { %652 = vmatpush3.msra.mxu0 %v85_v8  ;;  %787 = vmatpush3.msra.mxu1 %v85_v8  ;;  %v64_v53 = vld [vmem:[%s1317_s0 + $0x190] sm:$0xff]  ;;  %v65_v55 = vld [vmem:[%s1317_s0 + $0x198] sm:$0xff]  ;;  %v34_v56 = vld [vmem:[%s1317_s0 + $0xa0] sm:$0xff] }
  0x14   :  { %653 = vmatprep.subr.mxu0 %v84_v9  ;;  %772 = vmatprep.subr.mxu1 %v84_v9  ;;  %v66_v57 = vld [vmem:[%s1317_s0 + $0x1a0] sm:$0xff]  ;;  %v35_v58 = vld [vmem:[%s1317_s0 + $0xa8] sm:$0xff]  ;;  %v36_v60 = vld [vmem:[%s1317_s0 + $0xb0] sm:$0xff] }
  0x15   :  { %654 = vmatpush3.msra.mxu0 %v84_v9  ;;  %788 = vmatpush3.msra.mxu1 %v84_v9  ;;  %v67_v59 = vld [vmem:[%s1317_s0 + $0x1a8] sm:$0xff]  ;;  %v68_v61 = vld [vmem:[%s1317_s0 + $0x1b0] sm:$0xff]  ;;  %v37_v62 = vld [vmem:[%s1317_s0 + $0xb8] sm:$0xff] }
  0x16   :  { %655 = vmatprep.subr.mxu0 %v83_v10  ;;  %773 = vmatprep.subr.mxu1 %v83_v10  ;;  %v69_v63 = vld [vmem:[%s1317_s0 + $0x1b8] sm:$0xff]  ;;  %v38_v0 = vld [vmem:[%s1317_s0 + $0xc0] sm:$0xff]  ;;  %v39_v2 = vld [vmem:[%s1317_s0 + $0xc8] sm:$0xff] }
  0x17   :  { %656 = vmatpush3.msra.mxu0 %v83_v10  ;;  %789 = vmatpush3.msra.mxu1 %v83_v10  ;;  %v70_v1 = vld [vmem:[%s1317_s0 + $0x1c0] sm:$0xff]  ;;  %v71_v3 = vld [vmem:[%s1317_s0 + $0x1c8] sm:$0xff]  ;;  %v40_v4 = vld [vmem:[%s1317_s0 + $0xd0] sm:$0xff] }
  0x18   :  { %657 = vmatprep.subr.mxu0 %v82_v11  ;;  %774 = vmatprep.subr.mxu1 %v82_v11  ;;  %v72_v5 = vld [vmem:[%s1317_s0 + $0x1d0] sm:$0xff]  ;;  %v41_v6 = vld [vmem:[%s1317_s0 + $0xd8] sm:$0xff]  ;;  %v42_v8 = vld [vmem:[%s1317_s0 + $0xe0] sm:$0xff] }
  0x19   :  { %658 = vmatpush3.msra.mxu0 %v82_v11  ;;  %790 = vmatpush3.msra.mxu1 %v82_v11  ;;  %v73_v7 = vld [vmem:[%s1317_s0 + $0x1d8] sm:$0xff]  ;;  %v74_v9 = vld [vmem:[%s1317_s0 + $0x1e0] sm:$0xff]  ;;  %v43_v10 = vld [vmem:[%s1317_s0 + $0xe8] sm:$0xff] }
  0x1a   :  { %659 = vmatprep.subr.mxu0 %v81_v12  ;;  %775 = vmatprep.subr.mxu1 %v81_v12  ;;  %v75_v11 = vld [vmem:[%s1317_s0 + $0x1e8] sm:$0xff] }
  0x1b   :  { %660 = vmatpush3.msra.mxu0 %v81_v12  ;;  %791 = vmatpush3.msra.mxu1 %v81_v12  ;;  %v44_v12 = vld [vmem:[%s1317_s0 + $0xf0] sm:$0xff] }
  0x1c   :  { %661 = vmatprep.subr.mxu0 %v80_v13  ;;  %776 = vmatprep.subr.mxu1 %v80_v13 }
  0x1d   :  { %662 = vmatpush3.msra.mxu0 %v80_v13  ;;  %792 = vmatpush3.msra.mxu1 %v80_v13  ;;  %v76_v13 = vld [vmem:[%s1317_s0 + $0x1f0] sm:$0xff] }
  0x1e   :  { %663 = vmatprep.subr.mxu0 %v79_v14  ;;  %777 = vmatprep.subr.mxu1 %v79_v14 }
  0x1f   :  { %664 = vmatpush3.msra.mxu0 %v79_v14  ;;  %793 = vmatpush3.msra.mxu1 %v79_v14  ;;  %v45_v14 = vld [vmem:[%s1317_s0 + $0xf8] sm:$0xff] }
  0x20   :  { %665 = vmatprep.subr.mxu0 %v78_v15  ;;  %778 = vmatprep.subr.mxu1 %v78_v15 }
  0x21   :  { %666 = vmatpush3.msra.mxu0 %v78_v15  ;;  %794 = vmatpush3.msra.mxu1 %v78_v15  ;;  %v77_v15 = vld [vmem:[%s1317_s0 + $0x1f8] sm:$0xff] }
  0x22   :  { %667 = vmatprep.mubr.f32.mxu0 %v14_v16  ;;  %715 = vmatprep.mubr.f32.mxu1 %v46_v17  ;;  %v1058_v16 = vld [vmem:[%s1318_s2] ss:$0 sm:$0xff] }
  0x23   :  { %668 = vmatmul.mubr.f32.vlgmr.msra.gmra.mxu0 %v15_v18  ;;  %716 = vmatmul.mubr.f32.vlgmr.msra.gmra.mxu1 %v47_v19 }
  0x24   :  { %670 = vmatprep.mubr.f32.mxu0 %v16_v20  ;;  %718 = vmatprep.mubr.f32.mxu1 %v48_v21 }
  0x27   :  { %671 = vmatmul.mubr.f32.gmra.mxu0 %v17_v22  ;;  %719 = vmatmul.mubr.f32.gmra.mxu1 %v49_v23 }
  0x28   :  { %673 = vmatprep.mubr.f32.mxu0 %v18_v24  ;;  %721 = vmatprep.mubr.f32.mxu1 %v50_v25 }
  0x2b   :  { %674 = vmatmul.mubr.f32.gmra.mxu0 %v19_v26  ;;  %722 = vmatmul.mubr.f32.gmra.mxu1 %v51_v27 }
  0x2c   :  { %676 = vmatprep.mubr.f32.mxu0 %v20_v28  ;;  %724 = vmatprep.mubr.f32.mxu1 %v52_v29 }
  0x2f   :  { %677 = vmatmul.mubr.f32.gmra.mxu0 %v21_v30  ;;  %725 = vmatmul.mubr.f32.gmra.mxu1 %v53_v31 }
  0x30   :  { %679 = vmatprep.mubr.f32.mxu0 %v22_v32  ;;  %727 = vmatprep.mubr.f32.mxu1 %v54_v33 }
  0x33   :  { %680 = vmatmul.mubr.f32.gmra.mxu0 %v23_v34  ;;  %728 = vmatmul.mubr.f32.gmra.mxu1 %v55_v35 }
  0x34   :  { %682 = vmatprep.mubr.f32.mxu0 %v24_v36  ;;  %730 = vmatprep.mubr.f32.mxu1 %v56_v37 }
  0x37   :  { %683 = vmatmul.mubr.f32.gmra.mxu0 %v25_v38  ;;  %731 = vmatmul.mubr.f32.gmra.mxu1 %v57_v39 }
  0x38   :  { %685 = vmatprep.mubr.f32.mxu0 %v26_v40  ;;  %733 = vmatprep.mubr.f32.mxu1 %v58_v41 }
  0x3b   :  { %686 = vmatmul.mubr.f32.gmra.mxu0 %v27_v42  ;;  %734 = vmatmul.mubr.f32.gmra.mxu1 %v59_v43 }
  0x3c   :  { %688 = vmatprep.mubr.f32.mxu0 %v28_v44  ;;  %736 = vmatprep.mubr.f32.mxu1 %v60_v45 }
  0x3f   :  { %689 = vmatmul.mubr.f32.gmra.mxu0 %v29_v46  ;;  %737 = vmatmul.mubr.f32.gmra.mxu1 %v61_v47 }
  0x40   :  { %691 = vmatprep.mubr.f32.mxu0 %v30_v48  ;;  %739 = vmatprep.mubr.f32.mxu1 %v62_v49 }
  0x43   :  { %692 = vmatmul.mubr.f32.gmra.mxu0 %v31_v50  ;;  %740 = vmatmul.mubr.f32.gmra.mxu1 %v63_v51 }
  0x44   :  { %694 = vmatprep.mubr.f32.mxu0 %v32_v52  ;;  %742 = vmatprep.mubr.f32.mxu1 %v64_v53 }
  0x47   :  { %695 = vmatmul.mubr.f32.gmra.mxu0 %v33_v54  ;;  %743 = vmatmul.mubr.f32.gmra.mxu1 %v65_v55 }
  0x48   :  { %697 = vmatprep.mubr.f32.mxu0 %v34_v56  ;;  %745 = vmatprep.mubr.f32.mxu1 %v66_v57 }
  0x4b   :  { %698 = vmatmul.mubr.f32.gmra.mxu0 %v35_v58  ;;  %746 = vmatmul.mubr.f32.gmra.mxu1 %v67_v59 }
  0x4c   :  { %700 = vmatprep.mubr.f32.mxu0 %v36_v60  ;;  %748 = vmatprep.mubr.f32.mxu1 %v68_v61 }
  0x4f   :  { %701 = vmatmul.mubr.f32.gmra.mxu0 %v37_v62  ;;  %749 = vmatmul.mubr.f32.gmra.mxu1 %v69_v63 }
  0x50   :  { %703 = vmatprep.mubr.f32.mxu0 %v38_v0  ;;  %751 = vmatprep.mubr.f32.mxu1 %v70_v1 }
  0x53   :  { %704 = vmatmul.mubr.f32.gmra.mxu0 %v39_v2  ;;  %752 = vmatmul.mubr.f32.gmra.mxu1 %v71_v3 }
  0x54   :  { %706 = vmatprep.mubr.f32.mxu0 %v40_v4  ;;  %754 = vmatprep.mubr.f32.mxu1 %v72_v5 }
  0x57   :  { %707 = vmatmul.mubr.f32.gmra.mxu0 %v41_v6  ;;  %755 = vmatmul.mubr.f32.gmra.mxu1 %v73_v7 }
  0x58   :  { %709 = vmatprep.mubr.f32.mxu0 %v42_v8  ;;  %757 = vmatprep.mubr.f32.mxu1 %v74_v9 }
  0x5b   :  { %710 = vmatmul.mubr.f32.gmra.mxu0 %v43_v10  ;;  %758 = vmatmul.mubr.f32.gmra.mxu1 %v75_v11 }
  0x5c   :  { %712 = vmatprep.mubr.f32.mxu0 %v44_v12  ;;  %760 = vmatprep.mubr.f32.mxu1 %v76_v13 }
  0x5f   :  { %713 = vmatmul.mubr.f32.gmra.mxu0 %v45_v14  ;;  %761 = vmatmul.mubr.f32.gmra.mxu1 %v77_v15 }
  0xe3   :  { %v669_v17 = vpop.f32.mrf.mxu0  ;;  %v717_v18 = vpop.f32.mrf.mxu1 }
  0xe4   :  { %v173_v19 = vadd.f32 %v669_v17, %v1058_v16  ;;  %v333_v20 = vadd.f32 %v717_v18, %v1058_v16 }
  0xe5   :  { %v167_v21 = vpop.f32.mrf.mxu0  ;;  %v327_v22 = vpop.f32.mrf.mxu1 }
  0xe6   :  { %487 = vst [vmem:[%s1319_s3 + $0x8] sm:$0xff] %v173_v19  ;;  %519 = vst [vmem:[%s1319_s3 + $0x108] sm:$0xff] %v333_v20  ;;  %v168_v23 = vadd.f32 %v1058_v16, %v167_v21  ;;  %v328_v24 = vadd.f32 %v1058_v16, %v327_v22 }
  0xe7   :  { %v672_v25 = vpop.f32.mrf.mxu0  ;;  %v720_v26 = vpop.f32.mrf.mxu1 }
  0xe8   :  { %486 = vst [vmem:[%s1319_s3] sm:$0xff] %v168_v23  ;;  %518 = vst [vmem:[%s1319_s3 + $0x100] sm:$0xff] %v328_v24  ;;  %v183_v27 = vadd.f32 %v672_v25, %v1058_v16  ;;  %v343_v28 = vadd.f32 %v720_v26, %v1058_v16 }
  0xe9   :  { %v177_v29 = vpop.f32.mrf.mxu0  ;;  %v337_v30 = vpop.f32.mrf.mxu1 }
  0xea   :  { %489 = vst [vmem:[%s1319_s3 + $0x18] sm:$0xff] %v183_v27  ;;  %521 = vst [vmem:[%s1319_s3 + $0x118] sm:$0xff] %v343_v28  ;;  %v178_v31 = vadd.f32 %v1058_v16, %v177_v29  ;;  %v338_v32 = vadd.f32 %v1058_v16, %v337_v30 }
  0xeb   :  { %v675_v33 = vpop.f32.mrf.mxu0  ;;  %v723_v34 = vpop.f32.mrf.mxu1 }
  0xec   :  { %488 = vst [vmem:[%s1319_s3 + $0x10] sm:$0xff] %v178_v31  ;;  %520 = vst [vmem:[%s1319_s3 + $0x110] sm:$0xff] %v338_v32  ;;  %v193_v35 = vadd.f32 %v675_v33, %v1058_v16  ;;  %v353_v36 = vadd.f32 %v723_v34, %v1058_v16 }
  0xed   :  { %v187_v37 = vpop.f32.mrf.mxu0  ;;  %v347_v38 = vpop.f32.mrf.mxu1 }
  0xee   :  { %491 = vst [vmem:[%s1319_s3 + $0x28] sm:$0xff] %v193_v35  ;;  %523 = vst [vmem:[%s1319_s3 + $0x128] sm:$0xff] %v353_v36  ;;  %v188_v39 = vadd.f32 %v1058_v16, %v187_v37  ;;  %v348_v40 = vadd.f32 %v1058_v16, %v347_v38 }
  0xef   :  { %v678_v41 = vpop.f32.mrf.mxu0  ;;  %v726_v42 = vpop.f32.mrf.mxu1 }
  0xf0   :  { %490 = vst [vmem:[%s1319_s3 + $0x20] sm:$0xff] %v188_v39  ;;  %522 = vst [vmem:[%s1319_s3 + $0x120] sm:$0xff] %v348_v40  ;;  %v203_v43 = vadd.f32 %v678_v41, %v1058_v16  ;;  %v363_v44 = vadd.f32 %v726_v42, %v1058_v16 }
  0xf1   :  { %v197_v45 = vpop.f32.mrf.mxu0  ;;  %v357_v46 = vpop.f32.mrf.mxu1 }
  0xf2   :  { %493 = vst [vmem:[%s1319_s3 + $0x38] sm:$0xff] %v203_v43  ;;  %525 = vst [vmem:[%s1319_s3 + $0x138] sm:$0xff] %v363_v44  ;;  %v198_v47 = vadd.f32 %v1058_v16, %v197_v45  ;;  %v358_v48 = vadd.f32 %v1058_v16, %v357_v46 }
  0xf3   :  { %v681_v49 = vpop.f32.mrf.mxu0  ;;  %v729_v50 = vpop.f32.mrf.mxu1 }
  0xf4   :  { %492 = vst [vmem:[%s1319_s3 + $0x30] sm:$0xff] %v198_v47  ;;  %524 = vst [vmem:[%s1319_s3 + $0x130] sm:$0xff] %v358_v48  ;;  %v213_v51 = vadd.f32 %v681_v49, %v1058_v16  ;;  %v373_v52 = vadd.f32 %v729_v50, %v1058_v16 }
  0xf5   :  { %v207_v53 = vpop.f32.mrf.mxu0  ;;  %v367_v54 = vpop.f32.mrf.mxu1 }
  0xf6   :  { %495 = vst [vmem:[%s1319_s3 + $0x48] sm:$0xff] %v213_v51  ;;  %527 = vst [vmem:[%s1319_s3 + $0x148] sm:$0xff] %v373_v52  ;;  %v208_v55 = vadd.f32 %v1058_v16, %v207_v53  ;;  %v368_v56 = vadd.f32 %v1058_v16, %v367_v54 }
  0xf7   :  { %v684_v57 = vpop.f32.mrf.mxu0  ;;  %v732_v58 = vpop.f32.mrf.mxu1 }
  0xf8   :  { %494 = vst [vmem:[%s1319_s3 + $0x40] sm:$0xff] %v208_v55  ;;  %526 = vst [vmem:[%s1319_s3 + $0x140] sm:$0xff] %v368_v56  ;;  %v223_v59 = vadd.f32 %v684_v57, %v1058_v16  ;;  %v383_v60 = vadd.f32 %v732_v58, %v1058_v16 }
  0xf9   :  { %v217_v61 = vpop.f32.mrf.mxu0  ;;  %v377_v62 = vpop.f32.mrf.mxu1 }
  0xfa   :  { %497 = vst [vmem:[%s1319_s3 + $0x58] sm:$0xff] %v223_v59  ;;  %529 = vst [vmem:[%s1319_s3 + $0x158] sm:$0xff] %v383_v60  ;;  %v218_v63 = vadd.f32 %v1058_v16, %v217_v61  ;;  %v378_v0 = vadd.f32 %v1058_v16, %v377_v62 }
  0xfb   :  { %v687_v1 = vpop.f32.mrf.mxu0  ;;  %v735_v2 = vpop.f32.mrf.mxu1 }
  0xfc   :  { %496 = vst [vmem:[%s1319_s3 + $0x50] sm:$0xff] %v218_v63  ;;  %528 = vst [vmem:[%s1319_s3 + $0x150] sm:$0xff] %v378_v0  ;;  %v233_v3 = vadd.f32 %v687_v1, %v1058_v16  ;;  %v393_v4 = vadd.f32 %v735_v2, %v1058_v16 }
  0xfd   :  { %v227_v5 = vpop.f32.mrf.mxu0  ;;  %v387_v6 = vpop.f32.mrf.mxu1 }
  0xfe   :  { %499 = vst [vmem:[%s1319_s3 + $0x68] sm:$0xff] %v233_v3  ;;  %531 = vst [vmem:[%s1319_s3 + $0x168] sm:$0xff] %v393_v4  ;;  %v228_v7 = vadd.f32 %v1058_v16, %v227_v5  ;;  %v388_v8 = vadd.f32 %v1058_v16, %v387_v6 }
  0xff   :  { %v690_v9 = vpop.f32.mrf.mxu0  ;;  %v738_v10 = vpop.f32.mrf.mxu1 }
 0x100   :  { %498 = vst [vmem:[%s1319_s3 + $0x60] sm:$0xff] %v228_v7  ;;  %530 = vst [vmem:[%s1319_s3 + $0x160] sm:$0xff] %v388_v8  ;;  %v243_v11 = vadd.f32 %v690_v9, %v1058_v16  ;;  %v403_v12 = vadd.f32 %v738_v10, %v1058_v16 }
 0x101   :  { %v237_v13 = vpop.f32.mrf.mxu0  ;;  %v397_v14 = vpop.f32.mrf.mxu1 }
 0x102   :  { %501 = vst [vmem:[%s1319_s3 + $0x78] sm:$0xff] %v243_v11  ;;  %533 = vst [vmem:[%s1319_s3 + $0x178] sm:$0xff] %v403_v12  ;;  %v238_v15 = vadd.f32 %v1058_v16, %v237_v13  ;;  %v398_v17 = vadd.f32 %v1058_v16, %v397_v14 }
 0x103   :  { %v693_v18 = vpop.f32.mrf.mxu0  ;;  %v741_v19 = vpop.f32.mrf.mxu1 }
 0x104   :  { %500 = vst [vmem:[%s1319_s3 + $0x70] sm:$0xff] %v238_v15  ;;  %532 = vst [vmem:[%s1319_s3 + $0x170] sm:$0xff] %v398_v17  ;;  %v253_v20 = vadd.f32 %v693_v18, %v1058_v16  ;;  %v413_v21 = vadd.f32 %v741_v19, %v1058_v16 }
 0x105   :  { %v247_v22 = vpop.f32.mrf.mxu0  ;;  %v407_v23 = vpop.f32.mrf.mxu1 }
 0x106   :  { %503 = vst [vmem:[%s1319_s3 + $0x88] sm:$0xff] %v253_v20  ;;  %535 = vst [vmem:[%s1319_s3 + $0x188] sm:$0xff] %v413_v21  ;;  %v248_v24 = vadd.f32 %v1058_v16, %v247_v22  ;;  %v408_v25 = vadd.f32 %v1058_v16, %v407_v23 }
 0x107   :  { %v696_v26 = vpop.f32.mrf.mxu0  ;;  %v744_v27 = vpop.f32.mrf.mxu1 }
 0x108   :  { %502 = vst [vmem:[%s1319_s3 + $0x80] sm:$0xff] %v248_v24  ;;  %534 = vst [vmem:[%s1319_s3 + $0x180] sm:$0xff] %v408_v25  ;;  %v263_v28 = vadd.f32 %v696_v26, %v1058_v16  ;;  %v423_v29 = vadd.f32 %v744_v27, %v1058_v16 }
 0x109   :  { %v257_v30 = vpop.f32.mrf.mxu0  ;;  %v417_v31 = vpop.f32.mrf.mxu1 }
 0x10a   :  { %505 = vst [vmem:[%s1319_s3 + $0x98] sm:$0xff] %v263_v28  ;;  %537 = vst [vmem:[%s1319_s3 + $0x198] sm:$0xff] %v423_v29  ;;  %v258_v32 = vadd.f32 %v1058_v16, %v257_v30  ;;  %v418_v33 = vadd.f32 %v1058_v16, %v417_v31 }
 0x10b   :  { %v699_v34 = vpop.f32.mrf.mxu0  ;;  %v747_v35 = vpop.f32.mrf.mxu1 }
 0x10c   :  { %504 = vst [vmem:[%s1319_s3 + $0x90] sm:$0xff] %v258_v32  ;;  %536 = vst [vmem:[%s1319_s3 + $0x190] sm:$0xff] %v418_v33  ;;  %v273_v36 = vadd.f32 %v699_v34, %v1058_v16  ;;  %v433_v37 = vadd.f32 %v747_v35, %v1058_v16 }
 0x10d   :  { %v267_v38 = vpop.f32.mrf.mxu0  ;;  %v427_v39 = vpop.f32.mrf.mxu1 }
 0x10e   :  { %507 = vst [vmem:[%s1319_s3 + $0xa8] sm:$0xff] %v273_v36  ;;  %539 = vst [vmem:[%s1319_s3 + $0x1a8] sm:$0xff] %v433_v37  ;;  %v268_v40 = vadd.f32 %v1058_v16, %v267_v38  ;;  %v428_v41 = vadd.f32 %v1058_v16, %v427_v39 }
 0x10f   :  { %v702_v42 = vpop.f32.mrf.mxu0  ;;  %v750_v43 = vpop.f32.mrf.mxu1 }
 0x110   :  { %506 = vst [vmem:[%s1319_s3 + $0xa0] sm:$0xff] %v268_v40  ;;  %538 = vst [vmem:[%s1319_s3 + $0x1a0] sm:$0xff] %v428_v41  ;;  %v283_v44 = vadd.f32 %v702_v42, %v1058_v16  ;;  %v443_v45 = vadd.f32 %v750_v43, %v1058_v16 }
 0x111   :  { %v277_v46 = vpop.f32.mrf.mxu0  ;;  %v437_v47 = vpop.f32.mrf.mxu1 }
 0x112   :  { %509 = vst [vmem:[%s1319_s3 + $0xb8] sm:$0xff] %v283_v44  ;;  %541 = vst [vmem:[%s1319_s3 + $0x1b8] sm:$0xff] %v443_v45  ;;  %v278_v48 = vadd.f32 %v1058_v16, %v277_v46  ;;  %v438_v49 = vadd.f32 %v1058_v16, %v437_v47 }
 0x113   :  { %v705_v50 = vpop.f32.mrf.mxu0  ;;  %v753_v51 = vpop.f32.mrf.mxu1 }
 0x114   :  { %508 = vst [vmem:[%s1319_s3 + $0xb0] sm:$0xff] %v278_v48  ;;  %540 = vst [vmem:[%s1319_s3 + $0x1b0] sm:$0xff] %v438_v49  ;;  %v293_v52 = vadd.f32 %v705_v50, %v1058_v16  ;;  %v453_v53 = vadd.f32 %v753_v51, %v1058_v16 }
 0x115   :  { %v287_v54 = vpop.f32.mrf.mxu0  ;;  %v447_v55 = vpop.f32.mrf.mxu1 }
 0x116   :  { %511 = vst [vmem:[%s1319_s3 + $0xc8] sm:$0xff] %v293_v52  ;;  %543 = vst [vmem:[%s1319_s3 + $0x1c8] sm:$0xff] %v453_v53  ;;  %v288_v56 = vadd.f32 %v1058_v16, %v287_v54  ;;  %v448_v57 = vadd.f32 %v1058_v16, %v447_v55 }
 0x117   :  { %v708_v58 = vpop.f32.mrf.mxu0  ;;  %v756_v59 = vpop.f32.mrf.mxu1 }
 0x118   :  { %510 = vst [vmem:[%s1319_s3 + $0xc0] sm:$0xff] %v288_v56  ;;  %542 = vst [vmem:[%s1319_s3 + $0x1c0] sm:$0xff] %v448_v57  ;;  %v303_v60 = vadd.f32 %v708_v58, %v1058_v16  ;;  %v463_v61 = vadd.f32 %v756_v59, %v1058_v16 }
 0x119   :  { %v297_v62 = vpop.f32.mrf.mxu0  ;;  %v457_v63 = vpop.f32.mrf.mxu1 }
 0x11a   :  { %513 = vst [vmem:[%s1319_s3 + $0xd8] sm:$0xff] %v303_v60  ;;  %545 = vst [vmem:[%s1319_s3 + $0x1d8] sm:$0xff] %v463_v61  ;;  %v298_v0 = vadd.f32 %v1058_v16, %v297_v62  ;;  %v458_v1 = vadd.f32 %v1058_v16, %v457_v63 }
 0x11b   :  { %v711_v2 = vpop.f32.mrf.mxu0  ;;  %v759_v3 = vpop.f32.mrf.mxu1 }
 0x11c   :  { %512 = vst [vmem:[%s1319_s3 + $0xd0] sm:$0xff] %v298_v0  ;;  %544 = vst [vmem:[%s1319_s3 + $0x1d0] sm:$0xff] %v458_v1  ;;  %v313_v4 = vadd.f32 %v711_v2, %v1058_v16  ;;  %v473_v5 = vadd.f32 %v759_v3, %v1058_v16 }
 0x11d   :  { %v307_v6 = vpop.f32.mrf.mxu0  ;;  %v467_v7 = vpop.f32.mrf.mxu1 }
 0x11e   :  { %515 = vst [vmem:[%s1319_s3 + $0xe8] sm:$0xff] %v313_v4  ;;  %547 = vst [vmem:[%s1319_s3 + $0x1e8] sm:$0xff] %v473_v5  ;;  %v308_v8 = vadd.f32 %v1058_v16, %v307_v6  ;;  %v468_v9 = vadd.f32 %v1058_v16, %v467_v7 }
 0x11f   :  { %v714_v10 = vpop.f32.mrf.mxu0  ;;  %v762_v11 = vpop.f32.mrf.mxu1 }
 0x120   :  { %514 = vst [vmem:[%s1319_s3 + $0xe0] sm:$0xff] %v308_v8  ;;  %546 = vst [vmem:[%s1319_s3 + $0x1e0] sm:$0xff] %v468_v9  ;;  %v323_v12 = vadd.f32 %v714_v10, %v1058_v16  ;;  %v483_v13 = vadd.f32 %v762_v11, %v1058_v16 }
 0x121   :  { %v317_v14 = vpop.f32.mrf.mxu0  ;;  %v477_v15 = vpop.f32.mrf.mxu1 }
 0x122   :  { %517 = vst [vmem:[%s1319_s3 + $0xf8] sm:$0xff] %v323_v12  ;;  %549 = vst [vmem:[%s1319_s3 + $0x1f8] sm:$0xff] %v483_v13  ;;  %v318_v17 = vadd.f32 %v1058_v16, %v317_v14  ;;  %v478_v18 = vadd.f32 %v1058_v16, %v477_v15 }
 0x124   :  { %516 = vst [vmem:[%s1319_s3 + $0xf0] sm:$0xff] %v318_v17  ;;  %548 = vst [vmem:[%s1319_s3 + $0x1f0] sm:$0xff] %v478_v18 }

// kernel: _lambda_.13
= control target key start
LH: loop header
LB: loop body
LE: loop exit
PB: predicated region body
PF: predicated region fallthrough
CT: control target
= control target key end

     0   :  { %s143_s1 = inlined_call_operand.vmem [shape: f32[4,128], index: 1, kind: input, shape index: {}, may-alias: {1,3}]   ;;  %s144_s3 = inlined_call_operand.vmem [shape: f32[4,128], index: 3, kind: input, shape index: {}, may-alias: {1,3}]   ;;  %s145_s5 = inlined_call_operand.vmem [shape: f32[4,128], index: 5, kind: output, shape index: {1}]   ;;  %s146_s2 = inlined_call_operand.vmem [shape: f32[4,128], index: 2, kind: input, shape index: {}, may-alias: {0,2}]   ;;  %s147_s0 = inlined_call_operand.vmem [shape: f32[4,128], index: 0, kind: input, shape index: {}, may-alias: {0,2}]   ;;  %s148_s6 = inlined_call_operand.vmem [shape: f32[4,128], index: 6, kind: output, shape index: {2}]   ;;  %s149_s4 = inlined_call_operand.vmem [shape: f32[4,128], index: 4, kind: output, shape index: {0}]  }
   0x1   :  { %v20_v0 = vld [vmem:[%s143_s1] sm:$0xf] }
   0x2   :  { %v36_v1 = vld [vmem:[%s144_s3] sm:$0xf]  ;;  %v22_v2 = vand.u32 2147483647, %v20_v0  ;;  %v21_v20 = vmax.f32 %v20_v0, 0.0 }
   0x3   :  { %v38_v3 = vand.u32 2147483647, %v36_v1  ;;  %v37_v24 = vmax.f32 %v36_v1, 0.0  ;;  %v59_v33 = vld [vmem:[%s146_s2] sm:$0xf] }
   0x4   :  { %v23_v4 = vsub.f32 0.0, %v22_v2  ;;  %v57_v35 = vld [vmem:[%s147_s0] sm:$0xf] }
   0x5   :  { %v39_v5 = vsub.f32 0.0, %v38_v3 }
   0x6   :  { %v24_v6 = vmul.f32 1.442695, %v23_v4 }
   0x7   :  { %v40_v7 = vmul.f32 1.442695, %v39_v5 }
   0x8   :  { %77 = vpow2.f32 %v24_v6 }
   0x9   :  { %79 = vpow2.f32 %v40_v7 }
  0x15   :  { %v78_v8 = vpop.eup %77 }
  0x16   :  { %v80_v9 = vpop.eup %79  ;;  %v26_v10 = vadd.f32 1.0, %v78_v8  ;;  %v29_v12 = vmul.f32 -0.5, %v78_v8  ;;  %v32_v15 = vand.u32 2147483647, %v78_v8 }
  0x17   :  { %v42_v11 = vadd.f32 1.0, %v80_v9  ;;  %v45_v13 = vmul.f32 -0.5, %v80_v9  ;;  %v48_v17 = vand.u32 2147483647, %v80_v9 }
  0x18   :  { %81 = vlog2.f32 %v26_v10  ;;  %v30_v14 = vadd.f32 1.0, %v29_v12  ;;  %vm33_vm0 = vcmp.lt.f32.partialorder %v32_v15, 0.0004427343 }
  0x19   :  { %83 = vlog2.f32 %v42_v11  ;;  %v46_v16 = vadd.f32 1.0, %v45_v13  ;;  %vm49_vm1 = vcmp.lt.f32.partialorder %v48_v17, 0.0004427343 }
  0x1a   :  { %v31_v18 = vmul.f32 %v78_v8, %v30_v14 }
  0x1b   :  { %v47_v21 = vmul.f32 %v80_v9, %v46_v16 }
  0x25   :  { %v82_v19 = vpop.eup %81 }
  0x26   :  { %v84_v22 = vpop.eup %83  ;;  %v28_v23 = vmul.f32 0.6931472, %v82_v19 }
  0x27   :  { %v44_v25 = vmul.f32 0.6931472, %v84_v22 }
  0x28   :  { %v34_v26 = vsel %vm33_vm0, %v31_v18, %v28_v23 }
  0x29   :  { %v35_v27 = vadd.f32 %v34_v26, %v21_v20  ;;  %v50_v28 = vsel %vm49_vm1, %v47_v21, %v44_v25 }
  0x2a   :  { %v51_v29 = vadd.f32 %v50_v28, %v37_v24 }
  0x2b   :  { %63 = vst [vmem:[%s145_s5] sm:$0xf] %v35_v27 }
  0x2c   :  { %v52_v30 = vadd.f32 %v51_v29, %v35_v27 }
  0x2e   :  { %v53_v31 = vadd.f32 1e-06, %v52_v30 }
  0x30   :  { %85 = vrcp.f32 %v53_v31 }
  0x3d   :  { %v86_v32 = vpop.eup %85 }
  0x3e   :  { %v55_v34 = vmul.f32 %v86_v32, %v51_v29 }
  0x40   :  { %v56_v36 = vsub.f32 1.0, %v55_v34  ;;  %v60_v37 = vmul.f32 %v59_v33, %v55_v34  ;;  %64 = vst [vmem:[%s148_s6] sm:$0xf] %v55_v34 }
  0x42   :  { %v58_v38 = vmul.f32 %v57_v35, %v56_v36 }
  0x44   :  { %v61_v39 = vadd.f32 %v60_v37, %v58_v38 }
  0x46   :  { %62 = vst [vmem:[%s149_s4] sm:$0xf] %v61_v39 }

</bundles_post_ra>
